<compile_context>
chip_gen: v7x
topology: tpu7x:2x2x1
jax: 0.10.0
libtpu: 0.0.40
codegen_flags: <defaults>
</compile_context>

<pallas_src>
import jax
import jax.numpy as jnp
from jax.experimental import pallas as pl
from jax.experimental.pallas import tpu as pltpu


def _add_relu_conv1x1_kernel(x12_ref, x14_ref, w_ref, o_ref):
    # x12_ref, x14_ref: (Cin, tp) f32 tiles (channels x pixels)
    # w_ref:            (Cout, Cin) bf16 full weight
    # o_ref:            (Cout, tp) f32 output tile
    z = jnp.maximum(x12_ref[...] + x14_ref[...], 0.0)      # add + ReLU on the VPU (f32)
    zb = z.astype(w_ref.dtype)                              # bf16 -> native MXU path
    o_ref[...] = jnp.dot(
        w_ref[...], zb, preferred_element_type=jnp.float32  # 1x1 conv == matmul (MXU)
    ).astype(o_ref.dtype)


def add_relu_conv1x1(x12_nchw, x14_nchw, weight_oi, *, tp=512,
                     mxu_dtype=jnp.bfloat16):
    """Fused relu(x12 + x14) -> 1x1 conv (no bias), all in NCHW layout.

    x12_nchw, x14_nchw: (N, Cin, H, W) float32
    weight_oi:          (Cout, Cin) float32  (PyTorch conv weight squeezed)
    tp:                 spatial (lane) tile, multiple of 128.
    """
    N, Cin, H, W = x12_nchw.shape
    Cout, Cin_w = weight_oi.shape
    assert Cin_w == Cin
    assert tp % 128 == 0, "spatial tile must be a multiple of 128 lanes"

    P = H * W
    # Free reshapes: NCHW is contiguous, so (N, Cin, H, W) -> (N, Cin, H*W) moves no data.
    x12 = x12_nchw.reshape(N, Cin, P)
    x14 = x14_nchw.reshape(N, Cin, P)
    w = weight_oi.astype(mxu_dtype)  # tiny (Cout, Cin); cast once

    grid = (N, pl.cdiv(P, tp))  # edge spatial tile is masked automatically

    itemsize = jnp.dtype(x12_nchw.dtype).itemsize
    cost = pl.CostEstimate(
        flops=2 * N * P * Cin * Cout,
        transcendentals=0,
        bytes_accessed=(2 * N * Cin * P * itemsize          # two activation reads
                        + Cout * Cin * jnp.dtype(mxu_dtype).itemsize
                        + N * Cout * P * itemsize),          # output write
    )

    out_flat = pl.pallas_call(
        _add_relu_conv1x1_kernel,
        out_shape=jax.ShapeDtypeStruct((N, Cout, P), x12_nchw.dtype),
        grid_spec=pltpu.PrefetchScalarGridSpec(
            num_scalar_prefetch=0,
            grid=grid,
            in_specs=[
                pl.BlockSpec((None, Cin, tp), lambda n, p: (n, 0, p)),
                pl.BlockSpec((None, Cin, tp), lambda n, p: (n, 0, p)),
                pl.BlockSpec((Cout, Cin), lambda n, p: (0, 0)),  # weight resident
            ],
            out_specs=pl.BlockSpec((None, Cout, tp), lambda n, p: (n, 0, p)),
        ),
        compiler_params=pltpu.CompilerParams(
            dimension_semantics=("parallel", "parallel")),
        cost_estimate=cost,
    )(x12, x14, w)

    # (N, Cout, H*W) -> (N, Cout, H, W): free reshape, already NCHW.
    return out_flat.reshape(N, Cout, H, W)


if __name__ == "__main__":
    key = jax.random.PRNGKey(0)
    k1, k2, k3 = jax.random.split(key, 3)

    # Shapes from the PyTorch module: x12, x14 = (1, 256, 56, 56); Conv2d(256, 128, 1x1).
    N, Cin, Cout, H, W = 1, 256, 128, 56, 56
    x12 = jax.random.normal(k1, (N, Cin, H, W), dtype=jnp.float32)
    x14 = jax.random.normal(k2, (N, Cin, H, W), dtype=jnp.float32)
    # PyTorch weight shape (Cout, Cin, 1, 1) -> squeeze to (Cout, Cin).
    weight4d = jax.random.normal(k3, (Cout, Cin, 1, 1), dtype=jnp.float32) * 0.05
    weight = weight4d[:, :, 0, 0]

    out = add_relu_conv1x1(x12, x14, weight)
    out = jax.block_until_ready(out)
    assert out.shape == (N, Cout, H, W)

    # References.
    z_f32 = jnp.maximum(x12 + x14, 0.0)
    # (a) Mirror of the kernel's precision (bf16 operands, f32 accumulation): tight check.
    ref_mirror = jnp.einsum(
        "nchw,oc->nohw",
        z_f32.astype(jnp.bfloat16), weight.astype(jnp.bfloat16),
        preferred_element_type=jnp.float32)
    assert jnp.allclose(out, ref_mirror, atol=1e-2, rtol=1e-2)
    # (b) Full-f32 module semantics: loose check (bf16 MXU operands trade ~1e-2 rel. error).
    ref_f32 = jnp.einsum("nchw,oc->nohw", z_f32, weight)
    assert jnp.allclose(out, ref_f32, atol=1e-1, rtol=1e-1)

    print("KERNEL_OK")
</pallas_src>

<mosaic_0001>
module attributes {stable_mosaic.version = 11 : i64} {
  func.func @_add_relu_conv1x1_kernel(%arg0: i32, %arg1: i32, %arg2: memref<1x256x512xf32, #tpu.memory_space<vmem>>, %arg3: memref<1x256x512xf32, #tpu.memory_space<vmem>>, %arg4: memref<128x256xbf16, #tpu.memory_space<vmem>>, %arg5: memref<1x128x512xf32, #tpu.memory_space<vmem>>) attributes {dimension_semantics = [#tpu.dimension_semantics<parallel>, #tpu.dimension_semantics<parallel>], iteration_bounds = array<i64: 1, 7>, scalar_prefetch = 0 : i64, scratch_operands = 0 : i64, tpu.core_type = #tpu.core_type<tc>, window_params = [{transform_indices = @transform_0, window_bounds = array<i64: 1, 256, 512>}, {transform_indices = @transform_1, window_bounds = array<i64: 1, 256, 512>}, {pipeline_mode = #tpu.pipeline_mode<synchronous>, transform_indices = @transform_2, window_bounds = array<i64: 128, 256>}, {transform_indices = @transform_3, window_bounds = array<i64: 1, 128, 512>}]} {
    %c0 = arith.constant 0 : index
    %c0_0 = arith.constant 0 : index
    %c0_1 = arith.constant 0 : index
    %0 = vector.load %arg2[%c0, %c0_0, %c0_1] : memref<1x256x512xf32, #tpu.memory_space<vmem>>, vector<1x256x512xf32>
    %1 = vector.shape_cast %0 : vector<1x256x512xf32> to vector<256x512xf32>
    %c0_2 = arith.constant 0 : index
    %c0_3 = arith.constant 0 : index
    %c0_4 = arith.constant 0 : index
    %2 = vector.load %arg3[%c0_2, %c0_3, %c0_4] : memref<1x256x512xf32, #tpu.memory_space<vmem>>, vector<1x256x512xf32>
    %3 = vector.shape_cast %2 : vector<1x256x512xf32> to vector<256x512xf32>
    %4 = arith.addf %1, %3 : vector<256x512xf32>
    %cst = arith.constant 0.000000e+00 : f32
    %5 = vector.broadcast %cst : f32 to vector<256x512xf32>
    %6 = arith.maximumf %4, %5 : vector<256x512xf32>
    %7 = arith.truncf %6 : vector<256x512xf32> to vector<256x512xbf16>
    %c0_5 = arith.constant 0 : index
    %c0_6 = arith.constant 0 : index
    %8 = vector.load %arg4[%c0_5, %c0_6] : memref<128x256xbf16, #tpu.memory_space<vmem>>, vector<128x256xbf16>
    %cst_7 = arith.constant dense<0.000000e+00> : vector<128x512xf32>
    %9 = tpu.matmul %8, %7, %cst_7 {dimension_numbers = #tpu.dot_dimension_numbers<[1], [0], [0], [1], [0, 0, 1, 1], [], []>} : vector<128x256xbf16>, vector<256x512xbf16>, vector<128x512xf32> -> vector<128x512xf32>
    %c0_8 = arith.constant 0 : index
    %c0_9 = arith.constant 0 : index
    %c0_10 = arith.constant 0 : index
    %10 = vector.load %arg5[%c0_8, %c0_9, %c0_10] : memref<1x128x512xf32, #tpu.memory_space<vmem>>, vector<1x128x512xf32>
    %11 = vector.shape_cast %10 : vector<1x128x512xf32> to vector<128x512xf32>
    %12 = vector.shape_cast %9 : vector<128x512xf32> to vector<1x128x512xf32>
    tpu.vector_store %arg5[%c0_8, %c0_9, %c0_10], %12 {strides = array<i32>} : memref<1x128x512xf32, #tpu.memory_space<vmem>>, vector<1x128x512xf32>,
    return
  }
  func.func @transform_0(%arg0: i32, %arg1: i32) -> (i32, i32, i32) {
    %c0_i32 = arith.constant 0 : i32
    %c0_i32_0 = arith.constant 0 : i32
    return %arg0, %c0_i32, %arg1 : i32, i32, i32
  }
  func.func @transform_1(%arg0: i32, %arg1: i32) -> (i32, i32, i32) {
    %c0_i32 = arith.constant 0 : i32
    %c0_i32_0 = arith.constant 0 : i32
    return %arg0, %c0_i32, %arg1 : i32, i32, i32
  }
  func.func @transform_2(%arg0: i32, %arg1: i32) -> (i32, i32) {
    %c0_i32 = arith.constant 0 : i32
    %c0_i32_0 = arith.constant 0 : i32
    %c0_i32_1 = arith.constant 0 : i32
    return %c0_i32, %c0_i32_0 : i32, i32
  }
  func.func @transform_3(%arg0: i32, %arg1: i32) -> (i32, i32, i32) {
    %c0_i32 = arith.constant 0 : i32
    %c0_i32_0 = arith.constant 0 : i32
    return %arg0, %c0_i32, %arg1 : i32, i32, i32
  }
}

</mosaic_0001>

<bundles_post_ra>
// kernel: tpu_custom_call.1
= control target key start
LH: loop header
LB: loop body
LE: loop exit
PB: predicated region body
PF: predicated region fallthrough
CT: control target
= control target key end

     0   :  { %s7271_s0 = inlined_call_operand.vmem [shape: f32[1,256,3136], index: 0, kind: input, shape index: {}]   ;;  %s7272_s1 = inlined_call_operand.vmem [shape: f32[1,256,3136], index: 1, kind: input, shape index: {}]   ;;  %s7273_s2 = inlined_call_operand.vmem [shape: bf16[128,256], index: 2, kind: input, shape index: {}]   ;;  %s7274_s3 = inlined_call_operand.vmem [shape: f32[1,128,3136], index: 3, kind: output, shape index: {}]  }
   0x1   :  { %7275 = sst [smem:[#allocation5_spill]] %s7271_s0 }
   0x2   :  { %s4400_s12 = smov 0   ;;  %s4402_s13 = smov 0  }
   0x3   :  { %s4404_s14 = smov 0   ;;  %s4406_s15 = smov 0  }
   0x4   :  { %s4408_s16 = smov 0  }
   0x5 LB: > { %s22_s17 = sadd.s32 1, %s4176_s15  ;;  %s3374_s18 = sadd.s32 4294967295, %s4180_s16   ;;  %s4180_s16 = sphi %s4408_s16, %s13_s16   ;;  %s4176_s15 = sphi %s4406_s15, %s7338_s15   ;;  %s4172_s14 = sphi %s4404_s14, %s7337_s14   ;;  %s4168_s13 = sphi %s4402_s13, %s7336_s13   ;;  %s4164_s12 = sphi %s4400_s12, %s7335_s12  }
   0x6   : > { %p23_p0 = scmp.ge.s32.totalorder %s22_s17, 7  ;;  %p41_p1 = scmp.ne.s32.totalorder %s4168_s13, %s4164_s12 }
   0x7   : > { %p42_p2 = scmp.eq.s32.totalorder %s4180_s16, 0  ;;  %p122_p4 = scmp.eq.s32.totalorder %s3374_s18, 6 }
   0x8   : > { %s7340_s17 = smov (%p23_p0, %s22_s17), 0  ;;  %s34_s21 = sadd.s32 1, %s4168_s13 }
   0x9   : > { %p4432_p3 = por %p42_p2, %p41_p1  ;;  %s30_s20 = ssub.s32 %s4176_s15, %s7340_s17 }
   0xa   : > { %p32_p5 = scmp.eq.s32.totalorder %s30_s20, 0  ;;  %p4439_p6 = por %p122_p4, %p41_p1 }
   0xb   : > { %p3377_p7 = scmp.ge.s32.totalorder %s4180_s16, 7 }
   0xc   : > { %s4444_s23 = scalar_select %p32_p5, %s4168_s13, %s34_s21  }
   0xd   : > { %147 = sbr.rel (%p3377_p7) target bundleno = 504 (0x1f8), region = 20 }
  0x14   : > { %150 = sbr.rel (!%p4432_p3) target bundleno = 262 (0x106), region = 24  ;;  %s152_s24 = sand.u32 (%p4432_p3), 1, %s4168_s13  }
  0x15   : > { %s3379_s25 = sshll.u32 (%p4432_p3), %s4176_s15, 2  ;;  %s3378_s26 = sshll.u32 (%p4432_p3), %s152_s24, 10 }
  0x16   : > { %s156_s27 = ssub.s32 (%p4432_p3), 25, %s3379_s25  ;;  %s3481_s28 = sshll.u32 (%p4432_p3), %s4176_s15, 5 }
  0x17   : > { %p157_p8 = scmp.lt.s32.totalorder (%p4432_p3), %s156_s27, 4  ;;  %s7278_s0 = sld [smem:[#allocation5_spill]] (%p4432_p3) }
  0x18   : > { %s4459_s7 = scalar_lea.vmem (%p4432_p3), [#allocation2], %s3378_s26  }
  0x1b   : > { %s7342_s27 = smov (!%p157_p8, %s156_s27), 4 }
  0x1c   : > { %s3380_s5 = sshll.u32 %s7342_s27, 12  ;;  %s4457_s6 = sshll.u32 %s7342_s27, 3 }
  0x1d   : > { %s4455_s4 = scalar_lea.vmem %s7278_s0, %s3481_s28   ;;  %p3384_p9 = scmp.eq.s32.totalorder %s3380_s5, 0 }
  0x1e   : > { %p169_p10 = scmp.lt.u32.totalorder (!%p3384_p9), %s4457_s6, 8 }
  0x1f   : > { %168 = sbr.rel (%p3384_p9) target bundleno = 262 (0x106), region = 28 }
  0x26   : > { %172 = sbr.rel (%p169_p10) target bundleno = 227 (0xe3), region = 32  ;;  %s4463_s8 = sand.u32 (!%p169_p10), 7, %s4457_s6  }
  0x27   : > { %p250_p11 = scmp.eq.s32.totalorder (!%p169_p10), %s4463_s8, 0  ;;  %p3385_p12 = scmp.ne.s32.totalorder (!%p169_p10), %s4463_s8, 0 }
  0x2d   : > { %253 = sbr.rel (%p3385_p12) target bundleno = 119 (0x77), region = 47  ;;  %s254_s9 = sshrl.u32 (!%p3385_p12), %s4457_s6, 3 }
  0x2e   : > { %s4470_s10 = sshrl.u32 (!%p3385_p12), %s254_s9, 1 }
  0x2f   : > { %p3386_p13 = scmp.le.s32.totalorder (!%p3385_p12), %s4470_s10, 0 }
  0x34   : > { %3176 = sbr.rel (%p3386_p13) target bundleno = 92 (0x5c), region = 321  ;;  %s7279_s11 = smov (!%p3386_p13), %s4459_s7 }
  0x35   : > { %s7280_s18 = smov (!%p3386_p13), %s4455_s4  ;;  %s4479_s20 = smov (!%p3386_p13), 0  }
  0x36   : > { %s4481_s21 = smov (!%p3386_p13), 0  }
  0x3b LB: >> { %v267_v0 = vld [vmem:[%s4188_s18] sm:$0xff]  ;;  %v269_v1 = vld [vmem:[%s4188_s18 + $0x8] sm:$0xff]  ;;  %s395_s24 = sadd.s32 1, %s4192_s20  ;;  %v273_v3 = vld [vmem:[%s4188_s18 + $0xd0] sm:$0xff]  ;;  %s261_s21 = sadd.s32 1, %s4196_s21   ;;  %s4196_s21 = sphi %s4481_s21, %s261_s21   ;;  %s4192_s20 = sphi %s4479_s20, %s7283_s20   ;;  %s4188_s18 = sphi %s7280_s18, %s7282_s18   ;;  %s4184_s11 = sphi %s7279_s11, %s7281_s11  }
  0x3c   : >> { %v271_v2 = vld [vmem:[%s4188_s18 + $0xc8] sm:$0xff]  ;;  %268 = vst [vmem:[%s4184_s11] sm:$0xff] %v267_v0  ;;  %270 = vst [vmem:[%s4184_s11 + $0x8] sm:$0xff] %v269_v1  ;;  %v275_v4 = vld [vmem:[%s4188_s18 + $0x190] sm:$0xff]  ;;  %p396_p0 = scmp.ge.s32.totalorder %s395_s24, %s4470_s10  ;;  %p260_p1 = scmp.ge.s32.totalorder %s261_s21, %s4470_s10 }
  0x3d   : >> { %272 = vst [vmem:[%s4184_s11 + $0x20] sm:$0xff] %v271_v2  ;;  %v277_v5 = vld [vmem:[%s4188_s18 + $0x198] sm:$0xff]  ;;  %274 = vst [vmem:[%s4184_s11 + $0x28] sm:$0xff] %v273_v3  ;;  %v281_v7 = vld [vmem:[%s4188_s18 + $0x260] sm:$0xff] }
  0x3e   : >> { %276 = vst [vmem:[%s4184_s11 + $0x40] sm:$0xff] %v275_v4  ;;  %278 = vst [vmem:[%s4184_s11 + $0x48] sm:$0xff] %v277_v5  ;;  %v279_v6 = vld [vmem:[%s4188_s18 + $0x258] sm:$0xff]  ;;  %v283_v8 = vld [vmem:[%s4188_s18 + $0x320] sm:$0xff]  ;;  %s7344_s24 = smov (%p396_p0, %s395_s24), 0 }
  0x3f   : >> { %280 = vst [vmem:[%s4184_s11 + $0x60] sm:$0xff] %v279_v6  ;;  %282 = vst [vmem:[%s4184_s11 + $0x68] sm:$0xff] %v281_v7  ;;  %v285_v9 = vld [vmem:[%s4188_s18 + $0x328] sm:$0xff]  ;;  %v289_v11 = vld [vmem:[%s4188_s18 + $0x3f0] sm:$0xff]  ;;  %s3387_s25 = sshll.u32 %s7344_s24, 4  ;;  %s7283_s20 = smov %s7344_s24 }
  0x40   : >> { %284 = vst [vmem:[%s4184_s11 + $0x80] sm:$0xff] %v283_v8  ;;  %v287_v10 = vld [vmem:[%s4188_s18 + $0x3e8] sm:$0xff]  ;;  %286 = vst [vmem:[%s4184_s11 + $0x88] sm:$0xff] %v285_v9  ;;  %v291_v12 = vld [vmem:[%s4188_s18 + $0x4b0] sm:$0xff]  ;;  %s4537_s26 = scalar_lea.vmem %s4455_s4, %s3387_s25   ;;  %s4540_s27 = scalar_lea.vmem %s4459_s7, %s3387_s25 [#allocation2]  }
  0x41   : >> { %288 = vst [vmem:[%s4184_s11 + $0xa0] sm:$0xff] %v287_v10  ;;  %290 = vst [vmem:[%s4184_s11 + $0xa8] sm:$0xff] %v289_v11  ;;  %v293_v13 = vld [vmem:[%s4188_s18 + $0x4b8] sm:$0xff]  ;;  %v297_v15 = vld [vmem:[%s4188_s18 + $0x580] sm:$0xff] }
  0x42   : >> { %v295_v14 = vld [vmem:[%s4188_s18 + $0x578] sm:$0xff]  ;;  %292 = vst [vmem:[%s4184_s11 + $0xc0] sm:$0xff] %v291_v12  ;;  %294 = vst [vmem:[%s4184_s11 + $0xc8] sm:$0xff] %v293_v13  ;;  %v299_v16 = vld [vmem:[%s4188_s18 + $0x640] sm:$0xff] }
  0x43   : >> { %296 = vst [vmem:[%s4184_s11 + $0xe0] sm:$0xff] %v295_v14  ;;  %v301_v17 = vld [vmem:[%s4188_s18 + $0x648] sm:$0xff]  ;;  %298 = vst [vmem:[%s4184_s11 + $0xe8] sm:$0xff] %v297_v15  ;;  %v305_v19 = vld [vmem:[%s4188_s18 + $0x710] sm:$0xff] }
  0x44   : >> { %300 = vst [vmem:[%s4184_s11 + $0x100] sm:$0xff] %v299_v16  ;;  %302 = vst [vmem:[%s4184_s11 + $0x108] sm:$0xff] %v301_v17  ;;  %v303_v18 = vld [vmem:[%s4188_s18 + $0x708] sm:$0xff]  ;;  %v307_v20 = vld [vmem:[%s4188_s18 + $0x7d0] sm:$0xff] }
  0x45   : >> { %304 = vst [vmem:[%s4184_s11 + $0x120] sm:$0xff] %v303_v18  ;;  %306 = vst [vmem:[%s4184_s11 + $0x128] sm:$0xff] %v305_v19  ;;  %v309_v21 = vld [vmem:[%s4188_s18 + $0x7d8] sm:$0xff]  ;;  %v313_v23 = vld [vmem:[%s4188_s18 + $0x8a0] sm:$0xff] }
  0x46   : >> { %308 = vst [vmem:[%s4184_s11 + $0x140] sm:$0xff] %v307_v20  ;;  %v311_v22 = vld [vmem:[%s4188_s18 + $0x898] sm:$0xff]  ;;  %310 = vst [vmem:[%s4184_s11 + $0x148] sm:$0xff] %v309_v21  ;;  %v315_v24 = vld [vmem:[%s4188_s18 + $0x960] sm:$0xff] }
  0x47   : >> { %312 = vst [vmem:[%s4184_s11 + $0x160] sm:$0xff] %v311_v22  ;;  %314 = vst [vmem:[%s4184_s11 + $0x168] sm:$0xff] %v313_v23  ;;  %v317_v25 = vld [vmem:[%s4188_s18 + $0x968] sm:$0xff]  ;;  %v321_v27 = vld [vmem:[%s4188_s18 + $0xa30] sm:$0xff] }
  0x48   : >> { %v319_v26 = vld [vmem:[%s4188_s18 + $0xa28] sm:$0xff]  ;;  %316 = vst [vmem:[%s4184_s11 + $0x180] sm:$0xff] %v315_v24  ;;  %318 = vst [vmem:[%s4184_s11 + $0x188] sm:$0xff] %v317_v25  ;;  %v323_v28 = vld [vmem:[%s4188_s18 + $0xaf0] sm:$0xff] }
  0x49   : >> { %320 = vst [vmem:[%s4184_s11 + $0x1a0] sm:$0xff] %v319_v26  ;;  %v325_v29 = vld [vmem:[%s4188_s18 + $0xaf8] sm:$0xff]  ;;  %322 = vst [vmem:[%s4184_s11 + $0x1a8] sm:$0xff] %v321_v27  ;;  %v329_v31 = vld [vmem:[%s4188_s18 + $0xbc0] sm:$0xff] }
  0x4a   : >> { %324 = vst [vmem:[%s4184_s11 + $0x1c0] sm:$0xff] %v323_v28  ;;  %326 = vst [vmem:[%s4184_s11 + $0x1c8] sm:$0xff] %v325_v29  ;;  %v327_v30 = vld [vmem:[%s4188_s18 + $0xbb8] sm:$0xff]  ;;  %v331_v32 = vld [vmem:[%s4188_s18 + $0xc80] sm:$0xff] }
  0x4b   : >> { %328 = vst [vmem:[%s4184_s11 + $0x1e0] sm:$0xff] %v327_v30  ;;  %330 = vst [vmem:[%s4184_s11 + $0x1e8] sm:$0xff] %v329_v31  ;;  %v333_v33 = vld [vmem:[%s4188_s18 + $0xc88] sm:$0xff]  ;;  %v337_v35 = vld [vmem:[%s4188_s18 + $0xd50] sm:$0xff] }
  0x4c   : >> { %332 = vst [vmem:[%s4184_s11 + $0x200] sm:$0xff] %v331_v32  ;;  %v335_v34 = vld [vmem:[%s4188_s18 + $0xd48] sm:$0xff]  ;;  %334 = vst [vmem:[%s4184_s11 + $0x208] sm:$0xff] %v333_v33  ;;  %v339_v36 = vld [vmem:[%s4188_s18 + $0xe10] sm:$0xff] }
  0x4d   : >> { %336 = vst [vmem:[%s4184_s11 + $0x220] sm:$0xff] %v335_v34  ;;  %338 = vst [vmem:[%s4184_s11 + $0x228] sm:$0xff] %v337_v35  ;;  %v341_v37 = vld [vmem:[%s4188_s18 + $0xe18] sm:$0xff]  ;;  %v345_v39 = vld [vmem:[%s4188_s18 + $0xee0] sm:$0xff] }
  0x4e   : >> { %v343_v38 = vld [vmem:[%s4188_s18 + $0xed8] sm:$0xff]  ;;  %340 = vst [vmem:[%s4184_s11 + $0x240] sm:$0xff] %v339_v36  ;;  %342 = vst [vmem:[%s4184_s11 + $0x248] sm:$0xff] %v341_v37  ;;  %v347_v40 = vld [vmem:[%s4188_s18 + $0xfa0] sm:$0xff] }
  0x4f   : >> { %344 = vst [vmem:[%s4184_s11 + $0x260] sm:$0xff] %v343_v38  ;;  %v349_v41 = vld [vmem:[%s4188_s18 + $0xfa8] sm:$0xff]  ;;  %346 = vst [vmem:[%s4184_s11 + $0x268] sm:$0xff] %v345_v39  ;;  %v353_v43 = vld [vmem:[%s4188_s18 + $0x1070] sm:$0xff] }
  0x50   : >> { %348 = vst [vmem:[%s4184_s11 + $0x280] sm:$0xff] %v347_v40  ;;  %350 = vst [vmem:[%s4184_s11 + $0x288] sm:$0xff] %v349_v41  ;;  %v351_v42 = vld [vmem:[%s4188_s18 + $0x1068] sm:$0xff]  ;;  %v355_v44 = vld [vmem:[%s4188_s18 + $0x1130] sm:$0xff] }
  0x51   : >> { %352 = vst [vmem:[%s4184_s11 + $0x2a0] sm:$0xff] %v351_v42  ;;  %354 = vst [vmem:[%s4184_s11 + $0x2a8] sm:$0xff] %v353_v43  ;;  %v357_v45 = vld [vmem:[%s4188_s18 + $0x1138] sm:$0xff]  ;;  %v361_v47 = vld [vmem:[%s4188_s18 + $0x1200] sm:$0xff] }
  0x52   : >> { %356 = vst [vmem:[%s4184_s11 + $0x2c0] sm:$0xff] %v355_v44  ;;  %v359_v46 = vld [vmem:[%s4188_s18 + $0x11f8] sm:$0xff]  ;;  %358 = vst [vmem:[%s4184_s11 + $0x2c8] sm:$0xff] %v357_v45  ;;  %v363_v48 = vld [vmem:[%s4188_s18 + $0x12c0] sm:$0xff] }
  0x53   : >> { %360 = vst [vmem:[%s4184_s11 + $0x2e0] sm:$0xff] %v359_v46  ;;  %362 = vst [vmem:[%s4184_s11 + $0x2e8] sm:$0xff] %v361_v47  ;;  %v365_v49 = vld [vmem:[%s4188_s18 + $0x12c8] sm:$0xff]  ;;  %v369_v51 = vld [vmem:[%s4188_s18 + $0x1390] sm:$0xff] }
  0x54   : >> { %v367_v50 = vld [vmem:[%s4188_s18 + $0x1388] sm:$0xff]  ;;  %364 = vst [vmem:[%s4184_s11 + $0x300] sm:$0xff] %v363_v48  ;;  %366 = vst [vmem:[%s4184_s11 + $0x308] sm:$0xff] %v365_v49  ;;  %v371_v52 = vld [vmem:[%s4188_s18 + $0x1450] sm:$0xff] }
  0x55   : >> { %368 = vst [vmem:[%s4184_s11 + $0x320] sm:$0xff] %v367_v50  ;;  %v373_v53 = vld [vmem:[%s4188_s18 + $0x1458] sm:$0xff]  ;;  %370 = vst [vmem:[%s4184_s11 + $0x328] sm:$0xff] %v369_v51  ;;  %v377_v55 = vld [vmem:[%s4188_s18 + $0x1520] sm:$0xff]  ;;  %263 = sbr.rel (!%p260_p1) target bundleno = 59 (0x3b), region = 327 }
  0x56   : >> { %372 = vst [vmem:[%s4184_s11 + $0x340] sm:$0xff] %v371_v52  ;;  %374 = vst [vmem:[%s4184_s11 + $0x348] sm:$0xff] %v373_v53  ;;  %v375_v54 = vld [vmem:[%s4188_s18 + $0x1518] sm:$0xff]  ;;  %v379_v56 = vld [vmem:[%s4188_s18 + $0x15e0] sm:$0xff] }
  0x57   : >> { %376 = vst [vmem:[%s4184_s11 + $0x360] sm:$0xff] %v375_v54  ;;  %378 = vst [vmem:[%s4184_s11 + $0x368] sm:$0xff] %v377_v55  ;;  %v381_v57 = vld [vmem:[%s4188_s18 + $0x15e8] sm:$0xff]  ;;  %v385_v59 = vld [vmem:[%s4188_s18 + $0x16b0] sm:$0xff] }
  0x58   : >> { %380 = vst [vmem:[%s4184_s11 + $0x380] sm:$0xff] %v379_v56  ;;  %v383_v58 = vld [vmem:[%s4188_s18 + $0x16a8] sm:$0xff]  ;;  %382 = vst [vmem:[%s4184_s11 + $0x388] sm:$0xff] %v381_v57  ;;  %v387_v60 = vld [vmem:[%s4188_s18 + $0x1770] sm:$0xff] }
  0x59   : >> { %384 = vst [vmem:[%s4184_s11 + $0x3a0] sm:$0xff] %v383_v58  ;;  %386 = vst [vmem:[%s4184_s11 + $0x3a8] sm:$0xff] %v385_v59  ;;  %v389_v61 = vld [vmem:[%s4188_s18 + $0x1778] sm:$0xff]  ;;  %v393_v63 = vld [vmem:[%s4188_s18 + $0x1840] sm:$0xff] }
  0x5a   : >> { %v391_v62 = vld [vmem:[%s4188_s18 + $0x1838] sm:$0xff]  ;;  %388 = vst [vmem:[%s4184_s11 + $0x3c0] sm:$0xff] %v387_v60  ;;  %390 = vst [vmem:[%s4184_s11 + $0x3c8] sm:$0xff] %v389_v61  ;;  %s7282_s18 = smov %s4537_s26 }
  0x5b   : >> { %392 = vst [vmem:[%s4184_s11 + $0x3e0] sm:$0xff] %v391_v62  ;;  %394 = vst [vmem:[%s4184_s11 + $0x3e8] sm:$0xff] %v393_v63  ;;  %s7281_s11 = smov %s4540_s27 }
  0x5c PF: > { %s4646_s28 = sand.u32 1, %s254_s9   ;;  %s3482_s29 = sshll.u32 %s4470_s10, 8 }
  0x5d   : > { %s406_s30 = sshra.s32 %s3482_s29, 4  ;;  %p3392_p2 = scmp.le.s32.totalorder %s4646_s28, 0 }
  0x5e   : > { %s4650_s5 = scalar_lea.vmem %s4455_s4, %s406_s30   ;;  %s4653_s25 = scalar_lea.vmem %s4459_s7, %s406_s30 [#allocation2]  }
  0x5f   : > { %3190 = sbr.rel (%p3392_p2) target bundleno = 119 (0x77), region = 332  ;;  %s7284_s11 = smov (!%p3392_p2), %s4653_s25 }
  0x60   : > { %s7285_s18 = smov (!%p3392_p2), %s4650_s5  ;;  %s4662_s20 = smov (!%p3392_p2), 0  }
  0x61   : > { %s4664_s21 = smov (!%p3392_p2), 0  }
  0x66 LB: >> { %v422_v0 = vld [vmem:[%s4204_s18] sm:$0xff]  ;;  %v424_v1 = vld [vmem:[%s4204_s18 + $0xc8] sm:$0xff]  ;;  %v426_v2 = vld [vmem:[%s4204_s18 + $0x190] sm:$0xff]  ;;  %s486_s9 = sadd.s32 1, %s4208_s20  ;;  %s416_s21 = sadd.s32 1, %s4212_s21   ;;  %s4212_s21 = sphi %s4664_s21, %s416_s21   ;;  %s4208_s20 = sphi %s4662_s20, %s7288_s20   ;;  %s4204_s18 = sphi %s7285_s18, %s7287_s18   ;;  %s4200_s11 = sphi %s7284_s11, %s7286_s11  }
  0x67   : >> { %423 = vst [vmem:[%s4200_s11] sm:$0xff] %v422_v0  ;;  %425 = vst [vmem:[%s4200_s11 + $0x20] sm:$0xff] %v424_v1  ;;  %v428_v3 = vld [vmem:[%s4204_s18 + $0x258] sm:$0xff]  ;;  %v430_v4 = vld [vmem:[%s4204_s18 + $0x320] sm:$0xff]  ;;  %p487_p4 = scmp.ge.s32.totalorder %s486_s9, %s4646_s28  ;;  %p415_p5 = scmp.ge.s32.totalorder %s416_s21, %s4646_s28 }
  0x68   : >> { %427 = vst [vmem:[%s4200_s11 + $0x40] sm:$0xff] %v426_v2  ;;  %v432_v5 = vld [vmem:[%s4204_s18 + $0x3e8] sm:$0xff]  ;;  %429 = vst [vmem:[%s4200_s11 + $0x60] sm:$0xff] %v428_v3  ;;  %v434_v6 = vld [vmem:[%s4204_s18 + $0x4b0] sm:$0xff] }
  0x69   : >> { %431 = vst [vmem:[%s4200_s11 + $0x80] sm:$0xff] %v430_v4  ;;  %433 = vst [vmem:[%s4200_s11 + $0xa0] sm:$0xff] %v432_v5  ;;  %v436_v7 = vld [vmem:[%s4204_s18 + $0x578] sm:$0xff]  ;;  %v438_v8 = vld [vmem:[%s4204_s18 + $0x640] sm:$0xff]  ;;  %s7346_s9 = smov (%p487_p4, %s486_s9), 0 }
  0x6a   : >> { %435 = vst [vmem:[%s4200_s11 + $0xc0] sm:$0xff] %v434_v6  ;;  %437 = vst [vmem:[%s4200_s11 + $0xe0] sm:$0xff] %v436_v7  ;;  %v440_v9 = vld [vmem:[%s4204_s18 + $0x708] sm:$0xff]  ;;  %v442_v10 = vld [vmem:[%s4204_s18 + $0x7d0] sm:$0xff]  ;;  %s3393_s10 = sshll.u32 %s7346_s9, 3  ;;  %s7288_s20 = smov %s7346_s9 }
  0x6b   : >> { %439 = vst [vmem:[%s4200_s11 + $0x100] sm:$0xff] %v438_v8  ;;  %v444_v11 = vld [vmem:[%s4204_s18 + $0x898] sm:$0xff]  ;;  %441 = vst [vmem:[%s4200_s11 + $0x120] sm:$0xff] %v440_v9  ;;  %v446_v12 = vld [vmem:[%s4204_s18 + $0x960] sm:$0xff]  ;;  %s4720_s24 = scalar_lea.vmem %s4650_s5, %s3393_s10   ;;  %s492_s26 = scalar_lea.vmem %s4653_s25, %s3393_s10 [#allocation2]  }
  0x6c   : >> { %443 = vst [vmem:[%s4200_s11 + $0x140] sm:$0xff] %v442_v10  ;;  %445 = vst [vmem:[%s4200_s11 + $0x160] sm:$0xff] %v444_v11  ;;  %v448_v13 = vld [vmem:[%s4204_s18 + $0xa28] sm:$0xff]  ;;  %v450_v14 = vld [vmem:[%s4204_s18 + $0xaf0] sm:$0xff] }
  0x6d   : >> { %447 = vst [vmem:[%s4200_s11 + $0x180] sm:$0xff] %v446_v12  ;;  %449 = vst [vmem:[%s4200_s11 + $0x1a0] sm:$0xff] %v448_v13  ;;  %v452_v15 = vld [vmem:[%s4204_s18 + $0xbb8] sm:$0xff]  ;;  %v454_v16 = vld [vmem:[%s4204_s18 + $0xc80] sm:$0xff] }
  0x6e   : >> { %451 = vst [vmem:[%s4200_s11 + $0x1c0] sm:$0xff] %v450_v14  ;;  %v456_v17 = vld [vmem:[%s4204_s18 + $0xd48] sm:$0xff]  ;;  %453 = vst [vmem:[%s4200_s11 + $0x1e0] sm:$0xff] %v452_v15  ;;  %v458_v18 = vld [vmem:[%s4204_s18 + $0xe10] sm:$0xff] }
  0x6f   : >> { %455 = vst [vmem:[%s4200_s11 + $0x200] sm:$0xff] %v454_v16  ;;  %457 = vst [vmem:[%s4200_s11 + $0x220] sm:$0xff] %v456_v17  ;;  %v460_v19 = vld [vmem:[%s4204_s18 + $0xed8] sm:$0xff]  ;;  %v462_v20 = vld [vmem:[%s4204_s18 + $0xfa0] sm:$0xff] }
  0x70   : >> { %459 = vst [vmem:[%s4200_s11 + $0x240] sm:$0xff] %v458_v18  ;;  %461 = vst [vmem:[%s4200_s11 + $0x260] sm:$0xff] %v460_v19  ;;  %v464_v21 = vld [vmem:[%s4204_s18 + $0x1068] sm:$0xff]  ;;  %v466_v22 = vld [vmem:[%s4204_s18 + $0x1130] sm:$0xff]  ;;  %418 = sbr.rel (!%p415_p5) target bundleno = 102 (0x66), region = 338 }
  0x71   : >> { %463 = vst [vmem:[%s4200_s11 + $0x280] sm:$0xff] %v462_v20  ;;  %v468_v23 = vld [vmem:[%s4204_s18 + $0x11f8] sm:$0xff]  ;;  %465 = vst [vmem:[%s4200_s11 + $0x2a0] sm:$0xff] %v464_v21  ;;  %v470_v24 = vld [vmem:[%s4204_s18 + $0x12c0] sm:$0xff] }
  0x72   : >> { %467 = vst [vmem:[%s4200_s11 + $0x2c0] sm:$0xff] %v466_v22  ;;  %469 = vst [vmem:[%s4200_s11 + $0x2e0] sm:$0xff] %v468_v23  ;;  %v472_v25 = vld [vmem:[%s4204_s18 + $0x1388] sm:$0xff]  ;;  %v474_v26 = vld [vmem:[%s4204_s18 + $0x1450] sm:$0xff] }
  0x73   : >> { %471 = vst [vmem:[%s4200_s11 + $0x300] sm:$0xff] %v470_v24  ;;  %473 = vst [vmem:[%s4200_s11 + $0x320] sm:$0xff] %v472_v25  ;;  %v476_v27 = vld [vmem:[%s4204_s18 + $0x1518] sm:$0xff]  ;;  %v478_v28 = vld [vmem:[%s4204_s18 + $0x15e0] sm:$0xff] }
  0x74   : >> { %475 = vst [vmem:[%s4200_s11 + $0x340] sm:$0xff] %v474_v26  ;;  %v480_v29 = vld [vmem:[%s4204_s18 + $0x16a8] sm:$0xff]  ;;  %477 = vst [vmem:[%s4200_s11 + $0x360] sm:$0xff] %v476_v27  ;;  %v482_v30 = vld [vmem:[%s4204_s18 + $0x1770] sm:$0xff] }
  0x75   : >> { %479 = vst [vmem:[%s4200_s11 + $0x380] sm:$0xff] %v478_v28  ;;  %481 = vst [vmem:[%s4200_s11 + $0x3a0] sm:$0xff] %v480_v29  ;;  %v484_v31 = vld [vmem:[%s4204_s18 + $0x1838] sm:$0xff]  ;;  %s7287_s18 = smov %s4720_s24 }
  0x76   : >> { %483 = vst [vmem:[%s4200_s11 + $0x3c0] sm:$0xff] %v482_v30  ;;  %485 = vst [vmem:[%s4200_s11 + $0x3e0] sm:$0xff] %v484_v31  ;;  %s7286_s11 = smov %s492_s26 }
  0x77 PF: > { %495 = sbr.rel (%p250_p11) target bundleno = 227 (0xe3), region = 65  ;;  %s497_s27 = ssub.s32 (!%p250_p11), %s4457_s6, %s4463_s8 }
  0x78   : > { %s501_s29 = sshrl.u32 (!%p250_p11), %s4457_s6, 3  ;;  %s4766_s30 = scalar_lea.vmem (!%p250_p11), %s4455_s4, %s497_s27 }
  0x79   : > { %s4769_s10 = scalar_lea.vmem (!%p250_p11), %s4459_s7, %s497_s27 [#allocation2]  ;;  %s4773_s21 = sshrl.u32 (!%p250_p11), %s501_s29, 1 }
  0x7a   : > { %p3395_p7 = scmp.le.s32.totalorder (!%p250_p11), %s4773_s21, 0 }
  0x7e   : > { %3204 = sbr.rel (%p3395_p7) target bundleno = 166 (0xa6), region = 343  ;;  %s7289_s28 = smov (!%p3395_p7), %s4459_s7 }
  0x7f   : > { %s7290_s5 = smov (!%p3395_p7), %s4455_s4  ;;  %s4782_s25 = smov (!%p3395_p7), 0  }
  0x80   : > { %s4784_s11 = smov (!%p3395_p7), 0  }
  0x85 LB: >> { %v514_v32 = vld [vmem:[%s4220_s5] sm:$0xff]  ;;  %v516_v33 = vld [vmem:[%s4220_s5 + $0x8] sm:$0xff]  ;;  %s642_s18 = sadd.s32 1, %s4224_s25  ;;  %v520_v35 = vld [vmem:[%s4220_s5 + $0xd0] sm:$0xff]  ;;  %s508_s11 = sadd.s32 1, %s4228_s11   ;;  %s4228_s11 = sphi %s4784_s11, %s508_s11   ;;  %s4224_s25 = sphi %s4782_s25, %s7293_s25   ;;  %s4220_s5 = sphi %s7290_s5, %s7292_s5   ;;  %s4216_s28 = sphi %s7289_s28, %s7291_s28  }
  0x86   : >> { %v518_v34 = vld [vmem:[%s4220_s5 + $0xc8] sm:$0xff]  ;;  %515 = vst [vmem:[%s4216_s28] sm:$0xff] %v514_v32  ;;  %517 = vst [vmem:[%s4216_s28 + $0x8] sm:$0xff] %v516_v33  ;;  %v522_v36 = vld [vmem:[%s4220_s5 + $0x190] sm:$0xff]  ;;  %p643_p8 = scmp.ge.s32.totalorder %s642_s18, %s4773_s21  ;;  %p507_p9 = scmp.ge.s32.totalorder %s508_s11, %s4773_s21 }
  0x87   : >> { %519 = vst [vmem:[%s4216_s28 + $0x20] sm:$0xff] %v518_v34  ;;  %v524_v37 = vld [vmem:[%s4220_s5 + $0x198] sm:$0xff]  ;;  %521 = vst [vmem:[%s4216_s28 + $0x28] sm:$0xff] %v520_v35  ;;  %v528_v39 = vld [vmem:[%s4220_s5 + $0x260] sm:$0xff] }
  0x88   : >> { %523 = vst [vmem:[%s4216_s28 + $0x40] sm:$0xff] %v522_v36  ;;  %525 = vst [vmem:[%s4216_s28 + $0x48] sm:$0xff] %v524_v37  ;;  %v526_v38 = vld [vmem:[%s4220_s5 + $0x258] sm:$0xff]  ;;  %v530_v40 = vld [vmem:[%s4220_s5 + $0x320] sm:$0xff]  ;;  %s7348_s18 = smov (%p643_p8, %s642_s18), 0 }
  0x89   : >> { %527 = vst [vmem:[%s4216_s28 + $0x60] sm:$0xff] %v526_v38  ;;  %529 = vst [vmem:[%s4216_s28 + $0x68] sm:$0xff] %v528_v39  ;;  %v532_v41 = vld [vmem:[%s4220_s5 + $0x328] sm:$0xff]  ;;  %v536_v43 = vld [vmem:[%s4220_s5 + $0x3f0] sm:$0xff]  ;;  %s3396_s20 = sshll.u32 %s7348_s18, 4  ;;  %s7293_s25 = smov %s7348_s18 }
  0x8a   : >> { %531 = vst [vmem:[%s4216_s28 + $0x80] sm:$0xff] %v530_v40  ;;  %v534_v42 = vld [vmem:[%s4220_s5 + $0x3e8] sm:$0xff]  ;;  %533 = vst [vmem:[%s4216_s28 + $0x88] sm:$0xff] %v532_v41  ;;  %v538_v44 = vld [vmem:[%s4220_s5 + $0x4b0] sm:$0xff]  ;;  %s4840_s9 = scalar_lea.vmem %s4455_s4, %s3396_s20   ;;  %s4843_s24 = scalar_lea.vmem %s4459_s7, %s3396_s20 [#allocation2]  }
  0x8b   : >> { %535 = vst [vmem:[%s4216_s28 + $0xa0] sm:$0xff] %v534_v42  ;;  %537 = vst [vmem:[%s4216_s28 + $0xa8] sm:$0xff] %v536_v43  ;;  %v540_v45 = vld [vmem:[%s4220_s5 + $0x4b8] sm:$0xff]  ;;  %v544_v47 = vld [vmem:[%s4220_s5 + $0x580] sm:$0xff] }
  0x8c   : >> { %v542_v46 = vld [vmem:[%s4220_s5 + $0x578] sm:$0xff]  ;;  %539 = vst [vmem:[%s4216_s28 + $0xc0] sm:$0xff] %v538_v44  ;;  %541 = vst [vmem:[%s4216_s28 + $0xc8] sm:$0xff] %v540_v45  ;;  %v546_v48 = vld [vmem:[%s4220_s5 + $0x640] sm:$0xff] }
  0x8d   : >> { %543 = vst [vmem:[%s4216_s28 + $0xe0] sm:$0xff] %v542_v46  ;;  %v548_v49 = vld [vmem:[%s4220_s5 + $0x648] sm:$0xff]  ;;  %545 = vst [vmem:[%s4216_s28 + $0xe8] sm:$0xff] %v544_v47  ;;  %v552_v51 = vld [vmem:[%s4220_s5 + $0x710] sm:$0xff] }
  0x8e   : >> { %547 = vst [vmem:[%s4216_s28 + $0x100] sm:$0xff] %v546_v48  ;;  %549 = vst [vmem:[%s4216_s28 + $0x108] sm:$0xff] %v548_v49  ;;  %v550_v50 = vld [vmem:[%s4220_s5 + $0x708] sm:$0xff]  ;;  %v554_v52 = vld [vmem:[%s4220_s5 + $0x7d0] sm:$0xff] }
  0x8f   : >> { %551 = vst [vmem:[%s4216_s28 + $0x120] sm:$0xff] %v550_v50  ;;  %553 = vst [vmem:[%s4216_s28 + $0x128] sm:$0xff] %v552_v51  ;;  %v556_v53 = vld [vmem:[%s4220_s5 + $0x7d8] sm:$0xff]  ;;  %v560_v55 = vld [vmem:[%s4220_s5 + $0x8a0] sm:$0xff] }
  0x90   : >> { %555 = vst [vmem:[%s4216_s28 + $0x140] sm:$0xff] %v554_v52  ;;  %v558_v54 = vld [vmem:[%s4220_s5 + $0x898] sm:$0xff]  ;;  %557 = vst [vmem:[%s4216_s28 + $0x148] sm:$0xff] %v556_v53  ;;  %v562_v56 = vld [vmem:[%s4220_s5 + $0x960] sm:$0xff] }
  0x91   : >> { %559 = vst [vmem:[%s4216_s28 + $0x160] sm:$0xff] %v558_v54  ;;  %561 = vst [vmem:[%s4216_s28 + $0x168] sm:$0xff] %v560_v55  ;;  %v564_v57 = vld [vmem:[%s4220_s5 + $0x968] sm:$0xff]  ;;  %v568_v59 = vld [vmem:[%s4220_s5 + $0xa30] sm:$0xff] }
  0x92   : >> { %v566_v58 = vld [vmem:[%s4220_s5 + $0xa28] sm:$0xff]  ;;  %563 = vst [vmem:[%s4216_s28 + $0x180] sm:$0xff] %v562_v56  ;;  %565 = vst [vmem:[%s4216_s28 + $0x188] sm:$0xff] %v564_v57  ;;  %v570_v60 = vld [vmem:[%s4220_s5 + $0xaf0] sm:$0xff] }
  0x93   : >> { %567 = vst [vmem:[%s4216_s28 + $0x1a0] sm:$0xff] %v566_v58  ;;  %v572_v61 = vld [vmem:[%s4220_s5 + $0xaf8] sm:$0xff]  ;;  %569 = vst [vmem:[%s4216_s28 + $0x1a8] sm:$0xff] %v568_v59  ;;  %v576_v63 = vld [vmem:[%s4220_s5 + $0xbc0] sm:$0xff] }
  0x94   : >> { %571 = vst [vmem:[%s4216_s28 + $0x1c0] sm:$0xff] %v570_v60  ;;  %573 = vst [vmem:[%s4216_s28 + $0x1c8] sm:$0xff] %v572_v61  ;;  %v574_v62 = vld [vmem:[%s4220_s5 + $0xbb8] sm:$0xff]  ;;  %v578_v0 = vld [vmem:[%s4220_s5 + $0xc80] sm:$0xff] }
  0x95   : >> { %575 = vst [vmem:[%s4216_s28 + $0x1e0] sm:$0xff] %v574_v62  ;;  %577 = vst [vmem:[%s4216_s28 + $0x1e8] sm:$0xff] %v576_v63  ;;  %v580_v1 = vld [vmem:[%s4220_s5 + $0xc88] sm:$0xff]  ;;  %v584_v3 = vld [vmem:[%s4220_s5 + $0xd50] sm:$0xff] }
  0x96   : >> { %579 = vst [vmem:[%s4216_s28 + $0x200] sm:$0xff] %v578_v0  ;;  %v582_v2 = vld [vmem:[%s4220_s5 + $0xd48] sm:$0xff]  ;;  %581 = vst [vmem:[%s4216_s28 + $0x208] sm:$0xff] %v580_v1  ;;  %v586_v4 = vld [vmem:[%s4220_s5 + $0xe10] sm:$0xff] }
  0x97   : >> { %583 = vst [vmem:[%s4216_s28 + $0x220] sm:$0xff] %v582_v2  ;;  %585 = vst [vmem:[%s4216_s28 + $0x228] sm:$0xff] %v584_v3  ;;  %v588_v5 = vld [vmem:[%s4220_s5 + $0xe18] sm:$0xff]  ;;  %v592_v7 = vld [vmem:[%s4220_s5 + $0xee0] sm:$0xff] }
  0x98   : >> { %v590_v6 = vld [vmem:[%s4220_s5 + $0xed8] sm:$0xff]  ;;  %587 = vst [vmem:[%s4216_s28 + $0x240] sm:$0xff] %v586_v4  ;;  %589 = vst [vmem:[%s4216_s28 + $0x248] sm:$0xff] %v588_v5  ;;  %v594_v8 = vld [vmem:[%s4220_s5 + $0xfa0] sm:$0xff] }
  0x99   : >> { %591 = vst [vmem:[%s4216_s28 + $0x260] sm:$0xff] %v590_v6  ;;  %v596_v9 = vld [vmem:[%s4220_s5 + $0xfa8] sm:$0xff]  ;;  %593 = vst [vmem:[%s4216_s28 + $0x268] sm:$0xff] %v592_v7  ;;  %v600_v11 = vld [vmem:[%s4220_s5 + $0x1070] sm:$0xff] }
  0x9a   : >> { %595 = vst [vmem:[%s4216_s28 + $0x280] sm:$0xff] %v594_v8  ;;  %597 = vst [vmem:[%s4216_s28 + $0x288] sm:$0xff] %v596_v9  ;;  %v598_v10 = vld [vmem:[%s4220_s5 + $0x1068] sm:$0xff]  ;;  %v602_v12 = vld [vmem:[%s4220_s5 + $0x1130] sm:$0xff] }
  0x9b   : >> { %599 = vst [vmem:[%s4216_s28 + $0x2a0] sm:$0xff] %v598_v10  ;;  %601 = vst [vmem:[%s4216_s28 + $0x2a8] sm:$0xff] %v600_v11  ;;  %v604_v13 = vld [vmem:[%s4220_s5 + $0x1138] sm:$0xff]  ;;  %v608_v15 = vld [vmem:[%s4220_s5 + $0x1200] sm:$0xff] }
  0x9c   : >> { %603 = vst [vmem:[%s4216_s28 + $0x2c0] sm:$0xff] %v602_v12  ;;  %v606_v14 = vld [vmem:[%s4220_s5 + $0x11f8] sm:$0xff]  ;;  %605 = vst [vmem:[%s4216_s28 + $0x2c8] sm:$0xff] %v604_v13  ;;  %v610_v16 = vld [vmem:[%s4220_s5 + $0x12c0] sm:$0xff] }
  0x9d   : >> { %607 = vst [vmem:[%s4216_s28 + $0x2e0] sm:$0xff] %v606_v14  ;;  %609 = vst [vmem:[%s4216_s28 + $0x2e8] sm:$0xff] %v608_v15  ;;  %v612_v17 = vld [vmem:[%s4220_s5 + $0x12c8] sm:$0xff]  ;;  %v616_v19 = vld [vmem:[%s4220_s5 + $0x1390] sm:$0xff] }
  0x9e   : >> { %v614_v18 = vld [vmem:[%s4220_s5 + $0x1388] sm:$0xff]  ;;  %611 = vst [vmem:[%s4216_s28 + $0x300] sm:$0xff] %v610_v16  ;;  %613 = vst [vmem:[%s4216_s28 + $0x308] sm:$0xff] %v612_v17  ;;  %v618_v20 = vld [vmem:[%s4220_s5 + $0x1450] sm:$0xff] }
  0x9f   : >> { %615 = vst [vmem:[%s4216_s28 + $0x320] sm:$0xff] %v614_v18  ;;  %v620_v21 = vld [vmem:[%s4220_s5 + $0x1458] sm:$0xff]  ;;  %617 = vst [vmem:[%s4216_s28 + $0x328] sm:$0xff] %v616_v19  ;;  %v624_v23 = vld [vmem:[%s4220_s5 + $0x1520] sm:$0xff]  ;;  %510 = sbr.rel (!%p507_p9) target bundleno = 133 (0x85), region = 349 }
  0xa0   : >> { %619 = vst [vmem:[%s4216_s28 + $0x340] sm:$0xff] %v618_v20  ;;  %621 = vst [vmem:[%s4216_s28 + $0x348] sm:$0xff] %v620_v21  ;;  %v622_v22 = vld [vmem:[%s4220_s5 + $0x1518] sm:$0xff]  ;;  %v626_v24 = vld [vmem:[%s4220_s5 + $0x15e0] sm:$0xff] }
  0xa1   : >> { %623 = vst [vmem:[%s4216_s28 + $0x360] sm:$0xff] %v622_v22  ;;  %625 = vst [vmem:[%s4216_s28 + $0x368] sm:$0xff] %v624_v23  ;;  %v628_v25 = vld [vmem:[%s4220_s5 + $0x15e8] sm:$0xff]  ;;  %v632_v27 = vld [vmem:[%s4220_s5 + $0x16b0] sm:$0xff] }
  0xa2   : >> { %627 = vst [vmem:[%s4216_s28 + $0x380] sm:$0xff] %v626_v24  ;;  %v630_v26 = vld [vmem:[%s4220_s5 + $0x16a8] sm:$0xff]  ;;  %629 = vst [vmem:[%s4216_s28 + $0x388] sm:$0xff] %v628_v25  ;;  %v634_v28 = vld [vmem:[%s4220_s5 + $0x1770] sm:$0xff] }
  0xa3   : >> { %631 = vst [vmem:[%s4216_s28 + $0x3a0] sm:$0xff] %v630_v26  ;;  %633 = vst [vmem:[%s4216_s28 + $0x3a8] sm:$0xff] %v632_v27  ;;  %v636_v29 = vld [vmem:[%s4220_s5 + $0x1778] sm:$0xff]  ;;  %v640_v31 = vld [vmem:[%s4220_s5 + $0x1840] sm:$0xff] }
  0xa4   : >> { %v638_v30 = vld [vmem:[%s4220_s5 + $0x1838] sm:$0xff]  ;;  %635 = vst [vmem:[%s4216_s28 + $0x3c0] sm:$0xff] %v634_v28  ;;  %637 = vst [vmem:[%s4216_s28 + $0x3c8] sm:$0xff] %v636_v29  ;;  %s7292_s5 = smov %s4840_s9 }
  0xa5   : >> { %639 = vst [vmem:[%s4216_s28 + $0x3e0] sm:$0xff] %v638_v30  ;;  %641 = vst [vmem:[%s4216_s28 + $0x3e8] sm:$0xff] %v640_v31  ;;  %s7291_s28 = smov %s4843_s24 }
  0xa6 PF: > { %s4949_s26 = sand.u32 1, %s501_s29   ;;  %s3484_s27 = sshll.u32 %s4773_s21, 8 }
  0xa7   : > { %s653_s20 = sshra.s32 %s3484_s27, 4  ;;  %p3401_p10 = scmp.le.s32.totalorder %s4949_s26, 0 }
  0xa8   : > { %s4953_s0 = scalar_lea.vmem %s4455_s4, %s653_s20   ;;  %s4956_s24 = scalar_lea.vmem %s4459_s7, %s653_s20 [#allocation2]  }
  0xa9   : > { %3218 = sbr.rel (%p3401_p10) target bundleno = 193 (0xc1), region = 354  ;;  %s7294_s28 = smov (!%p3401_p10), %s4956_s24 }
  0xaa   : > { %s7295_s5 = smov (!%p3401_p10), %s4953_s0  ;;  %s4965_s25 = smov (!%p3401_p10), 0  }
  0xab   : > { %s4967_s11 = smov (!%p3401_p10), 0  }
  0xb0 LB: >> { %v669_v32 = vld [vmem:[%s4236_s5] sm:$0xff]  ;;  %v671_v33 = vld [vmem:[%s4236_s5 + $0xc8] sm:$0xff]  ;;  %v673_v34 = vld [vmem:[%s4236_s5 + $0x190] sm:$0xff]  ;;  %s733_s29 = sadd.s32 1, %s4240_s25  ;;  %s663_s11 = sadd.s32 1, %s4244_s11   ;;  %s4244_s11 = sphi %s4967_s11, %s663_s11   ;;  %s4240_s25 = sphi %s4965_s25, %s7298_s25   ;;  %s4236_s5 = sphi %s7295_s5, %s7297_s5   ;;  %s4232_s28 = sphi %s7294_s28, %s7296_s28  }
  0xb1   : >> { %670 = vst [vmem:[%s4232_s28] sm:$0xff] %v669_v32  ;;  %672 = vst [vmem:[%s4232_s28 + $0x20] sm:$0xff] %v671_v33  ;;  %v675_v35 = vld [vmem:[%s4236_s5 + $0x258] sm:$0xff]  ;;  %v677_v36 = vld [vmem:[%s4236_s5 + $0x320] sm:$0xff]  ;;  %p734_p11 = scmp.ge.s32.totalorder %s733_s29, %s4949_s26  ;;  %p662_p12 = scmp.ge.s32.totalorder %s663_s11, %s4949_s26 }
  0xb2   : >> { %674 = vst [vmem:[%s4232_s28 + $0x40] sm:$0xff] %v673_v34  ;;  %v679_v37 = vld [vmem:[%s4236_s5 + $0x3e8] sm:$0xff]  ;;  %676 = vst [vmem:[%s4232_s28 + $0x60] sm:$0xff] %v675_v35  ;;  %v681_v38 = vld [vmem:[%s4236_s5 + $0x4b0] sm:$0xff] }
  0xb3   : >> { %678 = vst [vmem:[%s4232_s28 + $0x80] sm:$0xff] %v677_v36  ;;  %680 = vst [vmem:[%s4232_s28 + $0xa0] sm:$0xff] %v679_v37  ;;  %v683_v39 = vld [vmem:[%s4236_s5 + $0x578] sm:$0xff]  ;;  %v685_v40 = vld [vmem:[%s4236_s5 + $0x640] sm:$0xff]  ;;  %s7350_s29 = smov (%p734_p11, %s733_s29), 0 }
  0xb4   : >> { %682 = vst [vmem:[%s4232_s28 + $0xc0] sm:$0xff] %v681_v38  ;;  %684 = vst [vmem:[%s4232_s28 + $0xe0] sm:$0xff] %v683_v39  ;;  %v687_v41 = vld [vmem:[%s4236_s5 + $0x708] sm:$0xff]  ;;  %v689_v42 = vld [vmem:[%s4236_s5 + $0x7d0] sm:$0xff]  ;;  %s3402_s21 = sshll.u32 %s7350_s29, 3  ;;  %s7298_s25 = smov %s7350_s29 }
  0xb5   : >> { %686 = vst [vmem:[%s4232_s28 + $0x100] sm:$0xff] %v685_v40  ;;  %v691_v43 = vld [vmem:[%s4236_s5 + $0x898] sm:$0xff]  ;;  %688 = vst [vmem:[%s4232_s28 + $0x120] sm:$0xff] %v687_v41  ;;  %v693_v44 = vld [vmem:[%s4236_s5 + $0x960] sm:$0xff]  ;;  %s5023_s18 = scalar_lea.vmem %s4953_s0, %s3402_s21   ;;  %s739_s9 = scalar_lea.vmem %s4956_s24, %s3402_s21 [#allocation2]  }
  0xb6   : >> { %690 = vst [vmem:[%s4232_s28 + $0x140] sm:$0xff] %v689_v42  ;;  %692 = vst [vmem:[%s4232_s28 + $0x160] sm:$0xff] %v691_v43  ;;  %v695_v45 = vld [vmem:[%s4236_s5 + $0xa28] sm:$0xff]  ;;  %v697_v46 = vld [vmem:[%s4236_s5 + $0xaf0] sm:$0xff] }
  0xb7   : >> { %694 = vst [vmem:[%s4232_s28 + $0x180] sm:$0xff] %v693_v44  ;;  %696 = vst [vmem:[%s4232_s28 + $0x1a0] sm:$0xff] %v695_v45  ;;  %v699_v47 = vld [vmem:[%s4236_s5 + $0xbb8] sm:$0xff]  ;;  %v701_v48 = vld [vmem:[%s4236_s5 + $0xc80] sm:$0xff] }
  0xb8   : >> { %698 = vst [vmem:[%s4232_s28 + $0x1c0] sm:$0xff] %v697_v46  ;;  %v703_v49 = vld [vmem:[%s4236_s5 + $0xd48] sm:$0xff]  ;;  %700 = vst [vmem:[%s4232_s28 + $0x1e0] sm:$0xff] %v699_v47  ;;  %v705_v50 = vld [vmem:[%s4236_s5 + $0xe10] sm:$0xff] }
  0xb9   : >> { %702 = vst [vmem:[%s4232_s28 + $0x200] sm:$0xff] %v701_v48  ;;  %704 = vst [vmem:[%s4232_s28 + $0x220] sm:$0xff] %v703_v49  ;;  %v707_v51 = vld [vmem:[%s4236_s5 + $0xed8] sm:$0xff]  ;;  %v709_v52 = vld [vmem:[%s4236_s5 + $0xfa0] sm:$0xff] }
  0xba   : >> { %706 = vst [vmem:[%s4232_s28 + $0x240] sm:$0xff] %v705_v50  ;;  %708 = vst [vmem:[%s4232_s28 + $0x260] sm:$0xff] %v707_v51  ;;  %v711_v53 = vld [vmem:[%s4236_s5 + $0x1068] sm:$0xff]  ;;  %v713_v54 = vld [vmem:[%s4236_s5 + $0x1130] sm:$0xff]  ;;  %665 = sbr.rel (!%p662_p12) target bundleno = 176 (0xb0), region = 360 }
  0xbb   : >> { %710 = vst [vmem:[%s4232_s28 + $0x280] sm:$0xff] %v709_v52  ;;  %v715_v55 = vld [vmem:[%s4236_s5 + $0x11f8] sm:$0xff]  ;;  %712 = vst [vmem:[%s4232_s28 + $0x2a0] sm:$0xff] %v711_v53  ;;  %v717_v56 = vld [vmem:[%s4236_s5 + $0x12c0] sm:$0xff] }
  0xbc   : >> { %714 = vst [vmem:[%s4232_s28 + $0x2c0] sm:$0xff] %v713_v54  ;;  %716 = vst [vmem:[%s4232_s28 + $0x2e0] sm:$0xff] %v715_v55  ;;  %v719_v57 = vld [vmem:[%s4236_s5 + $0x1388] sm:$0xff]  ;;  %v721_v58 = vld [vmem:[%s4236_s5 + $0x1450] sm:$0xff] }
  0xbd   : >> { %718 = vst [vmem:[%s4232_s28 + $0x300] sm:$0xff] %v717_v56  ;;  %720 = vst [vmem:[%s4232_s28 + $0x320] sm:$0xff] %v719_v57  ;;  %v723_v59 = vld [vmem:[%s4236_s5 + $0x1518] sm:$0xff]  ;;  %v725_v60 = vld [vmem:[%s4236_s5 + $0x15e0] sm:$0xff] }
  0xbe   : >> { %722 = vst [vmem:[%s4232_s28 + $0x340] sm:$0xff] %v721_v58  ;;  %v727_v61 = vld [vmem:[%s4236_s5 + $0x16a8] sm:$0xff]  ;;  %724 = vst [vmem:[%s4232_s28 + $0x360] sm:$0xff] %v723_v59  ;;  %v729_v62 = vld [vmem:[%s4236_s5 + $0x1770] sm:$0xff] }
  0xbf   : >> { %726 = vst [vmem:[%s4232_s28 + $0x380] sm:$0xff] %v725_v60  ;;  %728 = vst [vmem:[%s4232_s28 + $0x3a0] sm:$0xff] %v727_v61  ;;  %v731_v63 = vld [vmem:[%s4236_s5 + $0x1838] sm:$0xff]  ;;  %s7297_s5 = smov %s5023_s18 }
  0xc0   : >> { %730 = vst [vmem:[%s4232_s28 + $0x3c0] sm:$0xff] %v729_v62  ;;  %732 = vst [vmem:[%s4232_s28 + $0x3e0] sm:$0xff] %v731_v63  ;;  %s7296_s28 = smov %s739_s9 }
  0xc1 PF: > { %s4374_s27 = smov 0  }
  0xc2   : > { %s5064_s20 = sshllo.u32 %s4374_s27, %s4463_s8 }
  0xc3   : > { %v749_v0 = vld [vmem:[%s4766_s30] sm:%s5064_s20]  ;;  %v751_v1 = vld [vmem:[%s4766_s30 + $0xc8] sm:%s5064_s20] }
  0xc4   : > { %750 = vst [vmem:[%s4769_s10] sm:%s5064_s20] %v749_v0  ;;  %752 = vst [vmem:[%s4769_s10 + $0x20] sm:%s5064_s20] %v751_v1 }
  0xc5   : > { %v753_v2 = vld [vmem:[%s4766_s30 + $0x190] sm:%s5064_s20]  ;;  %v755_v3 = vld [vmem:[%s4766_s30 + $0x258] sm:%s5064_s20] }
  0xc6   : > { %754 = vst [vmem:[%s4769_s10 + $0x40] sm:%s5064_s20] %v753_v2  ;;  %756 = vst [vmem:[%s4769_s10 + $0x60] sm:%s5064_s20] %v755_v3 }
  0xc7   : > { %v757_v4 = vld [vmem:[%s4766_s30 + $0x320] sm:%s5064_s20]  ;;  %v759_v5 = vld [vmem:[%s4766_s30 + $0x3e8] sm:%s5064_s20] }
  0xc8   : > { %758 = vst [vmem:[%s4769_s10 + $0x80] sm:%s5064_s20] %v757_v4  ;;  %760 = vst [vmem:[%s4769_s10 + $0xa0] sm:%s5064_s20] %v759_v5 }
  0xc9   : > { %v761_v6 = vld [vmem:[%s4766_s30 + $0x4b0] sm:%s5064_s20]  ;;  %v763_v7 = vld [vmem:[%s4766_s30 + $0x578] sm:%s5064_s20] }
  0xca   : > { %762 = vst [vmem:[%s4769_s10 + $0xc0] sm:%s5064_s20] %v761_v6  ;;  %764 = vst [vmem:[%s4769_s10 + $0xe0] sm:%s5064_s20] %v763_v7 }
  0xcb   : > { %v765_v8 = vld [vmem:[%s4766_s30 + $0x640] sm:%s5064_s20]  ;;  %v767_v9 = vld [vmem:[%s4766_s30 + $0x708] sm:%s5064_s20] }
  0xcc   : > { %766 = vst [vmem:[%s4769_s10 + $0x100] sm:%s5064_s20] %v765_v8  ;;  %768 = vst [vmem:[%s4769_s10 + $0x120] sm:%s5064_s20] %v767_v9 }
  0xcd   : > { %v769_v10 = vld [vmem:[%s4766_s30 + $0x7d0] sm:%s5064_s20]  ;;  %v771_v11 = vld [vmem:[%s4766_s30 + $0x898] sm:%s5064_s20] }
  0xce   : > { %770 = vst [vmem:[%s4769_s10 + $0x140] sm:%s5064_s20] %v769_v10  ;;  %772 = vst [vmem:[%s4769_s10 + $0x160] sm:%s5064_s20] %v771_v11 }
  0xcf   : > { %v773_v12 = vld [vmem:[%s4766_s30 + $0x960] sm:%s5064_s20]  ;;  %v775_v13 = vld [vmem:[%s4766_s30 + $0xa28] sm:%s5064_s20] }
  0xd0   : > { %774 = vst [vmem:[%s4769_s10 + $0x180] sm:%s5064_s20] %v773_v12  ;;  %776 = vst [vmem:[%s4769_s10 + $0x1a0] sm:%s5064_s20] %v775_v13 }
  0xd1   : > { %v777_v14 = vld [vmem:[%s4766_s30 + $0xaf0] sm:%s5064_s20]  ;;  %v779_v15 = vld [vmem:[%s4766_s30 + $0xbb8] sm:%s5064_s20] }
  0xd2   : > { %778 = vst [vmem:[%s4769_s10 + $0x1c0] sm:%s5064_s20] %v777_v14  ;;  %780 = vst [vmem:[%s4769_s10 + $0x1e0] sm:%s5064_s20] %v779_v15 }
  0xd3   : > { %v781_v16 = vld [vmem:[%s4766_s30 + $0xc80] sm:%s5064_s20]  ;;  %v783_v17 = vld [vmem:[%s4766_s30 + $0xd48] sm:%s5064_s20] }
  0xd4   : > { %782 = vst [vmem:[%s4769_s10 + $0x200] sm:%s5064_s20] %v781_v16  ;;  %784 = vst [vmem:[%s4769_s10 + $0x220] sm:%s5064_s20] %v783_v17 }
  0xd5   : > { %v785_v18 = vld [vmem:[%s4766_s30 + $0xe10] sm:%s5064_s20]  ;;  %v787_v19 = vld [vmem:[%s4766_s30 + $0xed8] sm:%s5064_s20] }
  0xd6   : > { %786 = vst [vmem:[%s4769_s10 + $0x240] sm:%s5064_s20] %v785_v18  ;;  %788 = vst [vmem:[%s4769_s10 + $0x260] sm:%s5064_s20] %v787_v19 }
  0xd7   : > { %v789_v20 = vld [vmem:[%s4766_s30 + $0xfa0] sm:%s5064_s20]  ;;  %v791_v21 = vld [vmem:[%s4766_s30 + $0x1068] sm:%s5064_s20] }
  0xd8   : > { %790 = vst [vmem:[%s4769_s10 + $0x280] sm:%s5064_s20] %v789_v20  ;;  %792 = vst [vmem:[%s4769_s10 + $0x2a0] sm:%s5064_s20] %v791_v21 }
  0xd9   : > { %v793_v22 = vld [vmem:[%s4766_s30 + $0x1130] sm:%s5064_s20]  ;;  %v795_v23 = vld [vmem:[%s4766_s30 + $0x11f8] sm:%s5064_s20] }
  0xda   : > { %794 = vst [vmem:[%s4769_s10 + $0x2c0] sm:%s5064_s20] %v793_v22  ;;  %796 = vst [vmem:[%s4769_s10 + $0x2e0] sm:%s5064_s20] %v795_v23 }
  0xdb   : > { %v797_v24 = vld [vmem:[%s4766_s30 + $0x12c0] sm:%s5064_s20]  ;;  %v799_v25 = vld [vmem:[%s4766_s30 + $0x1388] sm:%s5064_s20] }
  0xdc   : > { %798 = vst [vmem:[%s4769_s10 + $0x300] sm:%s5064_s20] %v797_v24  ;;  %800 = vst [vmem:[%s4769_s10 + $0x320] sm:%s5064_s20] %v799_v25 }
  0xdd   : > { %v801_v26 = vld [vmem:[%s4766_s30 + $0x1450] sm:%s5064_s20]  ;;  %v803_v27 = vld [vmem:[%s4766_s30 + $0x1518] sm:%s5064_s20] }
  0xde   : > { %802 = vst [vmem:[%s4769_s10 + $0x340] sm:%s5064_s20] %v801_v26  ;;  %804 = vst [vmem:[%s4769_s10 + $0x360] sm:%s5064_s20] %v803_v27 }
  0xdf   : > { %v805_v28 = vld [vmem:[%s4766_s30 + $0x15e0] sm:%s5064_s20]  ;;  %v807_v29 = vld [vmem:[%s4766_s30 + $0x16a8] sm:%s5064_s20] }
  0xe0   : > { %806 = vst [vmem:[%s4769_s10 + $0x380] sm:%s5064_s20] %v805_v28  ;;  %808 = vst [vmem:[%s4769_s10 + $0x3a0] sm:%s5064_s20] %v807_v29 }
  0xe1   : > { %v809_v30 = vld [vmem:[%s4766_s30 + $0x1770] sm:%s5064_s20]  ;;  %v811_v31 = vld [vmem:[%s4766_s30 + $0x1838] sm:%s5064_s20] }
  0xe2   : > { %810 = vst [vmem:[%s4769_s10 + $0x3c0] sm:%s5064_s20] %v809_v30  ;;  %812 = vst [vmem:[%s4769_s10 + $0x3e0] sm:%s5064_s20] %v811_v31 }
  0xe3 PF: > { %p3404_p13 = scmp.ge.u32.totalorder %s4457_s6, 8 }
  0xe4   : > { %s4375_s0 = smov (!%p3404_p13), 0  }
  0xe5   : > { %175 = sbr.rel (%p3404_p13) target bundleno = 262 (0x106), region = 36  ;;  %s5196_s8 = sshllo.u32 (!%p3404_p13), %s4375_s0, %s4457_s6 }
  0xe6   : > { %v185_v32 = vld [vmem:[%s4455_s4] sm:%s5196_s8] (!%p3404_p13)  ;;  %v187_v33 = vld [vmem:[%s4455_s4 + $0xc8] sm:%s5196_s8] (!%p3404_p13) }
  0xe7   : > { %186 = vst [vmem:[%s4459_s7] sm:%s5196_s8] (!%p3404_p13), %v185_v32  ;;  %188 = vst [vmem:[%s4459_s7 + $0x20] sm:%s5196_s8] (!%p3404_p13), %v187_v33 }
  0xe8   : > { %v189_v34 = vld [vmem:[%s4455_s4 + $0x190] sm:%s5196_s8] (!%p3404_p13)  ;;  %v191_v35 = vld [vmem:[%s4455_s4 + $0x258] sm:%s5196_s8] (!%p3404_p13) }
  0xe9   : > { %190 = vst [vmem:[%s4459_s7 + $0x40] sm:%s5196_s8] (!%p3404_p13), %v189_v34  ;;  %192 = vst [vmem:[%s4459_s7 + $0x60] sm:%s5196_s8] (!%p3404_p13), %v191_v35 }
  0xea   : > { %v193_v36 = vld [vmem:[%s4455_s4 + $0x320] sm:%s5196_s8] (!%p3404_p13)  ;;  %v195_v37 = vld [vmem:[%s4455_s4 + $0x3e8] sm:%s5196_s8] (!%p3404_p13) }
  0xeb   : > { %194 = vst [vmem:[%s4459_s7 + $0x80] sm:%s5196_s8] (!%p3404_p13), %v193_v36  ;;  %196 = vst [vmem:[%s4459_s7 + $0xa0] sm:%s5196_s8] (!%p3404_p13), %v195_v37 }
  0xec   : > { %v197_v38 = vld [vmem:[%s4455_s4 + $0x4b0] sm:%s5196_s8]  ;;  %v199_v39 = vld [vmem:[%s4455_s4 + $0x578] sm:%s5196_s8] }
  0xed   : > { %198 = vst [vmem:[%s4459_s7 + $0xc0] sm:%s5196_s8] %v197_v38  ;;  %200 = vst [vmem:[%s4459_s7 + $0xe0] sm:%s5196_s8] %v199_v39 }
  0xee   : > { %v201_v40 = vld [vmem:[%s4455_s4 + $0x640] sm:%s5196_s8]  ;;  %v203_v41 = vld [vmem:[%s4455_s4 + $0x708] sm:%s5196_s8] }
  0xef   : > { %202 = vst [vmem:[%s4459_s7 + $0x100] sm:%s5196_s8] %v201_v40  ;;  %204 = vst [vmem:[%s4459_s7 + $0x120] sm:%s5196_s8] %v203_v41 }
  0xf0   : > { %v205_v42 = vld [vmem:[%s4455_s4 + $0x7d0] sm:%s5196_s8]  ;;  %v207_v43 = vld [vmem:[%s4455_s4 + $0x898] sm:%s5196_s8] }
  0xf1   : > { %206 = vst [vmem:[%s4459_s7 + $0x140] sm:%s5196_s8] %v205_v42  ;;  %208 = vst [vmem:[%s4459_s7 + $0x160] sm:%s5196_s8] %v207_v43 }
  0xf2   : > { %v209_v44 = vld [vmem:[%s4455_s4 + $0x960] sm:%s5196_s8]  ;;  %v211_v45 = vld [vmem:[%s4455_s4 + $0xa28] sm:%s5196_s8] }
  0xf3   : > { %210 = vst [vmem:[%s4459_s7 + $0x180] sm:%s5196_s8] %v209_v44  ;;  %212 = vst [vmem:[%s4459_s7 + $0x1a0] sm:%s5196_s8] %v211_v45 }
  0xf4   : > { %v213_v46 = vld [vmem:[%s4455_s4 + $0xaf0] sm:%s5196_s8]  ;;  %v215_v47 = vld [vmem:[%s4455_s4 + $0xbb8] sm:%s5196_s8] }
  0xf5   : > { %214 = vst [vmem:[%s4459_s7 + $0x1c0] sm:%s5196_s8] %v213_v46  ;;  %216 = vst [vmem:[%s4459_s7 + $0x1e0] sm:%s5196_s8] %v215_v47 }
  0xf6   : > { %v217_v48 = vld [vmem:[%s4455_s4 + $0xc80] sm:%s5196_s8]  ;;  %v219_v49 = vld [vmem:[%s4455_s4 + $0xd48] sm:%s5196_s8] }
  0xf7   : > { %218 = vst [vmem:[%s4459_s7 + $0x200] sm:%s5196_s8] %v217_v48  ;;  %220 = vst [vmem:[%s4459_s7 + $0x220] sm:%s5196_s8] %v219_v49 }
  0xf8   : > { %v221_v50 = vld [vmem:[%s4455_s4 + $0xe10] sm:%s5196_s8]  ;;  %v223_v51 = vld [vmem:[%s4455_s4 + $0xed8] sm:%s5196_s8] }
  0xf9   : > { %222 = vst [vmem:[%s4459_s7 + $0x240] sm:%s5196_s8] %v221_v50  ;;  %224 = vst [vmem:[%s4459_s7 + $0x260] sm:%s5196_s8] %v223_v51 }
  0xfa   : > { %v225_v52 = vld [vmem:[%s4455_s4 + $0xfa0] sm:%s5196_s8]  ;;  %v227_v53 = vld [vmem:[%s4455_s4 + $0x1068] sm:%s5196_s8] }
  0xfb   : > { %226 = vst [vmem:[%s4459_s7 + $0x280] sm:%s5196_s8] %v225_v52  ;;  %228 = vst [vmem:[%s4459_s7 + $0x2a0] sm:%s5196_s8] %v227_v53 }
  0xfc   : > { %v229_v54 = vld [vmem:[%s4455_s4 + $0x1130] sm:%s5196_s8]  ;;  %v231_v55 = vld [vmem:[%s4455_s4 + $0x11f8] sm:%s5196_s8] }
  0xfd   : > { %230 = vst [vmem:[%s4459_s7 + $0x2c0] sm:%s5196_s8] %v229_v54  ;;  %232 = vst [vmem:[%s4459_s7 + $0x2e0] sm:%s5196_s8] %v231_v55 }
  0xfe   : > { %v233_v56 = vld [vmem:[%s4455_s4 + $0x12c0] sm:%s5196_s8]  ;;  %v235_v57 = vld [vmem:[%s4455_s4 + $0x1388] sm:%s5196_s8] }
  0xff   : > { %234 = vst [vmem:[%s4459_s7 + $0x300] sm:%s5196_s8] %v233_v56  ;;  %236 = vst [vmem:[%s4459_s7 + $0x320] sm:%s5196_s8] %v235_v57 }
 0x100   : > { %v237_v58 = vld [vmem:[%s4455_s4 + $0x1450] sm:%s5196_s8]  ;;  %v239_v59 = vld [vmem:[%s4455_s4 + $0x1518] sm:%s5196_s8] }
 0x101   : > { %238 = vst [vmem:[%s4459_s7 + $0x340] sm:%s5196_s8] %v237_v58  ;;  %240 = vst [vmem:[%s4459_s7 + $0x360] sm:%s5196_s8] %v239_v59 }
 0x102   : > { %v241_v60 = vld [vmem:[%s4455_s4 + $0x15e0] sm:%s5196_s8]  ;;  %v243_v61 = vld [vmem:[%s4455_s4 + $0x16a8] sm:%s5196_s8] }
 0x103   : > { %242 = vst [vmem:[%s4459_s7 + $0x380] sm:%s5196_s8] %v241_v60  ;;  %244 = vst [vmem:[%s4459_s7 + $0x3a0] sm:%s5196_s8] %v243_v61 }
 0x104   : > { %v245_v62 = vld [vmem:[%s4455_s4 + $0x1770] sm:%s5196_s8]  ;;  %v247_v63 = vld [vmem:[%s4455_s4 + $0x1838] sm:%s5196_s8] }
 0x105   : > { %246 = vst [vmem:[%s4459_s7 + $0x3c0] sm:%s5196_s8] %v245_v62  ;;  %248 = vst [vmem:[%s4459_s7 + $0x3e0] sm:%s5196_s8] %v247_v63 }
 0x106 PF: > { %816 = sbr.rel (!%p4432_p3) target bundleno = 504 (0x1f8), region = 90  ;;  %s818_s6 = sand.u32 (%p4432_p3), 1, %s4168_s13  }
 0x107   : > { %s3406_s30 = sshll.u32 (%p4432_p3), %s4176_s15, 2  ;;  %s3405_s10 = sshll.u32 (%p4432_p3), %s818_s6, 10 }
 0x108   : > { %s822_s26 = ssub.s32 (%p4432_p3), 25, %s3406_s30  ;;  %s3486_s24 = sshll.u32 (%p4432_p3), %s4176_s15, 5 }
 0x109   : > { %p823_p0 = scmp.lt.s32.totalorder (%p4432_p3), %s822_s26, 4  ;;  %s5334_s7 = scalar_lea.vmem (%p4432_p3), %s7272_s1, %s3486_s24  }
 0x10a   : > { %s5338_s19 = scalar_lea.vmem (%p4432_p3), [#allocation3], %s3405_s10  }
 0x10d   : > { %s7352_s26 = smov (!%p823_p0, %s822_s26), 4 }
 0x10e   : > { %s3407_s5 = sshll.u32 %s7352_s26, 12  ;;  %s5336_s25 = sshll.u32 %s7352_s26, 3 }
 0x10f   : > { %p3411_p3 = scmp.eq.s32.totalorder %s3407_s5, 0 }
 0x110   : > { %p835_p1 = scmp.lt.u32.totalorder (!%p3411_p3), %s5336_s25, 8 }
 0x111   : > { %834 = sbr.rel (%p3411_p3) target bundleno = 504 (0x1f8), region = 94 }
 0x118   : > { %838 = sbr.rel (%p835_p1) target bundleno = 469 (0x1d5), region = 98  ;;  %s5342_s11 = sand.u32 (!%p835_p1), 7, %s5336_s25  }
 0x119   : > { %p916_p2 = scmp.eq.s32.totalorder (!%p835_p1), %s5342_s11, 0  ;;  %p3412_p4 = scmp.ne.s32.totalorder (!%p835_p1), %s5342_s11, 0 }
 0x11f   : > { %919 = sbr.rel (%p3412_p4) target bundleno = 361 (0x169), region = 113  ;;  %s920_s29 = sshrl.u32 (!%p3412_p4), %s5336_s25, 3 }
 0x120   : > { %s5349_s21 = sshrl.u32 (!%p3412_p4), %s920_s29, 1 }
 0x121   : > { %p3413_p5 = scmp.le.s32.totalorder (!%p3412_p4), %s5349_s21, 0 }
 0x126   : > { %3232 = sbr.rel (%p3413_p5) target bundleno = 334 (0x14e), region = 365  ;;  %s7299_s18 = smov (!%p3413_p5), %s5338_s19 }
 0x127   : > { %s7300_s9 = smov (!%p3413_p5), %s5334_s7  ;;  %s5358_s27 = smov (!%p3413_p5), 0  }
 0x128   : > { %s5360_s20 = smov (!%p3413_p5), 0  }
 0x12d LB: >> { %v933_v0 = vld [vmem:[%s4252_s9] sm:$0xff]  ;;  %v935_v1 = vld [vmem:[%s4252_s9 + $0x8] sm:$0xff]  ;;  %s1061_s0 = sadd.s32 1, %s4256_s27  ;;  %v939_v3 = vld [vmem:[%s4252_s9 + $0xd0] sm:$0xff]  ;;  %s927_s20 = sadd.s32 1, %s4260_s20   ;;  %s4260_s20 = sphi %s5360_s20, %s927_s20   ;;  %s4256_s27 = sphi %s5358_s27, %s7303_s27   ;;  %s4252_s9 = sphi %s7300_s9, %s7302_s9   ;;  %s4248_s18 = sphi %s7299_s18, %s7301_s18  }
 0x12e   : >> { %v937_v2 = vld [vmem:[%s4252_s9 + $0xc8] sm:$0xff]  ;;  %934 = vst [vmem:[%s4248_s18] sm:$0xff] %v933_v0  ;;  %936 = vst [vmem:[%s4248_s18 + $0x8] sm:$0xff] %v935_v1  ;;  %v941_v4 = vld [vmem:[%s4252_s9 + $0x190] sm:$0xff]  ;;  %p1062_p7 = scmp.ge.s32.totalorder %s1061_s0, %s5349_s21  ;;  %p926_p8 = scmp.ge.s32.totalorder %s927_s20, %s5349_s21 }
 0x12f   : >> { %938 = vst [vmem:[%s4248_s18 + $0x20] sm:$0xff] %v937_v2  ;;  %v943_v5 = vld [vmem:[%s4252_s9 + $0x198] sm:$0xff]  ;;  %940 = vst [vmem:[%s4248_s18 + $0x28] sm:$0xff] %v939_v3  ;;  %v947_v7 = vld [vmem:[%s4252_s9 + $0x260] sm:$0xff] }
 0x130   : >> { %942 = vst [vmem:[%s4248_s18 + $0x40] sm:$0xff] %v941_v4  ;;  %944 = vst [vmem:[%s4248_s18 + $0x48] sm:$0xff] %v943_v5  ;;  %v945_v6 = vld [vmem:[%s4252_s9 + $0x258] sm:$0xff]  ;;  %v949_v8 = vld [vmem:[%s4252_s9 + $0x320] sm:$0xff]  ;;  %s7354_s0 = smov (%p1062_p7, %s1061_s0), 0 }
 0x131   : >> { %946 = vst [vmem:[%s4248_s18 + $0x60] sm:$0xff] %v945_v6  ;;  %948 = vst [vmem:[%s4248_s18 + $0x68] sm:$0xff] %v947_v7  ;;  %v951_v9 = vld [vmem:[%s4252_s9 + $0x328] sm:$0xff]  ;;  %v955_v11 = vld [vmem:[%s4252_s9 + $0x3f0] sm:$0xff]  ;;  %s3414_s8 = sshll.u32 %s7354_s0, 4  ;;  %s7303_s27 = smov %s7354_s0 }
 0x132   : >> { %950 = vst [vmem:[%s4248_s18 + $0x80] sm:$0xff] %v949_v8  ;;  %v953_v10 = vld [vmem:[%s4252_s9 + $0x3e8] sm:$0xff]  ;;  %952 = vst [vmem:[%s4248_s18 + $0x88] sm:$0xff] %v951_v9  ;;  %v957_v12 = vld [vmem:[%s4252_s9 + $0x4b0] sm:$0xff]  ;;  %s5416_s6 = scalar_lea.vmem %s5334_s7, %s3414_s8   ;;  %s5419_s30 = scalar_lea.vmem %s5338_s19, %s3414_s8 [#allocation3]  }
 0x133   : >> { %954 = vst [vmem:[%s4248_s18 + $0xa0] sm:$0xff] %v953_v10  ;;  %956 = vst [vmem:[%s4248_s18 + $0xa8] sm:$0xff] %v955_v11  ;;  %v959_v13 = vld [vmem:[%s4252_s9 + $0x4b8] sm:$0xff]  ;;  %v963_v15 = vld [vmem:[%s4252_s9 + $0x580] sm:$0xff] }
 0x134   : >> { %v961_v14 = vld [vmem:[%s4252_s9 + $0x578] sm:$0xff]  ;;  %958 = vst [vmem:[%s4248_s18 + $0xc0] sm:$0xff] %v957_v12  ;;  %960 = vst [vmem:[%s4248_s18 + $0xc8] sm:$0xff] %v959_v13  ;;  %v965_v16 = vld [vmem:[%s4252_s9 + $0x640] sm:$0xff] }
 0x135   : >> { %962 = vst [vmem:[%s4248_s18 + $0xe0] sm:$0xff] %v961_v14  ;;  %v967_v17 = vld [vmem:[%s4252_s9 + $0x648] sm:$0xff]  ;;  %964 = vst [vmem:[%s4248_s18 + $0xe8] sm:$0xff] %v963_v15  ;;  %v971_v19 = vld [vmem:[%s4252_s9 + $0x710] sm:$0xff] }
 0x136   : >> { %966 = vst [vmem:[%s4248_s18 + $0x100] sm:$0xff] %v965_v16  ;;  %968 = vst [vmem:[%s4248_s18 + $0x108] sm:$0xff] %v967_v17  ;;  %v969_v18 = vld [vmem:[%s4252_s9 + $0x708] sm:$0xff]  ;;  %v973_v20 = vld [vmem:[%s4252_s9 + $0x7d0] sm:$0xff] }
 0x137   : >> { %970 = vst [vmem:[%s4248_s18 + $0x120] sm:$0xff] %v969_v18  ;;  %972 = vst [vmem:[%s4248_s18 + $0x128] sm:$0xff] %v971_v19  ;;  %v975_v21 = vld [vmem:[%s4252_s9 + $0x7d8] sm:$0xff]  ;;  %v979_v23 = vld [vmem:[%s4252_s9 + $0x8a0] sm:$0xff] }
 0x138   : >> { %974 = vst [vmem:[%s4248_s18 + $0x140] sm:$0xff] %v973_v20  ;;  %v977_v22 = vld [vmem:[%s4252_s9 + $0x898] sm:$0xff]  ;;  %976 = vst [vmem:[%s4248_s18 + $0x148] sm:$0xff] %v975_v21  ;;  %v981_v24 = vld [vmem:[%s4252_s9 + $0x960] sm:$0xff] }
 0x139   : >> { %978 = vst [vmem:[%s4248_s18 + $0x160] sm:$0xff] %v977_v22  ;;  %980 = vst [vmem:[%s4248_s18 + $0x168] sm:$0xff] %v979_v23  ;;  %v983_v25 = vld [vmem:[%s4252_s9 + $0x968] sm:$0xff]  ;;  %v987_v27 = vld [vmem:[%s4252_s9 + $0xa30] sm:$0xff] }
 0x13a   : >> { %v985_v26 = vld [vmem:[%s4252_s9 + $0xa28] sm:$0xff]  ;;  %982 = vst [vmem:[%s4248_s18 + $0x180] sm:$0xff] %v981_v24  ;;  %984 = vst [vmem:[%s4248_s18 + $0x188] sm:$0xff] %v983_v25  ;;  %v989_v28 = vld [vmem:[%s4252_s9 + $0xaf0] sm:$0xff] }
 0x13b   : >> { %986 = vst [vmem:[%s4248_s18 + $0x1a0] sm:$0xff] %v985_v26  ;;  %v991_v29 = vld [vmem:[%s4252_s9 + $0xaf8] sm:$0xff]  ;;  %988 = vst [vmem:[%s4248_s18 + $0x1a8] sm:$0xff] %v987_v27  ;;  %v995_v31 = vld [vmem:[%s4252_s9 + $0xbc0] sm:$0xff] }
 0x13c   : >> { %990 = vst [vmem:[%s4248_s18 + $0x1c0] sm:$0xff] %v989_v28  ;;  %992 = vst [vmem:[%s4248_s18 + $0x1c8] sm:$0xff] %v991_v29  ;;  %v993_v30 = vld [vmem:[%s4252_s9 + $0xbb8] sm:$0xff]  ;;  %v997_v32 = vld [vmem:[%s4252_s9 + $0xc80] sm:$0xff] }
 0x13d   : >> { %994 = vst [vmem:[%s4248_s18 + $0x1e0] sm:$0xff] %v993_v30  ;;  %996 = vst [vmem:[%s4248_s18 + $0x1e8] sm:$0xff] %v995_v31  ;;  %v999_v33 = vld [vmem:[%s4252_s9 + $0xc88] sm:$0xff]  ;;  %v1003_v35 = vld [vmem:[%s4252_s9 + $0xd50] sm:$0xff] }
 0x13e   : >> { %998 = vst [vmem:[%s4248_s18 + $0x200] sm:$0xff] %v997_v32  ;;  %v1001_v34 = vld [vmem:[%s4252_s9 + $0xd48] sm:$0xff]  ;;  %1000 = vst [vmem:[%s4248_s18 + $0x208] sm:$0xff] %v999_v33  ;;  %v1005_v36 = vld [vmem:[%s4252_s9 + $0xe10] sm:$0xff] }
 0x13f   : >> { %1002 = vst [vmem:[%s4248_s18 + $0x220] sm:$0xff] %v1001_v34  ;;  %1004 = vst [vmem:[%s4248_s18 + $0x228] sm:$0xff] %v1003_v35  ;;  %v1007_v37 = vld [vmem:[%s4252_s9 + $0xe18] sm:$0xff]  ;;  %v1011_v39 = vld [vmem:[%s4252_s9 + $0xee0] sm:$0xff] }
 0x140   : >> { %v1009_v38 = vld [vmem:[%s4252_s9 + $0xed8] sm:$0xff]  ;;  %1006 = vst [vmem:[%s4248_s18 + $0x240] sm:$0xff] %v1005_v36  ;;  %1008 = vst [vmem:[%s4248_s18 + $0x248] sm:$0xff] %v1007_v37  ;;  %v1013_v40 = vld [vmem:[%s4252_s9 + $0xfa0] sm:$0xff] }
 0x141   : >> { %1010 = vst [vmem:[%s4248_s18 + $0x260] sm:$0xff] %v1009_v38  ;;  %v1015_v41 = vld [vmem:[%s4252_s9 + $0xfa8] sm:$0xff]  ;;  %1012 = vst [vmem:[%s4248_s18 + $0x268] sm:$0xff] %v1011_v39  ;;  %v1019_v43 = vld [vmem:[%s4252_s9 + $0x1070] sm:$0xff] }
 0x142   : >> { %1014 = vst [vmem:[%s4248_s18 + $0x280] sm:$0xff] %v1013_v40  ;;  %1016 = vst [vmem:[%s4248_s18 + $0x288] sm:$0xff] %v1015_v41  ;;  %v1017_v42 = vld [vmem:[%s4252_s9 + $0x1068] sm:$0xff]  ;;  %v1021_v44 = vld [vmem:[%s4252_s9 + $0x1130] sm:$0xff] }
 0x143   : >> { %1018 = vst [vmem:[%s4248_s18 + $0x2a0] sm:$0xff] %v1017_v42  ;;  %1020 = vst [vmem:[%s4248_s18 + $0x2a8] sm:$0xff] %v1019_v43  ;;  %v1023_v45 = vld [vmem:[%s4252_s9 + $0x1138] sm:$0xff]  ;;  %v1027_v47 = vld [vmem:[%s4252_s9 + $0x1200] sm:$0xff] }
 0x144   : >> { %1022 = vst [vmem:[%s4248_s18 + $0x2c0] sm:$0xff] %v1021_v44  ;;  %v1025_v46 = vld [vmem:[%s4252_s9 + $0x11f8] sm:$0xff]  ;;  %1024 = vst [vmem:[%s4248_s18 + $0x2c8] sm:$0xff] %v1023_v45  ;;  %v1029_v48 = vld [vmem:[%s4252_s9 + $0x12c0] sm:$0xff] }
 0x145   : >> { %1026 = vst [vmem:[%s4248_s18 + $0x2e0] sm:$0xff] %v1025_v46  ;;  %1028 = vst [vmem:[%s4248_s18 + $0x2e8] sm:$0xff] %v1027_v47  ;;  %v1031_v49 = vld [vmem:[%s4252_s9 + $0x12c8] sm:$0xff]  ;;  %v1035_v51 = vld [vmem:[%s4252_s9 + $0x1390] sm:$0xff] }
 0x146   : >> { %v1033_v50 = vld [vmem:[%s4252_s9 + $0x1388] sm:$0xff]  ;;  %1030 = vst [vmem:[%s4248_s18 + $0x300] sm:$0xff] %v1029_v48  ;;  %1032 = vst [vmem:[%s4248_s18 + $0x308] sm:$0xff] %v1031_v49  ;;  %v1037_v52 = vld [vmem:[%s4252_s9 + $0x1450] sm:$0xff] }
 0x147   : >> { %1034 = vst [vmem:[%s4248_s18 + $0x320] sm:$0xff] %v1033_v50  ;;  %v1039_v53 = vld [vmem:[%s4252_s9 + $0x1458] sm:$0xff]  ;;  %1036 = vst [vmem:[%s4248_s18 + $0x328] sm:$0xff] %v1035_v51  ;;  %v1043_v55 = vld [vmem:[%s4252_s9 + $0x1520] sm:$0xff]  ;;  %929 = sbr.rel (!%p926_p8) target bundleno = 301 (0x12d), region = 371 }
 0x148   : >> { %1038 = vst [vmem:[%s4248_s18 + $0x340] sm:$0xff] %v1037_v52  ;;  %1040 = vst [vmem:[%s4248_s18 + $0x348] sm:$0xff] %v1039_v53  ;;  %v1041_v54 = vld [vmem:[%s4252_s9 + $0x1518] sm:$0xff]  ;;  %v1045_v56 = vld [vmem:[%s4252_s9 + $0x15e0] sm:$0xff] }
 0x149   : >> { %1042 = vst [vmem:[%s4248_s18 + $0x360] sm:$0xff] %v1041_v54  ;;  %1044 = vst [vmem:[%s4248_s18 + $0x368] sm:$0xff] %v1043_v55  ;;  %v1047_v57 = vld [vmem:[%s4252_s9 + $0x15e8] sm:$0xff]  ;;  %v1051_v59 = vld [vmem:[%s4252_s9 + $0x16b0] sm:$0xff] }
 0x14a   : >> { %1046 = vst [vmem:[%s4248_s18 + $0x380] sm:$0xff] %v1045_v56  ;;  %v1049_v58 = vld [vmem:[%s4252_s9 + $0x16a8] sm:$0xff]  ;;  %1048 = vst [vmem:[%s4248_s18 + $0x388] sm:$0xff] %v1047_v57  ;;  %v1053_v60 = vld [vmem:[%s4252_s9 + $0x1770] sm:$0xff] }
 0x14b   : >> { %1050 = vst [vmem:[%s4248_s18 + $0x3a0] sm:$0xff] %v1049_v58  ;;  %1052 = vst [vmem:[%s4248_s18 + $0x3a8] sm:$0xff] %v1051_v59  ;;  %v1055_v61 = vld [vmem:[%s4252_s9 + $0x1778] sm:$0xff]  ;;  %v1059_v63 = vld [vmem:[%s4252_s9 + $0x1840] sm:$0xff] }
 0x14c   : >> { %v1057_v62 = vld [vmem:[%s4252_s9 + $0x1838] sm:$0xff]  ;;  %1054 = vst [vmem:[%s4248_s18 + $0x3c0] sm:$0xff] %v1053_v60  ;;  %1056 = vst [vmem:[%s4248_s18 + $0x3c8] sm:$0xff] %v1055_v61  ;;  %s7302_s9 = smov %s5416_s6 }
 0x14d   : >> { %1058 = vst [vmem:[%s4248_s18 + $0x3e0] sm:$0xff] %v1057_v62  ;;  %1060 = vst [vmem:[%s4248_s18 + $0x3e8] sm:$0xff] %v1059_v63  ;;  %s7301_s18 = smov %s5419_s30 }
 0x14e PF: > { %s5525_s10 = sand.u32 1, %s920_s29   ;;  %s3487_s26 = sshll.u32 %s5349_s21, 8 }
 0x14f   : > { %s1072_s24 = sshra.s32 %s3487_s26, 4  ;;  %p3419_p9 = scmp.le.s32.totalorder %s5525_s10, 0 }
 0x150   : > { %s5529_s28 = scalar_lea.vmem %s5334_s7, %s1072_s24   ;;  %s5532_s4 = scalar_lea.vmem %s5338_s19, %s1072_s24 [#allocation3]  }
 0x151   : > { %3246 = sbr.rel (%p3419_p9) target bundleno = 361 (0x169), region = 376  ;;  %s7304_s5 = smov (!%p3419_p9), %s5532_s4 }
 0x152   : > { %s7305_s18 = smov (!%p3419_p9), %s5529_s28  ;;  %s5541_s9 = smov (!%p3419_p9), 0  }
 0x153   : > { %s5543_s27 = smov (!%p3419_p9), 0  }
 0x158 LB: >> { %v1088_v0 = vld [vmem:[%s4268_s18] sm:$0xff]  ;;  %v1090_v1 = vld [vmem:[%s4268_s18 + $0xc8] sm:$0xff]  ;;  %v1092_v2 = vld [vmem:[%s4268_s18 + $0x190] sm:$0xff]  ;;  %s1152_s29 = sadd.s32 1, %s4272_s9  ;;  %s1082_s27 = sadd.s32 1, %s4276_s27   ;;  %s4276_s27 = sphi %s5543_s27, %s1082_s27   ;;  %s4272_s9 = sphi %s5541_s9, %s7308_s9   ;;  %s4268_s18 = sphi %s7305_s18, %s7307_s18   ;;  %s4264_s5 = sphi %s7304_s5, %s7306_s5  }
 0x159   : >> { %1089 = vst [vmem:[%s4264_s5] sm:$0xff] %v1088_v0  ;;  %1091 = vst [vmem:[%s4264_s5 + $0x20] sm:$0xff] %v1090_v1  ;;  %v1094_v3 = vld [vmem:[%s4268_s18 + $0x258] sm:$0xff]  ;;  %v1096_v4 = vld [vmem:[%s4268_s18 + $0x320] sm:$0xff]  ;;  %p1153_p10 = scmp.ge.s32.totalorder %s1152_s29, %s5525_s10  ;;  %p1081_p11 = scmp.ge.s32.totalorder %s1082_s27, %s5525_s10 }
 0x15a   : >> { %1093 = vst [vmem:[%s4264_s5 + $0x40] sm:$0xff] %v1092_v2  ;;  %v1098_v5 = vld [vmem:[%s4268_s18 + $0x3e8] sm:$0xff]  ;;  %1095 = vst [vmem:[%s4264_s5 + $0x60] sm:$0xff] %v1094_v3  ;;  %v1100_v6 = vld [vmem:[%s4268_s18 + $0x4b0] sm:$0xff] }
 0x15b   : >> { %1097 = vst [vmem:[%s4264_s5 + $0x80] sm:$0xff] %v1096_v4  ;;  %1099 = vst [vmem:[%s4264_s5 + $0xa0] sm:$0xff] %v1098_v5  ;;  %v1102_v7 = vld [vmem:[%s4268_s18 + $0x578] sm:$0xff]  ;;  %v1104_v8 = vld [vmem:[%s4268_s18 + $0x640] sm:$0xff]  ;;  %s7356_s29 = smov (%p1153_p10, %s1152_s29), 0 }
 0x15c   : >> { %1101 = vst [vmem:[%s4264_s5 + $0xc0] sm:$0xff] %v1100_v6  ;;  %1103 = vst [vmem:[%s4264_s5 + $0xe0] sm:$0xff] %v1102_v7  ;;  %v1106_v9 = vld [vmem:[%s4268_s18 + $0x708] sm:$0xff]  ;;  %v1108_v10 = vld [vmem:[%s4268_s18 + $0x7d0] sm:$0xff]  ;;  %s3420_s21 = sshll.u32 %s7356_s29, 3  ;;  %s7308_s9 = smov %s7356_s29 }
 0x15d   : >> { %1105 = vst [vmem:[%s4264_s5 + $0x100] sm:$0xff] %v1104_v8  ;;  %v1110_v11 = vld [vmem:[%s4268_s18 + $0x898] sm:$0xff]  ;;  %1107 = vst [vmem:[%s4264_s5 + $0x120] sm:$0xff] %v1106_v9  ;;  %v1112_v12 = vld [vmem:[%s4268_s18 + $0x960] sm:$0xff]  ;;  %s5599_s20 = scalar_lea.vmem %s5529_s28, %s3420_s21   ;;  %s1158_s0 = scalar_lea.vmem %s5532_s4, %s3420_s21 [#allocation3]  }
 0x15e   : >> { %1109 = vst [vmem:[%s4264_s5 + $0x140] sm:$0xff] %v1108_v10  ;;  %1111 = vst [vmem:[%s4264_s5 + $0x160] sm:$0xff] %v1110_v11  ;;  %v1114_v13 = vld [vmem:[%s4268_s18 + $0xa28] sm:$0xff]  ;;  %v1116_v14 = vld [vmem:[%s4268_s18 + $0xaf0] sm:$0xff] }
 0x15f   : >> { %1113 = vst [vmem:[%s4264_s5 + $0x180] sm:$0xff] %v1112_v12  ;;  %1115 = vst [vmem:[%s4264_s5 + $0x1a0] sm:$0xff] %v1114_v13  ;;  %v1118_v15 = vld [vmem:[%s4268_s18 + $0xbb8] sm:$0xff]  ;;  %v1120_v16 = vld [vmem:[%s4268_s18 + $0xc80] sm:$0xff] }
 0x160   : >> { %1117 = vst [vmem:[%s4264_s5 + $0x1c0] sm:$0xff] %v1116_v14  ;;  %v1122_v17 = vld [vmem:[%s4268_s18 + $0xd48] sm:$0xff]  ;;  %1119 = vst [vmem:[%s4264_s5 + $0x1e0] sm:$0xff] %v1118_v15  ;;  %v1124_v18 = vld [vmem:[%s4268_s18 + $0xe10] sm:$0xff] }
 0x161   : >> { %1121 = vst [vmem:[%s4264_s5 + $0x200] sm:$0xff] %v1120_v16  ;;  %1123 = vst [vmem:[%s4264_s5 + $0x220] sm:$0xff] %v1122_v17  ;;  %v1126_v19 = vld [vmem:[%s4268_s18 + $0xed8] sm:$0xff]  ;;  %v1128_v20 = vld [vmem:[%s4268_s18 + $0xfa0] sm:$0xff] }
 0x162   : >> { %1125 = vst [vmem:[%s4264_s5 + $0x240] sm:$0xff] %v1124_v18  ;;  %1127 = vst [vmem:[%s4264_s5 + $0x260] sm:$0xff] %v1126_v19  ;;  %v1130_v21 = vld [vmem:[%s4268_s18 + $0x1068] sm:$0xff]  ;;  %v1132_v22 = vld [vmem:[%s4268_s18 + $0x1130] sm:$0xff]  ;;  %1084 = sbr.rel (!%p1081_p11) target bundleno = 344 (0x158), region = 382 }
 0x163   : >> { %1129 = vst [vmem:[%s4264_s5 + $0x280] sm:$0xff] %v1128_v20  ;;  %v1134_v23 = vld [vmem:[%s4268_s18 + $0x11f8] sm:$0xff]  ;;  %1131 = vst [vmem:[%s4264_s5 + $0x2a0] sm:$0xff] %v1130_v21  ;;  %v1136_v24 = vld [vmem:[%s4268_s18 + $0x12c0] sm:$0xff] }
 0x164   : >> { %1133 = vst [vmem:[%s4264_s5 + $0x2c0] sm:$0xff] %v1132_v22  ;;  %1135 = vst [vmem:[%s4264_s5 + $0x2e0] sm:$0xff] %v1134_v23  ;;  %v1138_v25 = vld [vmem:[%s4268_s18 + $0x1388] sm:$0xff]  ;;  %v1140_v26 = vld [vmem:[%s4268_s18 + $0x1450] sm:$0xff] }
 0x165   : >> { %1137 = vst [vmem:[%s4264_s5 + $0x300] sm:$0xff] %v1136_v24  ;;  %1139 = vst [vmem:[%s4264_s5 + $0x320] sm:$0xff] %v1138_v25  ;;  %v1142_v27 = vld [vmem:[%s4268_s18 + $0x1518] sm:$0xff]  ;;  %v1144_v28 = vld [vmem:[%s4268_s18 + $0x15e0] sm:$0xff] }
 0x166   : >> { %1141 = vst [vmem:[%s4264_s5 + $0x340] sm:$0xff] %v1140_v26  ;;  %v1146_v29 = vld [vmem:[%s4268_s18 + $0x16a8] sm:$0xff]  ;;  %1143 = vst [vmem:[%s4264_s5 + $0x360] sm:$0xff] %v1142_v27  ;;  %v1148_v30 = vld [vmem:[%s4268_s18 + $0x1770] sm:$0xff] }
 0x167   : >> { %1145 = vst [vmem:[%s4264_s5 + $0x380] sm:$0xff] %v1144_v28  ;;  %1147 = vst [vmem:[%s4264_s5 + $0x3a0] sm:$0xff] %v1146_v29  ;;  %v1150_v31 = vld [vmem:[%s4268_s18 + $0x1838] sm:$0xff]  ;;  %s7307_s18 = smov %s5599_s20 }
 0x168   : >> { %1149 = vst [vmem:[%s4264_s5 + $0x3c0] sm:$0xff] %v1148_v30  ;;  %1151 = vst [vmem:[%s4264_s5 + $0x3e0] sm:$0xff] %v1150_v31  ;;  %s7306_s5 = smov %s1158_s0 }
 0x169 PF: > { %1161 = sbr.rel (%p916_p2) target bundleno = 469 (0x1d5), region = 131  ;;  %s1163_s8 = ssub.s32 (!%p916_p2), %s5336_s25, %s5342_s11 }
 0x16a   : > { %s1167_s6 = sshrl.u32 (!%p916_p2), %s5336_s25, 3  ;;  %s5645_s30 = scalar_lea.vmem (!%p916_p2), %s5334_s7, %s1163_s8 }
 0x16b   : > { %s5648_s26 = scalar_lea.vmem (!%p916_p2), %s5338_s19, %s1163_s8 [#allocation3]  ;;  %s5652_s24 = sshrl.u32 (!%p916_p2), %s1167_s6, 1 }
 0x16c   : > { %p3422_p12 = scmp.le.s32.totalorder (!%p916_p2), %s5652_s24, 0 }
 0x170   : > { %3260 = sbr.rel (%p3422_p12) target bundleno = 408 (0x198), region = 387  ;;  %s7309_s10 = smov (!%p3422_p12), %s5338_s19 }
 0x171   : > { %s7310_s28 = smov (!%p3422_p12), %s5334_s7  ;;  %s5661_s4 = smov (!%p3422_p12), 0  }
 0x172   : > { %s5663_s5 = smov (!%p3422_p12), 0  }
 0x177 LB: >> { %v1180_v32 = vld [vmem:[%s4284_s28] sm:$0xff]  ;;  %v1182_v33 = vld [vmem:[%s4284_s28 + $0x8] sm:$0xff]  ;;  %s1308_s18 = sadd.s32 1, %s4288_s4  ;;  %v1186_v35 = vld [vmem:[%s4284_s28 + $0xd0] sm:$0xff]  ;;  %s1174_s5 = sadd.s32 1, %s4292_s5   ;;  %s4292_s5 = sphi %s5663_s5, %s1174_s5   ;;  %s4288_s4 = sphi %s5661_s4, %s7313_s4   ;;  %s4284_s28 = sphi %s7310_s28, %s7312_s28   ;;  %s4280_s10 = sphi %s7309_s10, %s7311_s10  }
 0x178   : >> { %v1184_v34 = vld [vmem:[%s4284_s28 + $0xc8] sm:$0xff]  ;;  %1181 = vst [vmem:[%s4280_s10] sm:$0xff] %v1180_v32  ;;  %1183 = vst [vmem:[%s4280_s10 + $0x8] sm:$0xff] %v1182_v33  ;;  %v1188_v36 = vld [vmem:[%s4284_s28 + $0x190] sm:$0xff]  ;;  %p1309_p13 = scmp.ge.s32.totalorder %s1308_s18, %s5652_s24  ;;  %p1173_p0 = scmp.ge.s32.totalorder %s1174_s5, %s5652_s24 }
 0x179   : >> { %1185 = vst [vmem:[%s4280_s10 + $0x20] sm:$0xff] %v1184_v34  ;;  %v1190_v37 = vld [vmem:[%s4284_s28 + $0x198] sm:$0xff]  ;;  %1187 = vst [vmem:[%s4280_s10 + $0x28] sm:$0xff] %v1186_v35  ;;  %v1194_v39 = vld [vmem:[%s4284_s28 + $0x260] sm:$0xff] }
 0x17a   : >> { %1189 = vst [vmem:[%s4280_s10 + $0x40] sm:$0xff] %v1188_v36  ;;  %1191 = vst [vmem:[%s4280_s10 + $0x48] sm:$0xff] %v1190_v37  ;;  %v1192_v38 = vld [vmem:[%s4284_s28 + $0x258] sm:$0xff]  ;;  %v1196_v40 = vld [vmem:[%s4284_s28 + $0x320] sm:$0xff]  ;;  %s7358_s18 = smov (%p1309_p13, %s1308_s18), 0 }
 0x17b   : >> { %1193 = vst [vmem:[%s4280_s10 + $0x60] sm:$0xff] %v1192_v38  ;;  %1195 = vst [vmem:[%s4280_s10 + $0x68] sm:$0xff] %v1194_v39  ;;  %v1198_v41 = vld [vmem:[%s4284_s28 + $0x328] sm:$0xff]  ;;  %v1202_v43 = vld [vmem:[%s4284_s28 + $0x3f0] sm:$0xff]  ;;  %s3423_s9 = sshll.u32 %s7358_s18, 4  ;;  %s7313_s4 = smov %s7358_s18 }
 0x17c   : >> { %1197 = vst [vmem:[%s4280_s10 + $0x80] sm:$0xff] %v1196_v40  ;;  %v1200_v42 = vld [vmem:[%s4284_s28 + $0x3e8] sm:$0xff]  ;;  %1199 = vst [vmem:[%s4280_s10 + $0x88] sm:$0xff] %v1198_v41  ;;  %v1204_v44 = vld [vmem:[%s4284_s28 + $0x4b0] sm:$0xff]  ;;  %s5719_s27 = scalar_lea.vmem %s5334_s7, %s3423_s9   ;;  %s5722_s29 = scalar_lea.vmem %s5338_s19, %s3423_s9 [#allocation3]  }
 0x17d   : >> { %1201 = vst [vmem:[%s4280_s10 + $0xa0] sm:$0xff] %v1200_v42  ;;  %1203 = vst [vmem:[%s4280_s10 + $0xa8] sm:$0xff] %v1202_v43  ;;  %v1206_v45 = vld [vmem:[%s4284_s28 + $0x4b8] sm:$0xff]  ;;  %v1210_v47 = vld [vmem:[%s4284_s28 + $0x580] sm:$0xff] }
 0x17e   : >> { %v1208_v46 = vld [vmem:[%s4284_s28 + $0x578] sm:$0xff]  ;;  %1205 = vst [vmem:[%s4280_s10 + $0xc0] sm:$0xff] %v1204_v44  ;;  %1207 = vst [vmem:[%s4280_s10 + $0xc8] sm:$0xff] %v1206_v45  ;;  %v1212_v48 = vld [vmem:[%s4284_s28 + $0x640] sm:$0xff] }
 0x17f   : >> { %1209 = vst [vmem:[%s4280_s10 + $0xe0] sm:$0xff] %v1208_v46  ;;  %v1214_v49 = vld [vmem:[%s4284_s28 + $0x648] sm:$0xff]  ;;  %1211 = vst [vmem:[%s4280_s10 + $0xe8] sm:$0xff] %v1210_v47  ;;  %v1218_v51 = vld [vmem:[%s4284_s28 + $0x710] sm:$0xff] }
 0x180   : >> { %1213 = vst [vmem:[%s4280_s10 + $0x100] sm:$0xff] %v1212_v48  ;;  %1215 = vst [vmem:[%s4280_s10 + $0x108] sm:$0xff] %v1214_v49  ;;  %v1216_v50 = vld [vmem:[%s4284_s28 + $0x708] sm:$0xff]  ;;  %v1220_v52 = vld [vmem:[%s4284_s28 + $0x7d0] sm:$0xff] }
 0x181   : >> { %1217 = vst [vmem:[%s4280_s10 + $0x120] sm:$0xff] %v1216_v50  ;;  %1219 = vst [vmem:[%s4280_s10 + $0x128] sm:$0xff] %v1218_v51  ;;  %v1222_v53 = vld [vmem:[%s4284_s28 + $0x7d8] sm:$0xff]  ;;  %v1226_v55 = vld [vmem:[%s4284_s28 + $0x8a0] sm:$0xff] }
 0x182   : >> { %1221 = vst [vmem:[%s4280_s10 + $0x140] sm:$0xff] %v1220_v52  ;;  %v1224_v54 = vld [vmem:[%s4284_s28 + $0x898] sm:$0xff]  ;;  %1223 = vst [vmem:[%s4280_s10 + $0x148] sm:$0xff] %v1222_v53  ;;  %v1228_v56 = vld [vmem:[%s4284_s28 + $0x960] sm:$0xff] }
 0x183   : >> { %1225 = vst [vmem:[%s4280_s10 + $0x160] sm:$0xff] %v1224_v54  ;;  %1227 = vst [vmem:[%s4280_s10 + $0x168] sm:$0xff] %v1226_v55  ;;  %v1230_v57 = vld [vmem:[%s4284_s28 + $0x968] sm:$0xff]  ;;  %v1234_v59 = vld [vmem:[%s4284_s28 + $0xa30] sm:$0xff] }
 0x184   : >> { %v1232_v58 = vld [vmem:[%s4284_s28 + $0xa28] sm:$0xff]  ;;  %1229 = vst [vmem:[%s4280_s10 + $0x180] sm:$0xff] %v1228_v56  ;;  %1231 = vst [vmem:[%s4280_s10 + $0x188] sm:$0xff] %v1230_v57  ;;  %v1236_v60 = vld [vmem:[%s4284_s28 + $0xaf0] sm:$0xff] }
 0x185   : >> { %1233 = vst [vmem:[%s4280_s10 + $0x1a0] sm:$0xff] %v1232_v58  ;;  %v1238_v61 = vld [vmem:[%s4284_s28 + $0xaf8] sm:$0xff]  ;;  %1235 = vst [vmem:[%s4280_s10 + $0x1a8] sm:$0xff] %v1234_v59  ;;  %v1242_v63 = vld [vmem:[%s4284_s28 + $0xbc0] sm:$0xff] }
 0x186   : >> { %1237 = vst [vmem:[%s4280_s10 + $0x1c0] sm:$0xff] %v1236_v60  ;;  %1239 = vst [vmem:[%s4280_s10 + $0x1c8] sm:$0xff] %v1238_v61  ;;  %v1240_v62 = vld [vmem:[%s4284_s28 + $0xbb8] sm:$0xff]  ;;  %v1244_v0 = vld [vmem:[%s4284_s28 + $0xc80] sm:$0xff] }
 0x187   : >> { %1241 = vst [vmem:[%s4280_s10 + $0x1e0] sm:$0xff] %v1240_v62  ;;  %1243 = vst [vmem:[%s4280_s10 + $0x1e8] sm:$0xff] %v1242_v63  ;;  %v1246_v1 = vld [vmem:[%s4284_s28 + $0xc88] sm:$0xff]  ;;  %v1250_v3 = vld [vmem:[%s4284_s28 + $0xd50] sm:$0xff] }
 0x188   : >> { %1245 = vst [vmem:[%s4280_s10 + $0x200] sm:$0xff] %v1244_v0  ;;  %v1248_v2 = vld [vmem:[%s4284_s28 + $0xd48] sm:$0xff]  ;;  %1247 = vst [vmem:[%s4280_s10 + $0x208] sm:$0xff] %v1246_v1  ;;  %v1252_v4 = vld [vmem:[%s4284_s28 + $0xe10] sm:$0xff] }
 0x189   : >> { %1249 = vst [vmem:[%s4280_s10 + $0x220] sm:$0xff] %v1248_v2  ;;  %1251 = vst [vmem:[%s4280_s10 + $0x228] sm:$0xff] %v1250_v3  ;;  %v1254_v5 = vld [vmem:[%s4284_s28 + $0xe18] sm:$0xff]  ;;  %v1258_v7 = vld [vmem:[%s4284_s28 + $0xee0] sm:$0xff] }
 0x18a   : >> { %v1256_v6 = vld [vmem:[%s4284_s28 + $0xed8] sm:$0xff]  ;;  %1253 = vst [vmem:[%s4280_s10 + $0x240] sm:$0xff] %v1252_v4  ;;  %1255 = vst [vmem:[%s4280_s10 + $0x248] sm:$0xff] %v1254_v5  ;;  %v1260_v8 = vld [vmem:[%s4284_s28 + $0xfa0] sm:$0xff] }
 0x18b   : >> { %1257 = vst [vmem:[%s4280_s10 + $0x260] sm:$0xff] %v1256_v6  ;;  %v1262_v9 = vld [vmem:[%s4284_s28 + $0xfa8] sm:$0xff]  ;;  %1259 = vst [vmem:[%s4280_s10 + $0x268] sm:$0xff] %v1258_v7  ;;  %v1266_v11 = vld [vmem:[%s4284_s28 + $0x1070] sm:$0xff] }
 0x18c   : >> { %1261 = vst [vmem:[%s4280_s10 + $0x280] sm:$0xff] %v1260_v8  ;;  %1263 = vst [vmem:[%s4280_s10 + $0x288] sm:$0xff] %v1262_v9  ;;  %v1264_v10 = vld [vmem:[%s4284_s28 + $0x1068] sm:$0xff]  ;;  %v1268_v12 = vld [vmem:[%s4284_s28 + $0x1130] sm:$0xff] }
 0x18d   : >> { %1265 = vst [vmem:[%s4280_s10 + $0x2a0] sm:$0xff] %v1264_v10  ;;  %1267 = vst [vmem:[%s4280_s10 + $0x2a8] sm:$0xff] %v1266_v11  ;;  %v1270_v13 = vld [vmem:[%s4284_s28 + $0x1138] sm:$0xff]  ;;  %v1274_v15 = vld [vmem:[%s4284_s28 + $0x1200] sm:$0xff] }
 0x18e   : >> { %1269 = vst [vmem:[%s4280_s10 + $0x2c0] sm:$0xff] %v1268_v12  ;;  %v1272_v14 = vld [vmem:[%s4284_s28 + $0x11f8] sm:$0xff]  ;;  %1271 = vst [vmem:[%s4280_s10 + $0x2c8] sm:$0xff] %v1270_v13  ;;  %v1276_v16 = vld [vmem:[%s4284_s28 + $0x12c0] sm:$0xff] }
 0x18f   : >> { %1273 = vst [vmem:[%s4280_s10 + $0x2e0] sm:$0xff] %v1272_v14  ;;  %1275 = vst [vmem:[%s4280_s10 + $0x2e8] sm:$0xff] %v1274_v15  ;;  %v1278_v17 = vld [vmem:[%s4284_s28 + $0x12c8] sm:$0xff]  ;;  %v1282_v19 = vld [vmem:[%s4284_s28 + $0x1390] sm:$0xff] }
 0x190   : >> { %v1280_v18 = vld [vmem:[%s4284_s28 + $0x1388] sm:$0xff]  ;;  %1277 = vst [vmem:[%s4280_s10 + $0x300] sm:$0xff] %v1276_v16  ;;  %1279 = vst [vmem:[%s4280_s10 + $0x308] sm:$0xff] %v1278_v17  ;;  %v1284_v20 = vld [vmem:[%s4284_s28 + $0x1450] sm:$0xff] }
 0x191   : >> { %1281 = vst [vmem:[%s4280_s10 + $0x320] sm:$0xff] %v1280_v18  ;;  %v1286_v21 = vld [vmem:[%s4284_s28 + $0x1458] sm:$0xff]  ;;  %1283 = vst [vmem:[%s4280_s10 + $0x328] sm:$0xff] %v1282_v19  ;;  %v1290_v23 = vld [vmem:[%s4284_s28 + $0x1520] sm:$0xff]  ;;  %1176 = sbr.rel (!%p1173_p0) target bundleno = 375 (0x177), region = 393 }
 0x192   : >> { %1285 = vst [vmem:[%s4280_s10 + $0x340] sm:$0xff] %v1284_v20  ;;  %1287 = vst [vmem:[%s4280_s10 + $0x348] sm:$0xff] %v1286_v21  ;;  %v1288_v22 = vld [vmem:[%s4284_s28 + $0x1518] sm:$0xff]  ;;  %v1292_v24 = vld [vmem:[%s4284_s28 + $0x15e0] sm:$0xff] }
 0x193   : >> { %1289 = vst [vmem:[%s4280_s10 + $0x360] sm:$0xff] %v1288_v22  ;;  %1291 = vst [vmem:[%s4280_s10 + $0x368] sm:$0xff] %v1290_v23  ;;  %v1294_v25 = vld [vmem:[%s4284_s28 + $0x15e8] sm:$0xff]  ;;  %v1298_v27 = vld [vmem:[%s4284_s28 + $0x16b0] sm:$0xff] }
 0x194   : >> { %1293 = vst [vmem:[%s4280_s10 + $0x380] sm:$0xff] %v1292_v24  ;;  %v1296_v26 = vld [vmem:[%s4284_s28 + $0x16a8] sm:$0xff]  ;;  %1295 = vst [vmem:[%s4280_s10 + $0x388] sm:$0xff] %v1294_v25  ;;  %v1300_v28 = vld [vmem:[%s4284_s28 + $0x1770] sm:$0xff] }
 0x195   : >> { %1297 = vst [vmem:[%s4280_s10 + $0x3a0] sm:$0xff] %v1296_v26  ;;  %1299 = vst [vmem:[%s4280_s10 + $0x3a8] sm:$0xff] %v1298_v27  ;;  %v1302_v29 = vld [vmem:[%s4284_s28 + $0x1778] sm:$0xff]  ;;  %v1306_v31 = vld [vmem:[%s4284_s28 + $0x1840] sm:$0xff] }
 0x196   : >> { %v1304_v30 = vld [vmem:[%s4284_s28 + $0x1838] sm:$0xff]  ;;  %1301 = vst [vmem:[%s4280_s10 + $0x3c0] sm:$0xff] %v1300_v28  ;;  %1303 = vst [vmem:[%s4280_s10 + $0x3c8] sm:$0xff] %v1302_v29  ;;  %s7312_s28 = smov %s5719_s27 }
 0x197   : >> { %1305 = vst [vmem:[%s4280_s10 + $0x3e0] sm:$0xff] %v1304_v30  ;;  %1307 = vst [vmem:[%s4280_s10 + $0x3e8] sm:$0xff] %v1306_v31  ;;  %s7311_s10 = smov %s5722_s29 }
 0x198 PF: > { %s5828_s21 = sand.u32 1, %s1167_s6   ;;  %s3489_s20 = sshll.u32 %s5652_s24, 8 }
 0x199   : > { %s1319_s0 = sshra.s32 %s3489_s20, 4  ;;  %p3428_p3 = scmp.le.s32.totalorder %s5828_s21, 0 }
 0x19a   : > { %s5832_s8 = scalar_lea.vmem %s5334_s7, %s1319_s0   ;;  %s5835_s9 = scalar_lea.vmem %s5338_s19, %s1319_s0 [#allocation3]  }
 0x19b   : > { %3274 = sbr.rel (%p3428_p3) target bundleno = 435 (0x1b3), region = 398  ;;  %s7314_s10 = smov (!%p3428_p3), %s5835_s9 }
 0x19c   : > { %s7315_s28 = smov (!%p3428_p3), %s5832_s8  ;;  %s5844_s4 = smov (!%p3428_p3), 0  }
 0x19d   : > { %s5846_s5 = smov (!%p3428_p3), 0  }
 0x1a2 LB: >> { %v1335_v32 = vld [vmem:[%s4300_s28] sm:$0xff]  ;;  %v1337_v33 = vld [vmem:[%s4300_s28 + $0xc8] sm:$0xff]  ;;  %v1339_v34 = vld [vmem:[%s4300_s28 + $0x190] sm:$0xff]  ;;  %s1399_s6 = sadd.s32 1, %s4304_s4  ;;  %s1329_s5 = sadd.s32 1, %s4308_s5   ;;  %s4308_s5 = sphi %s5846_s5, %s1329_s5   ;;  %s4304_s4 = sphi %s5844_s4, %s7318_s4   ;;  %s4300_s28 = sphi %s7315_s28, %s7317_s28   ;;  %s4296_s10 = sphi %s7314_s10, %s7316_s10  }
 0x1a3   : >> { %1336 = vst [vmem:[%s4296_s10] sm:$0xff] %v1335_v32  ;;  %1338 = vst [vmem:[%s4296_s10 + $0x20] sm:$0xff] %v1337_v33  ;;  %v1341_v35 = vld [vmem:[%s4300_s28 + $0x258] sm:$0xff]  ;;  %v1343_v36 = vld [vmem:[%s4300_s28 + $0x320] sm:$0xff]  ;;  %p1400_p1 = scmp.ge.s32.totalorder %s1399_s6, %s5828_s21  ;;  %p1328_p2 = scmp.ge.s32.totalorder %s1329_s5, %s5828_s21 }
 0x1a4   : >> { %1340 = vst [vmem:[%s4296_s10 + $0x40] sm:$0xff] %v1339_v34  ;;  %v1345_v37 = vld [vmem:[%s4300_s28 + $0x3e8] sm:$0xff]  ;;  %1342 = vst [vmem:[%s4296_s10 + $0x60] sm:$0xff] %v1341_v35  ;;  %v1347_v38 = vld [vmem:[%s4300_s28 + $0x4b0] sm:$0xff] }
 0x1a5   : >> { %1344 = vst [vmem:[%s4296_s10 + $0x80] sm:$0xff] %v1343_v36  ;;  %1346 = vst [vmem:[%s4296_s10 + $0xa0] sm:$0xff] %v1345_v37  ;;  %v1349_v39 = vld [vmem:[%s4300_s28 + $0x578] sm:$0xff]  ;;  %v1351_v40 = vld [vmem:[%s4300_s28 + $0x640] sm:$0xff]  ;;  %s7360_s6 = smov (%p1400_p1, %s1399_s6), 0 }
 0x1a6   : >> { %1348 = vst [vmem:[%s4296_s10 + $0xc0] sm:$0xff] %v1347_v38  ;;  %1350 = vst [vmem:[%s4296_s10 + $0xe0] sm:$0xff] %v1349_v39  ;;  %v1353_v41 = vld [vmem:[%s4300_s28 + $0x708] sm:$0xff]  ;;  %v1355_v42 = vld [vmem:[%s4300_s28 + $0x7d0] sm:$0xff]  ;;  %s3429_s24 = sshll.u32 %s7360_s6, 3  ;;  %s7318_s4 = smov %s7360_s6 }
 0x1a7   : >> { %1352 = vst [vmem:[%s4296_s10 + $0x100] sm:$0xff] %v1351_v40  ;;  %v1357_v43 = vld [vmem:[%s4300_s28 + $0x898] sm:$0xff]  ;;  %1354 = vst [vmem:[%s4296_s10 + $0x120] sm:$0xff] %v1353_v41  ;;  %v1359_v44 = vld [vmem:[%s4300_s28 + $0x960] sm:$0xff]  ;;  %s5902_s18 = scalar_lea.vmem %s5832_s8, %s3429_s24   ;;  %s1405_s27 = scalar_lea.vmem %s5835_s9, %s3429_s24 [#allocation3]  }
 0x1a8   : >> { %1356 = vst [vmem:[%s4296_s10 + $0x140] sm:$0xff] %v1355_v42  ;;  %1358 = vst [vmem:[%s4296_s10 + $0x160] sm:$0xff] %v1357_v43  ;;  %v1361_v45 = vld [vmem:[%s4300_s28 + $0xa28] sm:$0xff]  ;;  %v1363_v46 = vld [vmem:[%s4300_s28 + $0xaf0] sm:$0xff] }
 0x1a9   : >> { %1360 = vst [vmem:[%s4296_s10 + $0x180] sm:$0xff] %v1359_v44  ;;  %1362 = vst [vmem:[%s4296_s10 + $0x1a0] sm:$0xff] %v1361_v45  ;;  %v1365_v47 = vld [vmem:[%s4300_s28 + $0xbb8] sm:$0xff]  ;;  %v1367_v48 = vld [vmem:[%s4300_s28 + $0xc80] sm:$0xff] }
 0x1aa   : >> { %1364 = vst [vmem:[%s4296_s10 + $0x1c0] sm:$0xff] %v1363_v46  ;;  %v1369_v49 = vld [vmem:[%s4300_s28 + $0xd48] sm:$0xff]  ;;  %1366 = vst [vmem:[%s4296_s10 + $0x1e0] sm:$0xff] %v1365_v47  ;;  %v1371_v50 = vld [vmem:[%s4300_s28 + $0xe10] sm:$0xff] }
 0x1ab   : >> { %1368 = vst [vmem:[%s4296_s10 + $0x200] sm:$0xff] %v1367_v48  ;;  %1370 = vst [vmem:[%s4296_s10 + $0x220] sm:$0xff] %v1369_v49  ;;  %v1373_v51 = vld [vmem:[%s4300_s28 + $0xed8] sm:$0xff]  ;;  %v1375_v52 = vld [vmem:[%s4300_s28 + $0xfa0] sm:$0xff] }
 0x1ac   : >> { %1372 = vst [vmem:[%s4296_s10 + $0x240] sm:$0xff] %v1371_v50  ;;  %1374 = vst [vmem:[%s4296_s10 + $0x260] sm:$0xff] %v1373_v51  ;;  %v1377_v53 = vld [vmem:[%s4300_s28 + $0x1068] sm:$0xff]  ;;  %v1379_v54 = vld [vmem:[%s4300_s28 + $0x1130] sm:$0xff]  ;;  %1331 = sbr.rel (!%p1328_p2) target bundleno = 418 (0x1a2), region = 404 }
 0x1ad   : >> { %1376 = vst [vmem:[%s4296_s10 + $0x280] sm:$0xff] %v1375_v52  ;;  %v1381_v55 = vld [vmem:[%s4300_s28 + $0x11f8] sm:$0xff]  ;;  %1378 = vst [vmem:[%s4296_s10 + $0x2a0] sm:$0xff] %v1377_v53  ;;  %v1383_v56 = vld [vmem:[%s4300_s28 + $0x12c0] sm:$0xff] }
 0x1ae   : >> { %1380 = vst [vmem:[%s4296_s10 + $0x2c0] sm:$0xff] %v1379_v54  ;;  %1382 = vst [vmem:[%s4296_s10 + $0x2e0] sm:$0xff] %v1381_v55  ;;  %v1385_v57 = vld [vmem:[%s4300_s28 + $0x1388] sm:$0xff]  ;;  %v1387_v58 = vld [vmem:[%s4300_s28 + $0x1450] sm:$0xff] }
 0x1af   : >> { %1384 = vst [vmem:[%s4296_s10 + $0x300] sm:$0xff] %v1383_v56  ;;  %1386 = vst [vmem:[%s4296_s10 + $0x320] sm:$0xff] %v1385_v57  ;;  %v1389_v59 = vld [vmem:[%s4300_s28 + $0x1518] sm:$0xff]  ;;  %v1391_v60 = vld [vmem:[%s4300_s28 + $0x15e0] sm:$0xff] }
 0x1b0   : >> { %1388 = vst [vmem:[%s4296_s10 + $0x340] sm:$0xff] %v1387_v58  ;;  %v1393_v61 = vld [vmem:[%s4300_s28 + $0x16a8] sm:$0xff]  ;;  %1390 = vst [vmem:[%s4296_s10 + $0x360] sm:$0xff] %v1389_v59  ;;  %v1395_v62 = vld [vmem:[%s4300_s28 + $0x1770] sm:$0xff] }
 0x1b1   : >> { %1392 = vst [vmem:[%s4296_s10 + $0x380] sm:$0xff] %v1391_v60  ;;  %1394 = vst [vmem:[%s4296_s10 + $0x3a0] sm:$0xff] %v1393_v61  ;;  %v1397_v63 = vld [vmem:[%s4300_s28 + $0x1838] sm:$0xff]  ;;  %s7317_s28 = smov %s5902_s18 }
 0x1b2   : >> { %1396 = vst [vmem:[%s4296_s10 + $0x3c0] sm:$0xff] %v1395_v62  ;;  %1398 = vst [vmem:[%s4296_s10 + $0x3e0] sm:$0xff] %v1397_v63  ;;  %s7316_s10 = smov %s1405_s27 }
 0x1b3 PF: > { %s4376_s29 = smov 0  }
 0x1b4   : > { %s5943_s20 = sshllo.u32 %s4376_s29, %s5342_s11 }
 0x1b5   : > { %v1415_v0 = vld [vmem:[%s5645_s30] sm:%s5943_s20]  ;;  %v1417_v1 = vld [vmem:[%s5645_s30 + $0xc8] sm:%s5943_s20] }
 0x1b6   : > { %1416 = vst [vmem:[%s5648_s26] sm:%s5943_s20] %v1415_v0  ;;  %1418 = vst [vmem:[%s5648_s26 + $0x20] sm:%s5943_s20] %v1417_v1 }
 0x1b7   : > { %v1419_v2 = vld [vmem:[%s5645_s30 + $0x190] sm:%s5943_s20]  ;;  %v1421_v3 = vld [vmem:[%s5645_s30 + $0x258] sm:%s5943_s20] }
 0x1b8   : > { %1420 = vst [vmem:[%s5648_s26 + $0x40] sm:%s5943_s20] %v1419_v2  ;;  %1422 = vst [vmem:[%s5648_s26 + $0x60] sm:%s5943_s20] %v1421_v3 }
 0x1b9   : > { %v1423_v4 = vld [vmem:[%s5645_s30 + $0x320] sm:%s5943_s20]  ;;  %v1425_v5 = vld [vmem:[%s5645_s30 + $0x3e8] sm:%s5943_s20] }
 0x1ba   : > { %1424 = vst [vmem:[%s5648_s26 + $0x80] sm:%s5943_s20] %v1423_v4  ;;  %1426 = vst [vmem:[%s5648_s26 + $0xa0] sm:%s5943_s20] %v1425_v5 }
 0x1bb   : > { %v1427_v6 = vld [vmem:[%s5645_s30 + $0x4b0] sm:%s5943_s20]  ;;  %v1429_v7 = vld [vmem:[%s5645_s30 + $0x578] sm:%s5943_s20] }
 0x1bc   : > { %1428 = vst [vmem:[%s5648_s26 + $0xc0] sm:%s5943_s20] %v1427_v6  ;;  %1430 = vst [vmem:[%s5648_s26 + $0xe0] sm:%s5943_s20] %v1429_v7 }
 0x1bd   : > { %v1431_v8 = vld [vmem:[%s5645_s30 + $0x640] sm:%s5943_s20]  ;;  %v1433_v9 = vld [vmem:[%s5645_s30 + $0x708] sm:%s5943_s20] }
 0x1be   : > { %1432 = vst [vmem:[%s5648_s26 + $0x100] sm:%s5943_s20] %v1431_v8  ;;  %1434 = vst [vmem:[%s5648_s26 + $0x120] sm:%s5943_s20] %v1433_v9 }
 0x1bf   : > { %v1435_v10 = vld [vmem:[%s5645_s30 + $0x7d0] sm:%s5943_s20]  ;;  %v1437_v11 = vld [vmem:[%s5645_s30 + $0x898] sm:%s5943_s20] }
 0x1c0   : > { %1436 = vst [vmem:[%s5648_s26 + $0x140] sm:%s5943_s20] %v1435_v10  ;;  %1438 = vst [vmem:[%s5648_s26 + $0x160] sm:%s5943_s20] %v1437_v11 }
 0x1c1   : > { %v1439_v12 = vld [vmem:[%s5645_s30 + $0x960] sm:%s5943_s20]  ;;  %v1441_v13 = vld [vmem:[%s5645_s30 + $0xa28] sm:%s5943_s20] }
 0x1c2   : > { %1440 = vst [vmem:[%s5648_s26 + $0x180] sm:%s5943_s20] %v1439_v12  ;;  %1442 = vst [vmem:[%s5648_s26 + $0x1a0] sm:%s5943_s20] %v1441_v13 }
 0x1c3   : > { %v1443_v14 = vld [vmem:[%s5645_s30 + $0xaf0] sm:%s5943_s20]  ;;  %v1445_v15 = vld [vmem:[%s5645_s30 + $0xbb8] sm:%s5943_s20] }
 0x1c4   : > { %1444 = vst [vmem:[%s5648_s26 + $0x1c0] sm:%s5943_s20] %v1443_v14  ;;  %1446 = vst [vmem:[%s5648_s26 + $0x1e0] sm:%s5943_s20] %v1445_v15 }
 0x1c5   : > { %v1447_v16 = vld [vmem:[%s5645_s30 + $0xc80] sm:%s5943_s20]  ;;  %v1449_v17 = vld [vmem:[%s5645_s30 + $0xd48] sm:%s5943_s20] }
 0x1c6   : > { %1448 = vst [vmem:[%s5648_s26 + $0x200] sm:%s5943_s20] %v1447_v16  ;;  %1450 = vst [vmem:[%s5648_s26 + $0x220] sm:%s5943_s20] %v1449_v17 }
 0x1c7   : > { %v1451_v18 = vld [vmem:[%s5645_s30 + $0xe10] sm:%s5943_s20]  ;;  %v1453_v19 = vld [vmem:[%s5645_s30 + $0xed8] sm:%s5943_s20] }
 0x1c8   : > { %1452 = vst [vmem:[%s5648_s26 + $0x240] sm:%s5943_s20] %v1451_v18  ;;  %1454 = vst [vmem:[%s5648_s26 + $0x260] sm:%s5943_s20] %v1453_v19 }
 0x1c9   : > { %v1455_v20 = vld [vmem:[%s5645_s30 + $0xfa0] sm:%s5943_s20]  ;;  %v1457_v21 = vld [vmem:[%s5645_s30 + $0x1068] sm:%s5943_s20] }
 0x1ca   : > { %1456 = vst [vmem:[%s5648_s26 + $0x280] sm:%s5943_s20] %v1455_v20  ;;  %1458 = vst [vmem:[%s5648_s26 + $0x2a0] sm:%s5943_s20] %v1457_v21 }
 0x1cb   : > { %v1459_v22 = vld [vmem:[%s5645_s30 + $0x1130] sm:%s5943_s20]  ;;  %v1461_v23 = vld [vmem:[%s5645_s30 + $0x11f8] sm:%s5943_s20] }
 0x1cc   : > { %1460 = vst [vmem:[%s5648_s26 + $0x2c0] sm:%s5943_s20] %v1459_v22  ;;  %1462 = vst [vmem:[%s5648_s26 + $0x2e0] sm:%s5943_s20] %v1461_v23 }
 0x1cd   : > { %v1463_v24 = vld [vmem:[%s5645_s30 + $0x12c0] sm:%s5943_s20]  ;;  %v1465_v25 = vld [vmem:[%s5645_s30 + $0x1388] sm:%s5943_s20] }
 0x1ce   : > { %1464 = vst [vmem:[%s5648_s26 + $0x300] sm:%s5943_s20] %v1463_v24  ;;  %1466 = vst [vmem:[%s5648_s26 + $0x320] sm:%s5943_s20] %v1465_v25 }
 0x1cf   : > { %v1467_v26 = vld [vmem:[%s5645_s30 + $0x1450] sm:%s5943_s20]  ;;  %v1469_v27 = vld [vmem:[%s5645_s30 + $0x1518] sm:%s5943_s20] }
 0x1d0   : > { %1468 = vst [vmem:[%s5648_s26 + $0x340] sm:%s5943_s20] %v1467_v26  ;;  %1470 = vst [vmem:[%s5648_s26 + $0x360] sm:%s5943_s20] %v1469_v27 }
 0x1d1   : > { %v1471_v28 = vld [vmem:[%s5645_s30 + $0x15e0] sm:%s5943_s20]  ;;  %v1473_v29 = vld [vmem:[%s5645_s30 + $0x16a8] sm:%s5943_s20] }
 0x1d2   : > { %1472 = vst [vmem:[%s5648_s26 + $0x380] sm:%s5943_s20] %v1471_v28  ;;  %1474 = vst [vmem:[%s5648_s26 + $0x3a0] sm:%s5943_s20] %v1473_v29 }
 0x1d3   : > { %v1475_v30 = vld [vmem:[%s5645_s30 + $0x1770] sm:%s5943_s20]  ;;  %v1477_v31 = vld [vmem:[%s5645_s30 + $0x1838] sm:%s5943_s20] }
 0x1d4   : > { %1476 = vst [vmem:[%s5648_s26 + $0x3c0] sm:%s5943_s20] %v1475_v30  ;;  %1478 = vst [vmem:[%s5648_s26 + $0x3e0] sm:%s5943_s20] %v1477_v31 }
 0x1d5 PF: > { %p3431_p4 = scmp.ge.u32.totalorder %s5336_s25, 8 }
 0x1d6   : > { %s4377_s11 = smov (!%p3431_p4), 0  }
 0x1d7   : > { %841 = sbr.rel (%p3431_p4) target bundleno = 504 (0x1f8), region = 102  ;;  %s6075_s30 = sshllo.u32 (!%p3431_p4), %s4377_s11, %s5336_s25 }
 0x1d8   : > { %v851_v32 = vld [vmem:[%s5334_s7] sm:%s6075_s30] (!%p3431_p4)  ;;  %v853_v33 = vld [vmem:[%s5334_s7 + $0xc8] sm:%s6075_s30] (!%p3431_p4) }
 0x1d9   : > { %852 = vst [vmem:[%s5338_s19] sm:%s6075_s30] (!%p3431_p4), %v851_v32  ;;  %854 = vst [vmem:[%s5338_s19 + $0x20] sm:%s6075_s30] (!%p3431_p4), %v853_v33 }
 0x1da   : > { %v855_v34 = vld [vmem:[%s5334_s7 + $0x190] sm:%s6075_s30] (!%p3431_p4)  ;;  %v857_v35 = vld [vmem:[%s5334_s7 + $0x258] sm:%s6075_s30] (!%p3431_p4) }
 0x1db   : > { %856 = vst [vmem:[%s5338_s19 + $0x40] sm:%s6075_s30] (!%p3431_p4), %v855_v34  ;;  %858 = vst [vmem:[%s5338_s19 + $0x60] sm:%s6075_s30] (!%p3431_p4), %v857_v35 }
 0x1dc   : > { %v859_v36 = vld [vmem:[%s5334_s7 + $0x320] sm:%s6075_s30] (!%p3431_p4)  ;;  %v861_v37 = vld [vmem:[%s5334_s7 + $0x3e8] sm:%s6075_s30] (!%p3431_p4) }
 0x1dd   : > { %860 = vst [vmem:[%s5338_s19 + $0x80] sm:%s6075_s30] (!%p3431_p4), %v859_v36  ;;  %862 = vst [vmem:[%s5338_s19 + $0xa0] sm:%s6075_s30] (!%p3431_p4), %v861_v37 }
 0x1de   : > { %v863_v38 = vld [vmem:[%s5334_s7 + $0x4b0] sm:%s6075_s30]  ;;  %v865_v39 = vld [vmem:[%s5334_s7 + $0x578] sm:%s6075_s30] }
 0x1df   : > { %864 = vst [vmem:[%s5338_s19 + $0xc0] sm:%s6075_s30] %v863_v38  ;;  %866 = vst [vmem:[%s5338_s19 + $0xe0] sm:%s6075_s30] %v865_v39 }
 0x1e0   : > { %v867_v40 = vld [vmem:[%s5334_s7 + $0x640] sm:%s6075_s30]  ;;  %v869_v41 = vld [vmem:[%s5334_s7 + $0x708] sm:%s6075_s30] }
 0x1e1   : > { %868 = vst [vmem:[%s5338_s19 + $0x100] sm:%s6075_s30] %v867_v40  ;;  %870 = vst [vmem:[%s5338_s19 + $0x120] sm:%s6075_s30] %v869_v41 }
 0x1e2   : > { %v871_v42 = vld [vmem:[%s5334_s7 + $0x7d0] sm:%s6075_s30]  ;;  %v873_v43 = vld [vmem:[%s5334_s7 + $0x898] sm:%s6075_s30] }
 0x1e3   : > { %872 = vst [vmem:[%s5338_s19 + $0x140] sm:%s6075_s30] %v871_v42  ;;  %874 = vst [vmem:[%s5338_s19 + $0x160] sm:%s6075_s30] %v873_v43 }
 0x1e4   : > { %v875_v44 = vld [vmem:[%s5334_s7 + $0x960] sm:%s6075_s30]  ;;  %v877_v45 = vld [vmem:[%s5334_s7 + $0xa28] sm:%s6075_s30] }
 0x1e5   : > { %876 = vst [vmem:[%s5338_s19 + $0x180] sm:%s6075_s30] %v875_v44  ;;  %878 = vst [vmem:[%s5338_s19 + $0x1a0] sm:%s6075_s30] %v877_v45 }
 0x1e6   : > { %v879_v46 = vld [vmem:[%s5334_s7 + $0xaf0] sm:%s6075_s30]  ;;  %v881_v47 = vld [vmem:[%s5334_s7 + $0xbb8] sm:%s6075_s30] }
 0x1e7   : > { %880 = vst [vmem:[%s5338_s19 + $0x1c0] sm:%s6075_s30] %v879_v46  ;;  %882 = vst [vmem:[%s5338_s19 + $0x1e0] sm:%s6075_s30] %v881_v47 }
 0x1e8   : > { %v883_v48 = vld [vmem:[%s5334_s7 + $0xc80] sm:%s6075_s30]  ;;  %v885_v49 = vld [vmem:[%s5334_s7 + $0xd48] sm:%s6075_s30] }
 0x1e9   : > { %884 = vst [vmem:[%s5338_s19 + $0x200] sm:%s6075_s30] %v883_v48  ;;  %886 = vst [vmem:[%s5338_s19 + $0x220] sm:%s6075_s30] %v885_v49 }
 0x1ea   : > { %v887_v50 = vld [vmem:[%s5334_s7 + $0xe10] sm:%s6075_s30]  ;;  %v889_v51 = vld [vmem:[%s5334_s7 + $0xed8] sm:%s6075_s30] }
 0x1eb   : > { %888 = vst [vmem:[%s5338_s19 + $0x240] sm:%s6075_s30] %v887_v50  ;;  %890 = vst [vmem:[%s5338_s19 + $0x260] sm:%s6075_s30] %v889_v51 }
 0x1ec   : > { %v891_v52 = vld [vmem:[%s5334_s7 + $0xfa0] sm:%s6075_s30]  ;;  %v893_v53 = vld [vmem:[%s5334_s7 + $0x1068] sm:%s6075_s30] }
 0x1ed   : > { %892 = vst [vmem:[%s5338_s19 + $0x280] sm:%s6075_s30] %v891_v52  ;;  %894 = vst [vmem:[%s5338_s19 + $0x2a0] sm:%s6075_s30] %v893_v53 }
 0x1ee   : > { %v895_v54 = vld [vmem:[%s5334_s7 + $0x1130] sm:%s6075_s30]  ;;  %v897_v55 = vld [vmem:[%s5334_s7 + $0x11f8] sm:%s6075_s30] }
 0x1ef   : > { %896 = vst [vmem:[%s5338_s19 + $0x2c0] sm:%s6075_s30] %v895_v54  ;;  %898 = vst [vmem:[%s5338_s19 + $0x2e0] sm:%s6075_s30] %v897_v55 }
 0x1f0   : > { %v899_v56 = vld [vmem:[%s5334_s7 + $0x12c0] sm:%s6075_s30]  ;;  %v901_v57 = vld [vmem:[%s5334_s7 + $0x1388] sm:%s6075_s30] }
 0x1f1   : > { %900 = vst [vmem:[%s5338_s19 + $0x300] sm:%s6075_s30] %v899_v56  ;;  %902 = vst [vmem:[%s5338_s19 + $0x320] sm:%s6075_s30] %v901_v57 }
 0x1f2   : > { %v903_v58 = vld [vmem:[%s5334_s7 + $0x1450] sm:%s6075_s30]  ;;  %v905_v59 = vld [vmem:[%s5334_s7 + $0x1518] sm:%s6075_s30] }
 0x1f3   : > { %904 = vst [vmem:[%s5338_s19 + $0x340] sm:%s6075_s30] %v903_v58  ;;  %906 = vst [vmem:[%s5338_s19 + $0x360] sm:%s6075_s30] %v905_v59 }
 0x1f4   : > { %v907_v60 = vld [vmem:[%s5334_s7 + $0x15e0] sm:%s6075_s30]  ;;  %v909_v61 = vld [vmem:[%s5334_s7 + $0x16a8] sm:%s6075_s30] }
 0x1f5   : > { %908 = vst [vmem:[%s5338_s19 + $0x380] sm:%s6075_s30] %v907_v60  ;;  %910 = vst [vmem:[%s5338_s19 + $0x3a0] sm:%s6075_s30] %v909_v61 }
 0x1f6   : > { %v911_v62 = vld [vmem:[%s5334_s7 + $0x1770] sm:%s6075_s30]  ;;  %v913_v63 = vld [vmem:[%s5334_s7 + $0x1838] sm:%s6075_s30] }
 0x1f7   : > { %912 = vst [vmem:[%s5338_s19 + $0x3c0] sm:%s6075_s30] %v911_v62  ;;  %914 = vst [vmem:[%s5338_s19 + $0x3e0] sm:%s6075_s30] %v913_v63 }
 0x1f8 PF: > { %p3432_p5 = scmp.ge.s32.totalorder %s4180_s16, 1  ;;  %p1481_p7 = scmp.lt.s32.totalorder %s4180_s16, 8 }
 0x1fa   : > { %p1482_p8 = pnand %p3432_p5, %p1481_p7 }
 0x1fb   : > { %s1488_s25 = sand.u32 (!%p1482_p8), 1, %s4164_s12   ;;  %v3928_v0 = vld [vmem:[%s7273_s2 + $0x4] ss:$8 sps:$4 sm:$0xff] (!%p1482_p8)  }
 0x1fc   : > { %1485 = sbr.rel (%p1482_p8) target bundleno = 1084 (0x43c), region = 156  ;;  %s3433_s26 = sshll.u32 (!%p1482_p8), %s1488_s25, 10  ;;  %2240 = vmatprep.mubr.bf16.mxu0 (!%p1482_p8), %v3928_v0  ;;  %2353 = vmatprep.mubr.bf16.mxu1 (!%p1482_p8), %v3928_v0 }
 0x1fd   : > { %s6213_s7 = scalar_lea.vmem (!%p1482_p8), [#allocation2], %s3433_s26  ;;  %s6217_s19 = scalar_lea.vmem (!%p1482_p8), [#allocation3], %s3433_s26 }
 0x1fe   : > { %v1537_v1 = vld [vmem:[%s6213_s7 + $0x8] sm:$0xff] (!%p1482_p8)  ;;  %v1539_v6 = vld [vmem:[%s6213_s7 + $0x18] sm:$0xff] (!%p1482_p8)  ;;  %v1536_v11 = vld [vmem:[%s6213_s7] sm:$0xff] (!%p1482_p8)  ;;  %s3435_s20 = sshll.u32 (!%p1482_p8), %s1488_s25, 9 }
 0x1ff   : > { %v1541_v2 = vld [vmem:[%s6213_s7 + $0x28] sm:$0xff] (!%p1482_p8)  ;;  %v1543_v7 = vld [vmem:[%s6213_s7 + $0x38] sm:$0xff] (!%p1482_p8)  ;;  %v1540_v15 = vld [vmem:[%s6213_s7 + $0x20] sm:$0xff] (!%p1482_p8)  ;;  %s6520_s11 = scalar_lea.vmem (!%p1482_p8), [#allocation4], %s3435_s20  }
 0x200   : > { %v1665_v3 = vld [vmem:[%s6217_s19 + $0x8] sm:$0xff] (!%p1482_p8)  ;;  %v1667_v9 = vld [vmem:[%s6217_s19 + $0x18] sm:$0xff] (!%p1482_p8)  ;;  %v1664_v16 = vld [vmem:[%s6217_s19] sm:$0xff] (!%p1482_p8) }
 0x201   : > { %v1669_v4 = vld [vmem:[%s6217_s19 + $0x28] sm:$0xff] (!%p1482_p8)  ;;  %v1793_v5 = vadd.f32 (!%p1482_p8), %v1665_v3, %v1537_v1  ;;  %v1671_v10 = vld [vmem:[%s6217_s19 + $0x38] sm:$0xff] (!%p1482_p8)  ;;  %v1795_v13 = vadd.f32 (!%p1482_p8), %v1667_v9, %v1539_v6  ;;  %v1668_v17 = vld [vmem:[%s6217_s19 + $0x20] sm:$0xff] (!%p1482_p8)  ;;  %v1792_v19 = vadd.f32 (!%p1482_p8), %v1664_v16, %v1536_v11 }
 0x202   : > { %v1797_v8 = vadd.f32 (!%p1482_p8), %v1669_v4, %v1541_v2  ;;  %v1799_v14 = vadd.f32 (!%p1482_p8), %v1671_v10, %v1543_v7  ;;  %v1796_v20 = vadd.f32 (!%p1482_p8), %v1668_v17, %v1540_v15  ;;  %v1538_v21 = vld [vmem:[%s6213_s7 + $0x10] sm:$0xff] (!%p1482_p8)  ;;  %v1545_v28 = vld [vmem:[%s6213_s7 + $0x48] sm:$0xff] (!%p1482_p8)  ;;  %v1547_v36 = vld [vmem:[%s6213_s7 + $0x58] sm:$0xff] (!%p1482_p8) }
 0x203   : > { %v1921_v12 = vmax.f32 %v1793_v5, 0.0  ;;  %v1542_v22 = vld [vmem:[%s6213_s7 + $0x30] sm:$0xff]  ;;  %v1923_v24 = vmax.f32 %v1795_v13, 0.0  ;;  %v1549_v29 = vld [vmem:[%s6213_s7 + $0x68] sm:$0xff]  ;;  %v1920_v31 = vmax.f32 %v1792_v19, 0.0  ;;  %v1551_v41 = vld [vmem:[%s6213_s7 + $0x78] sm:$0xff] }
 0x204   : > { %v1925_v18 = vmax.f32 %v1797_v8, 0.0  ;;  %v1666_v23 = vld [vmem:[%s6217_s19 + $0x10] sm:$0xff]  ;;  %v1927_v25 = vmax.f32 %v1799_v14, 0.0  ;;  %v1924_v32 = vmax.f32 %v1796_v20, 0.0  ;;  %v1673_v34 = vld [vmem:[%s6217_s19 + $0x48] sm:$0xff]  ;;  %v1675_v42 = vld [vmem:[%s6217_s19 + $0x58] sm:$0xff] }
 0x205   : > { %v1670_v26 = vld [vmem:[%s6217_s19 + $0x30] sm:$0xff]  ;;  %v1794_v27 = vadd.f32 %v1666_v23, %v1538_v21  ;;  %v1677_v35 = vld [vmem:[%s6217_s19 + $0x68] sm:$0xff]  ;;  %v1801_v39 = vadd.f32 %v1673_v34, %v1545_v28  ;;  %v1679_v43 = vld [vmem:[%s6217_s19 + $0x78] sm:$0xff]  ;;  %v1803_v46 = vadd.f32 %v1675_v42, %v1547_v36  ;;  %s3453_s12 = sshll.u32 (%p4439_p6), %s4172_s14, 2  ;;  %s3491_s25 = sshll.u32 (%p4439_p6), %s4172_s14, 5 }
 0x206   : > { %v2049_v30 = vpack.c.bf16 %v1925_v18, %v1921_v12  ;;  %v1798_v33 = vadd.f32 %v1670_v26, %v1542_v22  ;;  %v2051_v37 = vpack.c.bf16 %v1927_v25, %v1923_v24  ;;  %v1805_v40 = vadd.f32 %v1677_v35, %v1549_v29  ;;  %v1544_v48 = vld [vmem:[%s6213_s7 + $0x40] sm:$0xff]  ;;  %v1546_v55 = vld [vmem:[%s6213_s7 + $0x50] sm:$0xff]  ;;  %v1553_v63 = vld [vmem:[%s6213_s7 + $0x88] sm:$0xff]  ;;  %s2506_s30 = ssub.s32 (%p4439_p6), 25, %s3453_s12  ;;  %s6593_s0 = scalar_lea.vmem (%p4439_p6), %s7274_s3, %s3491_s25  }
 0x207   : > { %v1922_v38 = vmax.f32 %v1794_v27, 0.0  ;;  %v2048_v44 = vpack.c.bf16 %v1924_v32, %v1920_v31  ;;  %v1807_v47 = vadd.f32 %v1679_v43, %v1551_v41  ;;  %v1548_v49 = vld [vmem:[%s6213_s7 + $0x60] sm:$0xff]  ;;  %v1929_v51 = vmax.f32 %v1801_v39, 0.0  ;;  %v1550_v56 = vld [vmem:[%s6213_s7 + $0x70] sm:$0xff]  ;;  %v1557_v4 = vld [vmem:[%s6213_s7 + $0xa8] sm:$0xff]  ;;  %p2507_p9 = scmp.lt.s32.totalorder (%p4439_p6), %s2506_s30, 4 }
 0x208   : > { %2208 = vmatprep.subr.bf16.mxu0 %v2049_v30  ;;  %v1926_v45 = vmax.f32 %v1798_v33, 0.0  ;;  %v1672_v50 = vld [vmem:[%s6217_s19 + $0x40] sm:$0xff]  ;;  %2321 = vmatprep.subr.bf16.mxu1 %v2051_v37  ;;  %v1933_v52 = vmax.f32 %v1805_v40, 0.0  ;;  %v1931_v58 = vmax.f32 %v1803_v46, 0.0  ;;  %v1674_v61 = vld [vmem:[%s6217_s19 + $0x50] sm:$0xff]  ;;  %v1681_v5 = vld [vmem:[%s6217_s19 + $0x88] sm:$0xff] }
 0x209   : > { %v1676_v53 = vld [vmem:[%s6217_s19 + $0x60] sm:$0xff]  ;;  %v1800_v54 = vadd.f32 %v1672_v50, %v1544_v48  ;;  %2209 = vmatpush1.bf16.msra.mxu0 %v2048_v44  ;;  %v1935_v59 = vmax.f32 %v1807_v47, 0.0  ;;  %v1678_v62 = vld [vmem:[%s6217_s19 + $0x70] sm:$0xff]  ;;  %v1802_v2 = vadd.f32 %v1674_v61, %v1546_v55  ;;  %v1685_v6 = vld [vmem:[%s6217_s19 + $0xa8] sm:$0xff]  ;;  %v1809_v9 = vadd.f32 %v1681_v5, %v1553_v63 }
 0x20a   : > { %v2050_v57 = vpack.c.bf16 %v1926_v45, %v1922_v38  ;;  %v1804_v60 = vadd.f32 %v1676_v53, %v1548_v49  ;;  %v2053_v0 = vpack.c.bf16 %v1933_v52, %v1929_v51  ;;  %v1806_v3 = vadd.f32 %v1678_v62, %v1550_v56  ;;  %v1555_v11 = vld [vmem:[%s6213_s7 + $0x98] sm:$0xff]  ;;  %v1552_v18 = vld [vmem:[%s6213_s7 + $0x80] sm:$0xff]  ;;  %v1554_v26 = vld [vmem:[%s6213_s7 + $0x90] sm:$0xff] }
 0x20b   : > { %v1928_v1 = vmax.f32 %v1800_v54, 0.0  ;;  %v2055_v7 = vpack.c.bf16 %v1935_v59, %v1931_v58  ;;  %v1813_v10 = vadd.f32 %v1685_v6, %v1557_v4  ;;  %v1559_v12 = vld [vmem:[%s6213_s7 + $0xb8] sm:$0xff]  ;;  %v1930_v14 = vmax.f32 %v1802_v2, 0.0  ;;  %v1556_v19 = vld [vmem:[%s6213_s7 + $0xa0] sm:$0xff]  ;;  %v1558_v31 = vld [vmem:[%s6213_s7 + $0xb0] sm:$0xff] }
 0x20c   : > { %2322 = vmatpush1.bf16.msra.mxu1 %v2050_v57  ;;  %v1932_v8 = vmax.f32 %v1804_v60, 0.0  ;;  %v1683_v13 = vld [vmem:[%s6217_s19 + $0x98] sm:$0xff]  ;;  %2210 = vmatprep.subr.bf16.mxu0 %v2053_v0  ;;  %v1934_v15 = vmax.f32 %v1806_v3, 0.0  ;;  %v1937_v21 = vmax.f32 %v1809_v9, 0.0  ;;  %v1680_v24 = vld [vmem:[%s6217_s19 + $0x80] sm:$0xff]  ;;  %v1682_v32 = vld [vmem:[%s6217_s19 + $0x90] sm:$0xff] }
 0x20d   : > { %v1687_v16 = vld [vmem:[%s6217_s19 + $0xb8] sm:$0xff]  ;;  %v1811_v17 = vadd.f32 %v1683_v13, %v1555_v11  ;;  %2323 = vmatprep.subr.bf16.mxu1 %v2055_v7  ;;  %v1941_v22 = vmax.f32 %v1813_v10, 0.0  ;;  %v1684_v25 = vld [vmem:[%s6217_s19 + $0xa0] sm:$0xff]  ;;  %v1808_v29 = vadd.f32 %v1680_v24, %v1552_v18  ;;  %v1686_v33 = vld [vmem:[%s6217_s19 + $0xb0] sm:$0xff]  ;;  %v1810_v36 = vadd.f32 %v1682_v32, %v1554_v26 }
 0x20e   : > { %v2052_v20 = vpack.c.bf16 %v1932_v8, %v1928_v1  ;;  %v1815_v23 = vadd.f32 %v1687_v16, %v1559_v12  ;;  %v2054_v27 = vpack.c.bf16 %v1934_v15, %v1930_v14  ;;  %v1812_v30 = vadd.f32 %v1684_v25, %v1556_v19  ;;  %v1561_v38 = vld [vmem:[%s6213_s7 + $0xc8] sm:$0xff]  ;;  %v1563_v45 = vld [vmem:[%s6213_s7 + $0xd8] sm:$0xff]  ;;  %v1560_v53 = vld [vmem:[%s6213_s7 + $0xc0] sm:$0xff] }
 0x20f   : > { %v1939_v28 = vmax.f32 %v1811_v17, 0.0  ;;  %v2057_v34 = vpack.c.bf16 %v1941_v22, %v1937_v21  ;;  %v1814_v37 = vadd.f32 %v1686_v33, %v1558_v31  ;;  %v1565_v39 = vld [vmem:[%s6213_s7 + $0xe8] sm:$0xff]  ;;  %v1936_v41 = vmax.f32 %v1808_v29, 0.0  ;;  %v1567_v46 = vld [vmem:[%s6213_s7 + $0xf8] sm:$0xff]  ;;  %v1564_v58 = vld [vmem:[%s6213_s7 + $0xe0] sm:$0xff] }
 0x210   : > { %2211 = vmatpush1.bf16.msra.mxu0 %v2052_v20  ;;  %v1943_v35 = vmax.f32 %v1815_v23, 0.0  ;;  %v1689_v40 = vld [vmem:[%s6217_s19 + $0xc8] sm:$0xff]  ;;  %2324 = vmatpush1.bf16.msra.mxu1 %v2054_v27  ;;  %v1940_v42 = vmax.f32 %v1812_v30, 0.0  ;;  %v1938_v48 = vmax.f32 %v1810_v36, 0.0  ;;  %v1691_v51 = vld [vmem:[%s6217_s19 + $0xd8] sm:$0xff]  ;;  %v1688_v59 = vld [vmem:[%s6217_s19 + $0xc0] sm:$0xff] }
 0x211   : > { %v1693_v43 = vld [vmem:[%s6217_s19 + $0xe8] sm:$0xff]  ;;  %v1817_v44 = vadd.f32 %v1689_v40, %v1561_v38  ;;  %2212 = vmatprep.subr.bf16.mxu0 %v2057_v34  ;;  %v1942_v49 = vmax.f32 %v1814_v37, 0.0  ;;  %v1695_v52 = vld [vmem:[%s6217_s19 + $0xf8] sm:$0xff]  ;;  %v1819_v56 = vadd.f32 %v1691_v51, %v1563_v45  ;;  %v1692_v60 = vld [vmem:[%s6217_s19 + $0xe0] sm:$0xff]  ;;  %v1816_v63 = vadd.f32 %v1688_v59, %v1560_v53 }
 0x212   : > { %v2059_v47 = vpack.c.bf16 %v1943_v35, %v1939_v28  ;;  %v1821_v50 = vadd.f32 %v1693_v43, %v1565_v39  ;;  %v2056_v54 = vpack.c.bf16 %v1940_v42, %v1936_v41  ;;  %v1823_v57 = vadd.f32 %v1695_v52, %v1567_v46  ;;  %v1562_v1 = vld [vmem:[%s6213_s7 + $0xd0] sm:$0xff]  ;;  %v1569_v8 = vld [vmem:[%s6213_s7 + $0x108] sm:$0xff]  ;;  %v1571_v16 = vld [vmem:[%s6213_s7 + $0x118] sm:$0xff] }
 0x213   : > { %v1945_v55 = vmax.f32 %v1817_v44, 0.0  ;;  %v2058_v61 = vpack.c.bf16 %v1942_v49, %v1938_v48  ;;  %v1820_v0 = vadd.f32 %v1692_v60, %v1564_v58  ;;  %v1566_v2 = vld [vmem:[%s6213_s7 + $0xf0] sm:$0xff]  ;;  %v1947_v4 = vmax.f32 %v1819_v56, 0.0  ;;  %v1573_v9 = vld [vmem:[%s6213_s7 + $0x128] sm:$0xff]  ;;  %v1575_v21 = vld [vmem:[%s6213_s7 + $0x138] sm:$0xff] }
 0x214   : > { %2325 = vmatprep.subr.bf16.mxu1 %v2059_v47  ;;  %v1949_v62 = vmax.f32 %v1821_v50, 0.0  ;;  %v1690_v3 = vld [vmem:[%s6217_s19 + $0xd0] sm:$0xff]  ;;  %2213 = vmatpush1.bf16.msra.mxu0 %v2056_v54  ;;  %v1951_v5 = vmax.f32 %v1823_v57, 0.0  ;;  %v1944_v11 = vmax.f32 %v1816_v63, 0.0  ;;  %v1697_v14 = vld [vmem:[%s6217_s19 + $0x108] sm:$0xff]  ;;  %v1699_v22 = vld [vmem:[%s6217_s19 + $0x118] sm:$0xff] }
 0x215   : > { %v1694_v6 = vld [vmem:[%s6217_s19 + $0xf0] sm:$0xff]  ;;  %v1818_v7 = vadd.f32 %v1690_v3, %v1562_v1  ;;  %2326 = vmatpush1.bf16.msra.mxu1 %v2058_v61  ;;  %v1948_v12 = vmax.f32 %v1820_v0, 0.0  ;;  %v1701_v15 = vld [vmem:[%s6217_s19 + $0x128] sm:$0xff]  ;;  %v1825_v19 = vadd.f32 %v1697_v14, %v1569_v8  ;;  %v1703_v23 = vld [vmem:[%s6217_s19 + $0x138] sm:$0xff]  ;;  %v1827_v26 = vadd.f32 %v1699_v22, %v1571_v16 }
 0x216   : > { %v2061_v10 = vpack.c.bf16 %v1949_v62, %v1945_v55  ;;  %v1822_v13 = vadd.f32 %v1694_v6, %v1566_v2  ;;  %v2063_v17 = vpack.c.bf16 %v1951_v5, %v1947_v4  ;;  %v1829_v20 = vadd.f32 %v1701_v15, %v1573_v9  ;;  %v1568_v28 = vld [vmem:[%s6213_s7 + $0x100] sm:$0xff]  ;;  %v1570_v35 = vld [vmem:[%s6213_s7 + $0x110] sm:$0xff]  ;;  %v1577_v43 = vld [vmem:[%s6213_s7 + $0x148] sm:$0xff] }
 0x217   : > { %v1946_v18 = vmax.f32 %v1818_v7, 0.0  ;;  %v2060_v24 = vpack.c.bf16 %v1948_v12, %v1944_v11  ;;  %v1831_v27 = vadd.f32 %v1703_v23, %v1575_v21  ;;  %v1572_v29 = vld [vmem:[%s6213_s7 + $0x120] sm:$0xff]  ;;  %v1953_v31 = vmax.f32 %v1825_v19, 0.0  ;;  %v1574_v36 = vld [vmem:[%s6213_s7 + $0x130] sm:$0xff]  ;;  %v1581_v48 = vld [vmem:[%s6213_s7 + $0x168] sm:$0xff] }
 0x218   : > { %2214 = vmatprep.subr.bf16.mxu0 %v2061_v10  ;;  %v1950_v25 = vmax.f32 %v1822_v13, 0.0  ;;  %v1696_v30 = vld [vmem:[%s6217_s19 + $0x100] sm:$0xff]  ;;  %2327 = vmatprep.subr.bf16.mxu1 %v2063_v17  ;;  %v1957_v32 = vmax.f32 %v1829_v20, 0.0  ;;  %v1955_v38 = vmax.f32 %v1827_v26, 0.0  ;;  %v1698_v41 = vld [vmem:[%s6217_s19 + $0x110] sm:$0xff]  ;;  %v1705_v49 = vld [vmem:[%s6217_s19 + $0x148] sm:$0xff] }
 0x219   : > { %v1700_v33 = vld [vmem:[%s6217_s19 + $0x120] sm:$0xff]  ;;  %v1824_v34 = vadd.f32 %v1696_v30, %v1568_v28  ;;  %2215 = vmatpush1.bf16.msra.mxu0 %v2060_v24  ;;  %v1959_v39 = vmax.f32 %v1831_v27, 0.0  ;;  %v1702_v42 = vld [vmem:[%s6217_s19 + $0x130] sm:$0xff]  ;;  %v1826_v46 = vadd.f32 %v1698_v41, %v1570_v35  ;;  %v1709_v50 = vld [vmem:[%s6217_s19 + $0x168] sm:$0xff]  ;;  %v1833_v53 = vadd.f32 %v1705_v49, %v1577_v43 }
 0x21a   : > { %v2062_v37 = vpack.c.bf16 %v1950_v25, %v1946_v18  ;;  %v1828_v40 = vadd.f32 %v1700_v33, %v1572_v29  ;;  %v2065_v44 = vpack.c.bf16 %v1957_v32, %v1953_v31  ;;  %v1830_v47 = vadd.f32 %v1702_v42, %v1574_v36  ;;  %v1579_v55 = vld [vmem:[%s6213_s7 + $0x158] sm:$0xff]  ;;  %v1576_v62 = vld [vmem:[%s6213_s7 + $0x140] sm:$0xff]  ;;  %v1578_v6 = vld [vmem:[%s6213_s7 + $0x150] sm:$0xff] }
 0x21b   : > { %v1952_v45 = vmax.f32 %v1824_v34, 0.0  ;;  %v2067_v51 = vpack.c.bf16 %v1959_v39, %v1955_v38  ;;  %v1837_v54 = vadd.f32 %v1709_v50, %v1581_v48  ;;  %v1583_v56 = vld [vmem:[%s6213_s7 + $0x178] sm:$0xff]  ;;  %v1954_v58 = vmax.f32 %v1826_v46, 0.0  ;;  %v1580_v63 = vld [vmem:[%s6213_s7 + $0x160] sm:$0xff]  ;;  %v1582_v11 = vld [vmem:[%s6213_s7 + $0x170] sm:$0xff] }
 0x21c   : > { %2328 = vmatpush1.bf16.msra.mxu1 %v2062_v37  ;;  %v1956_v52 = vmax.f32 %v1828_v40, 0.0  ;;  %v1707_v57 = vld [vmem:[%s6217_s19 + $0x158] sm:$0xff]  ;;  %2216 = vmatprep.subr.bf16.mxu0 %v2065_v44  ;;  %v1958_v59 = vmax.f32 %v1830_v47, 0.0  ;;  %v1961_v1 = vmax.f32 %v1833_v53, 0.0  ;;  %v1704_v4 = vld [vmem:[%s6217_s19 + $0x140] sm:$0xff]  ;;  %v1706_v12 = vld [vmem:[%s6217_s19 + $0x150] sm:$0xff] }
 0x21d   : > { %v1711_v60 = vld [vmem:[%s6217_s19 + $0x178] sm:$0xff]  ;;  %v1835_v61 = vadd.f32 %v1707_v57, %v1579_v55  ;;  %2329 = vmatprep.subr.bf16.mxu1 %v2067_v51  ;;  %v1965_v2 = vmax.f32 %v1837_v54, 0.0  ;;  %v1708_v5 = vld [vmem:[%s6217_s19 + $0x160] sm:$0xff]  ;;  %v1832_v9 = vadd.f32 %v1704_v4, %v1576_v62  ;;  %v1710_v13 = vld [vmem:[%s6217_s19 + $0x170] sm:$0xff]  ;;  %v1834_v16 = vadd.f32 %v1706_v12, %v1578_v6 }
 0x21e   : > { %v2064_v0 = vpack.c.bf16 %v1956_v52, %v1952_v45  ;;  %v1839_v3 = vadd.f32 %v1711_v60, %v1583_v56  ;;  %v2066_v7 = vpack.c.bf16 %v1958_v59, %v1954_v58  ;;  %v1836_v10 = vadd.f32 %v1708_v5, %v1580_v63  ;;  %v1585_v18 = vld [vmem:[%s6213_s7 + $0x188] sm:$0xff]  ;;  %v1587_v25 = vld [vmem:[%s6213_s7 + $0x198] sm:$0xff]  ;;  %v1584_v33 = vld [vmem:[%s6213_s7 + $0x180] sm:$0xff] }
 0x21f   : > { %v1963_v8 = vmax.f32 %v1835_v61, 0.0  ;;  %v2069_v14 = vpack.c.bf16 %v1965_v2, %v1961_v1  ;;  %v1838_v17 = vadd.f32 %v1710_v13, %v1582_v11  ;;  %v1589_v19 = vld [vmem:[%s6213_s7 + $0x1a8] sm:$0xff]  ;;  %v1960_v21 = vmax.f32 %v1832_v9, 0.0  ;;  %v1591_v26 = vld [vmem:[%s6213_s7 + $0x1b8] sm:$0xff]  ;;  %v1588_v38 = vld [vmem:[%s6213_s7 + $0x1a0] sm:$0xff] }
 0x220   : > { %2217 = vmatpush1.bf16.msra.mxu0 %v2064_v0  ;;  %v1967_v15 = vmax.f32 %v1839_v3, 0.0  ;;  %v1713_v20 = vld [vmem:[%s6217_s19 + $0x188] sm:$0xff]  ;;  %2330 = vmatpush1.bf16.msra.mxu1 %v2066_v7  ;;  %v1964_v22 = vmax.f32 %v1836_v10, 0.0  ;;  %v1962_v28 = vmax.f32 %v1834_v16, 0.0  ;;  %v1715_v31 = vld [vmem:[%s6217_s19 + $0x198] sm:$0xff]  ;;  %v1712_v39 = vld [vmem:[%s6217_s19 + $0x180] sm:$0xff] }
 0x221   : > { %v1717_v23 = vld [vmem:[%s6217_s19 + $0x1a8] sm:$0xff]  ;;  %v1841_v24 = vadd.f32 %v1713_v20, %v1585_v18  ;;  %2218 = vmatprep.subr.bf16.mxu0 %v2069_v14  ;;  %v1966_v29 = vmax.f32 %v1838_v17, 0.0  ;;  %v1719_v32 = vld [vmem:[%s6217_s19 + $0x1b8] sm:$0xff]  ;;  %v1843_v36 = vadd.f32 %v1715_v31, %v1587_v25  ;;  %v1716_v40 = vld [vmem:[%s6217_s19 + $0x1a0] sm:$0xff]  ;;  %v1840_v43 = vadd.f32 %v1712_v39, %v1584_v33 }
 0x222   : > { %v2071_v27 = vpack.c.bf16 %v1967_v15, %v1963_v8  ;;  %v1845_v30 = vadd.f32 %v1717_v23, %v1589_v19  ;;  %v2068_v34 = vpack.c.bf16 %v1964_v22, %v1960_v21  ;;  %v1847_v37 = vadd.f32 %v1719_v32, %v1591_v26  ;;  %v1586_v45 = vld [vmem:[%s6213_s7 + $0x190] sm:$0xff]  ;;  %v1593_v52 = vld [vmem:[%s6213_s7 + $0x1c8] sm:$0xff]  ;;  %v1595_v60 = vld [vmem:[%s6213_s7 + $0x1d8] sm:$0xff] }
 0x223   : > { %v1969_v35 = vmax.f32 %v1841_v24, 0.0  ;;  %v2070_v41 = vpack.c.bf16 %v1966_v29, %v1962_v28  ;;  %v1844_v44 = vadd.f32 %v1716_v40, %v1588_v38  ;;  %v1590_v46 = vld [vmem:[%s6213_s7 + $0x1b0] sm:$0xff]  ;;  %v1971_v48 = vmax.f32 %v1843_v36, 0.0  ;;  %v1597_v53 = vld [vmem:[%s6213_s7 + $0x1e8] sm:$0xff]  ;;  %v1599_v1 = vld [vmem:[%s6213_s7 + $0x1f8] sm:$0xff] }
 0x224   : > { %2331 = vmatprep.subr.bf16.mxu1 %v2071_v27  ;;  %v1973_v42 = vmax.f32 %v1845_v30, 0.0  ;;  %v1714_v47 = vld [vmem:[%s6217_s19 + $0x190] sm:$0xff]  ;;  %2219 = vmatpush1.bf16.msra.mxu0 %v2068_v34  ;;  %v1975_v49 = vmax.f32 %v1847_v37, 0.0  ;;  %v1968_v55 = vmax.f32 %v1840_v43, 0.0  ;;  %v1721_v58 = vld [vmem:[%s6217_s19 + $0x1c8] sm:$0xff]  ;;  %v1723_v2 = vld [vmem:[%s6217_s19 + $0x1d8] sm:$0xff] }
 0x225   : > { %v1718_v50 = vld [vmem:[%s6217_s19 + $0x1b0] sm:$0xff]  ;;  %v1842_v51 = vadd.f32 %v1714_v47, %v1586_v45  ;;  %2332 = vmatpush1.bf16.msra.mxu1 %v2070_v41  ;;  %v1972_v56 = vmax.f32 %v1844_v44, 0.0  ;;  %v1725_v59 = vld [vmem:[%s6217_s19 + $0x1e8] sm:$0xff]  ;;  %v1849_v63 = vadd.f32 %v1721_v58, %v1593_v52  ;;  %v1727_v3 = vld [vmem:[%s6217_s19 + $0x1f8] sm:$0xff]  ;;  %v1851_v6 = vadd.f32 %v1723_v2, %v1595_v60 }
 0x226   : > { %v2073_v54 = vpack.c.bf16 %v1973_v42, %v1969_v35  ;;  %v1846_v57 = vadd.f32 %v1718_v50, %v1590_v46  ;;  %v2075_v61 = vpack.c.bf16 %v1975_v49, %v1971_v48  ;;  %v1853_v0 = vadd.f32 %v1725_v59, %v1597_v53  ;;  %v1592_v8 = vld [vmem:[%s6213_s7 + $0x1c0] sm:$0xff]  ;;  %v1594_v15 = vld [vmem:[%s6213_s7 + $0x1d0] sm:$0xff]  ;;  %v1601_v23 = vld [vmem:[%s6213_s7 + $0x208] sm:$0xff] }
 0x227   : > { %v1970_v62 = vmax.f32 %v1842_v51, 0.0  ;;  %v2072_v4 = vpack.c.bf16 %v1972_v56, %v1968_v55  ;;  %v1855_v7 = vadd.f32 %v1727_v3, %v1599_v1  ;;  %v1596_v9 = vld [vmem:[%s6213_s7 + $0x1e0] sm:$0xff]  ;;  %v1977_v11 = vmax.f32 %v1849_v63, 0.0  ;;  %v1598_v16 = vld [vmem:[%s6213_s7 + $0x1f0] sm:$0xff]  ;;  %v1605_v28 = vld [vmem:[%s6213_s7 + $0x228] sm:$0xff] }
 0x228   : > { %2220 = vmatprep.subr.bf16.mxu0 %v2073_v54  ;;  %v1974_v5 = vmax.f32 %v1846_v57, 0.0  ;;  %v1720_v10 = vld [vmem:[%s6217_s19 + $0x1c0] sm:$0xff]  ;;  %2333 = vmatprep.subr.bf16.mxu1 %v2075_v61  ;;  %v1981_v12 = vmax.f32 %v1853_v0, 0.0  ;;  %v1979_v18 = vmax.f32 %v1851_v6, 0.0  ;;  %v1722_v21 = vld [vmem:[%s6217_s19 + $0x1d0] sm:$0xff]  ;;  %v1729_v29 = vld [vmem:[%s6217_s19 + $0x208] sm:$0xff] }
 0x229   : > { %v1724_v13 = vld [vmem:[%s6217_s19 + $0x1e0] sm:$0xff]  ;;  %v1848_v14 = vadd.f32 %v1720_v10, %v1592_v8  ;;  %2221 = vmatpush1.bf16.msra.mxu0 %v2072_v4  ;;  %v1983_v19 = vmax.f32 %v1855_v7, 0.0  ;;  %v1726_v22 = vld [vmem:[%s6217_s19 + $0x1f0] sm:$0xff]  ;;  %v1850_v26 = vadd.f32 %v1722_v21, %v1594_v15  ;;  %v1733_v30 = vld [vmem:[%s6217_s19 + $0x228] sm:$0xff]  ;;  %v1857_v33 = vadd.f32 %v1729_v29, %v1601_v23 }
 0x22a   : > { %v2074_v17 = vpack.c.bf16 %v1974_v5, %v1970_v62  ;;  %v1852_v20 = vadd.f32 %v1724_v13, %v1596_v9  ;;  %v2077_v24 = vpack.c.bf16 %v1981_v12, %v1977_v11  ;;  %v1854_v27 = vadd.f32 %v1726_v22, %v1598_v16  ;;  %v1603_v35 = vld [vmem:[%s6213_s7 + $0x218] sm:$0xff]  ;;  %v1600_v42 = vld [vmem:[%s6213_s7 + $0x200] sm:$0xff]  ;;  %v1602_v50 = vld [vmem:[%s6213_s7 + $0x210] sm:$0xff] }
 0x22b   : > { %v1976_v25 = vmax.f32 %v1848_v14, 0.0  ;;  %v2079_v31 = vpack.c.bf16 %v1983_v19, %v1979_v18  ;;  %v1861_v34 = vadd.f32 %v1733_v30, %v1605_v28  ;;  %v1607_v36 = vld [vmem:[%s6213_s7 + $0x238] sm:$0xff]  ;;  %v1978_v38 = vmax.f32 %v1850_v26, 0.0  ;;  %v1604_v43 = vld [vmem:[%s6213_s7 + $0x220] sm:$0xff]  ;;  %v1606_v55 = vld [vmem:[%s6213_s7 + $0x230] sm:$0xff] }
 0x22c   : > { %2334 = vmatpush1.bf16.msra.mxu1 %v2074_v17  ;;  %v1980_v32 = vmax.f32 %v1852_v20, 0.0  ;;  %v1731_v37 = vld [vmem:[%s6217_s19 + $0x218] sm:$0xff]  ;;  %2222 = vmatprep.subr.bf16.mxu0 %v2077_v24  ;;  %v1982_v39 = vmax.f32 %v1854_v27, 0.0  ;;  %v1985_v45 = vmax.f32 %v1857_v33, 0.0  ;;  %v1728_v48 = vld [vmem:[%s6217_s19 + $0x200] sm:$0xff]  ;;  %v1730_v56 = vld [vmem:[%s6217_s19 + $0x210] sm:$0xff] }
 0x22d   : > { %v1735_v40 = vld [vmem:[%s6217_s19 + $0x238] sm:$0xff]  ;;  %v1859_v41 = vadd.f32 %v1731_v37, %v1603_v35  ;;  %2335 = vmatprep.subr.bf16.mxu1 %v2079_v31  ;;  %v1989_v46 = vmax.f32 %v1861_v34, 0.0  ;;  %v1732_v49 = vld [vmem:[%s6217_s19 + $0x220] sm:$0xff]  ;;  %v1856_v53 = vadd.f32 %v1728_v48, %v1600_v42  ;;  %v1734_v57 = vld [vmem:[%s6217_s19 + $0x230] sm:$0xff]  ;;  %v1858_v60 = vadd.f32 %v1730_v56, %v1602_v50 }
 0x22e   : > { %v2076_v44 = vpack.c.bf16 %v1980_v32, %v1976_v25  ;;  %v1863_v47 = vadd.f32 %v1735_v40, %v1607_v36  ;;  %v2078_v51 = vpack.c.bf16 %v1982_v39, %v1978_v38  ;;  %v1860_v54 = vadd.f32 %v1732_v49, %v1604_v43  ;;  %v1609_v62 = vld [vmem:[%s6213_s7 + $0x248] sm:$0xff]  ;;  %v1611_v5 = vld [vmem:[%s6213_s7 + $0x258] sm:$0xff]  ;;  %v1608_v13 = vld [vmem:[%s6213_s7 + $0x240] sm:$0xff] }
 0x22f   : > { %v1987_v52 = vmax.f32 %v1859_v41, 0.0  ;;  %v2081_v58 = vpack.c.bf16 %v1989_v46, %v1985_v45  ;;  %v1862_v61 = vadd.f32 %v1734_v57, %v1606_v55  ;;  %v1613_v63 = vld [vmem:[%s6213_s7 + $0x268] sm:$0xff]  ;;  %v1984_v1 = vmax.f32 %v1856_v53, 0.0  ;;  %v1615_v6 = vld [vmem:[%s6213_s7 + $0x278] sm:$0xff]  ;;  %v1612_v18 = vld [vmem:[%s6213_s7 + $0x260] sm:$0xff] }
 0x230   : > { %2223 = vmatpush1.bf16.msra.mxu0 %v2076_v44  ;;  %v1991_v59 = vmax.f32 %v1863_v47, 0.0  ;;  %v1737_v0 = vld [vmem:[%s6217_s19 + $0x248] sm:$0xff]  ;;  %2336 = vmatpush1.bf16.msra.mxu1 %v2078_v51  ;;  %v1988_v2 = vmax.f32 %v1860_v54, 0.0  ;;  %v1986_v8 = vmax.f32 %v1858_v60, 0.0  ;;  %v1739_v11 = vld [vmem:[%s6217_s19 + $0x258] sm:$0xff]  ;;  %v1736_v19 = vld [vmem:[%s6217_s19 + $0x240] sm:$0xff] }
 0x231   : > { %v1741_v3 = vld [vmem:[%s6217_s19 + $0x268] sm:$0xff]  ;;  %v1865_v4 = vadd.f32 %v1737_v0, %v1609_v62  ;;  %2224 = vmatprep.subr.bf16.mxu0 %v2081_v58  ;;  %v1990_v9 = vmax.f32 %v1862_v61, 0.0  ;;  %v1743_v12 = vld [vmem:[%s6217_s19 + $0x278] sm:$0xff]  ;;  %v1867_v16 = vadd.f32 %v1739_v11, %v1611_v5  ;;  %v1740_v20 = vld [vmem:[%s6217_s19 + $0x260] sm:$0xff]  ;;  %v1864_v23 = vadd.f32 %v1736_v19, %v1608_v13 }
 0x232   : > { %v2083_v7 = vpack.c.bf16 %v1991_v59, %v1987_v52  ;;  %v1869_v10 = vadd.f32 %v1741_v3, %v1613_v63  ;;  %v2080_v14 = vpack.c.bf16 %v1988_v2, %v1984_v1  ;;  %v1871_v17 = vadd.f32 %v1743_v12, %v1615_v6  ;;  %v1610_v25 = vld [vmem:[%s6213_s7 + $0x250] sm:$0xff]  ;;  %v1617_v32 = vld [vmem:[%s6213_s7 + $0x288] sm:$0xff]  ;;  %v1619_v40 = vld [vmem:[%s6213_s7 + $0x298] sm:$0xff] }
 0x233   : > { %v1993_v15 = vmax.f32 %v1865_v4, 0.0  ;;  %v2082_v21 = vpack.c.bf16 %v1990_v9, %v1986_v8  ;;  %v1868_v24 = vadd.f32 %v1740_v20, %v1612_v18  ;;  %v1614_v26 = vld [vmem:[%s6213_s7 + $0x270] sm:$0xff]  ;;  %v1995_v28 = vmax.f32 %v1867_v16, 0.0  ;;  %v1621_v33 = vld [vmem:[%s6213_s7 + $0x2a8] sm:$0xff]  ;;  %v1623_v45 = vld [vmem:[%s6213_s7 + $0x2b8] sm:$0xff] }
 0x234   : > { %2337 = vmatprep.subr.bf16.mxu1 %v2083_v7  ;;  %v1997_v22 = vmax.f32 %v1869_v10, 0.0  ;;  %v1738_v27 = vld [vmem:[%s6217_s19 + $0x250] sm:$0xff]  ;;  %2225 = vmatpush1.bf16.msra.mxu0 %v2080_v14  ;;  %v1999_v29 = vmax.f32 %v1871_v17, 0.0  ;;  %v1992_v35 = vmax.f32 %v1864_v23, 0.0  ;;  %v1745_v38 = vld [vmem:[%s6217_s19 + $0x288] sm:$0xff]  ;;  %v1747_v46 = vld [vmem:[%s6217_s19 + $0x298] sm:$0xff] }
 0x235   : > { %v1742_v30 = vld [vmem:[%s6217_s19 + $0x270] sm:$0xff]  ;;  %v1866_v31 = vadd.f32 %v1738_v27, %v1610_v25  ;;  %2338 = vmatpush1.bf16.msra.mxu1 %v2082_v21  ;;  %v1996_v36 = vmax.f32 %v1868_v24, 0.0  ;;  %v1749_v39 = vld [vmem:[%s6217_s19 + $0x2a8] sm:$0xff]  ;;  %v1873_v43 = vadd.f32 %v1745_v38, %v1617_v32  ;;  %v1751_v47 = vld [vmem:[%s6217_s19 + $0x2b8] sm:$0xff]  ;;  %v1875_v50 = vadd.f32 %v1747_v46, %v1619_v40 }
 0x236   : > { %v2085_v34 = vpack.c.bf16 %v1997_v22, %v1993_v15  ;;  %v1870_v37 = vadd.f32 %v1742_v30, %v1614_v26  ;;  %v2087_v41 = vpack.c.bf16 %v1999_v29, %v1995_v28  ;;  %v1877_v44 = vadd.f32 %v1749_v39, %v1621_v33  ;;  %v1616_v52 = vld [vmem:[%s6213_s7 + $0x280] sm:$0xff]  ;;  %v1618_v59 = vld [vmem:[%s6213_s7 + $0x290] sm:$0xff]  ;;  %v1625_v3 = vld [vmem:[%s6213_s7 + $0x2c8] sm:$0xff] }
 0x237   : > { %v1994_v42 = vmax.f32 %v1866_v31, 0.0  ;;  %v2084_v48 = vpack.c.bf16 %v1996_v36, %v1992_v35  ;;  %v1879_v51 = vadd.f32 %v1751_v47, %v1623_v45  ;;  %v1620_v53 = vld [vmem:[%s6213_s7 + $0x2a0] sm:$0xff]  ;;  %v2001_v55 = vmax.f32 %v1873_v43, 0.0  ;;  %v1622_v60 = vld [vmem:[%s6213_s7 + $0x2b0] sm:$0xff]  ;;  %v1629_v8 = vld [vmem:[%s6213_s7 + $0x2e8] sm:$0xff] }
 0x238   : > { %2226 = vmatprep.subr.bf16.mxu0 %v2085_v34  ;;  %v1998_v49 = vmax.f32 %v1870_v37, 0.0  ;;  %v1744_v54 = vld [vmem:[%s6217_s19 + $0x280] sm:$0xff]  ;;  %2339 = vmatprep.subr.bf16.mxu1 %v2087_v41  ;;  %v2005_v56 = vmax.f32 %v1877_v44, 0.0  ;;  %v2003_v62 = vmax.f32 %v1875_v50, 0.0  ;;  %v1746_v1 = vld [vmem:[%s6217_s19 + $0x290] sm:$0xff]  ;;  %v1753_v9 = vld [vmem:[%s6217_s19 + $0x2c8] sm:$0xff] }
 0x239   : > { %v1748_v57 = vld [vmem:[%s6217_s19 + $0x2a0] sm:$0xff]  ;;  %v1872_v58 = vadd.f32 %v1744_v54, %v1616_v52  ;;  %2227 = vmatpush1.bf16.msra.mxu0 %v2084_v48  ;;  %v2007_v63 = vmax.f32 %v1879_v51, 0.0  ;;  %v1750_v2 = vld [vmem:[%s6217_s19 + $0x2b0] sm:$0xff]  ;;  %v1874_v6 = vadd.f32 %v1746_v1, %v1618_v59  ;;  %v1757_v10 = vld [vmem:[%s6217_s19 + $0x2e8] sm:$0xff]  ;;  %v1881_v13 = vadd.f32 %v1753_v9, %v1625_v3 }
 0x23a   : > { %v2086_v61 = vpack.c.bf16 %v1998_v49, %v1994_v42  ;;  %v1876_v0 = vadd.f32 %v1748_v57, %v1620_v53  ;;  %v2089_v4 = vpack.c.bf16 %v2005_v56, %v2001_v55  ;;  %v1878_v7 = vadd.f32 %v1750_v2, %v1622_v60  ;;  %v1627_v15 = vld [vmem:[%s6213_s7 + $0x2d8] sm:$0xff]  ;;  %v1624_v22 = vld [vmem:[%s6213_s7 + $0x2c0] sm:$0xff]  ;;  %v1626_v30 = vld [vmem:[%s6213_s7 + $0x2d0] sm:$0xff] }
 0x23b   : > { %v2000_v5 = vmax.f32 %v1872_v58, 0.0  ;;  %v2091_v11 = vpack.c.bf16 %v2007_v63, %v2003_v62  ;;  %v1885_v14 = vadd.f32 %v1757_v10, %v1629_v8  ;;  %v1631_v16 = vld [vmem:[%s6213_s7 + $0x2f8] sm:$0xff]  ;;  %v2002_v18 = vmax.f32 %v1874_v6, 0.0  ;;  %v1628_v23 = vld [vmem:[%s6213_s7 + $0x2e0] sm:$0xff]  ;;  %v1630_v35 = vld [vmem:[%s6213_s7 + $0x2f0] sm:$0xff] }
 0x23c   : > { %2340 = vmatpush1.bf16.msra.mxu1 %v2086_v61  ;;  %v2004_v12 = vmax.f32 %v1876_v0, 0.0  ;;  %v1755_v17 = vld [vmem:[%s6217_s19 + $0x2d8] sm:$0xff]  ;;  %2228 = vmatprep.subr.bf16.mxu0 %v2089_v4  ;;  %v2006_v19 = vmax.f32 %v1878_v7, 0.0  ;;  %v2009_v25 = vmax.f32 %v1881_v13, 0.0  ;;  %v1752_v28 = vld [vmem:[%s6217_s19 + $0x2c0] sm:$0xff]  ;;  %v1754_v36 = vld [vmem:[%s6217_s19 + $0x2d0] sm:$0xff] }
 0x23d   : > { %v1759_v20 = vld [vmem:[%s6217_s19 + $0x2f8] sm:$0xff]  ;;  %v1883_v21 = vadd.f32 %v1755_v17, %v1627_v15  ;;  %2341 = vmatprep.subr.bf16.mxu1 %v2091_v11  ;;  %v2013_v26 = vmax.f32 %v1885_v14, 0.0  ;;  %v1756_v29 = vld [vmem:[%s6217_s19 + $0x2e0] sm:$0xff]  ;;  %v1880_v33 = vadd.f32 %v1752_v28, %v1624_v22  ;;  %v1758_v37 = vld [vmem:[%s6217_s19 + $0x2f0] sm:$0xff]  ;;  %v1882_v40 = vadd.f32 %v1754_v36, %v1626_v30 }
 0x23e   : > { %v2088_v24 = vpack.c.bf16 %v2004_v12, %v2000_v5  ;;  %v1887_v27 = vadd.f32 %v1759_v20, %v1631_v16  ;;  %v2090_v31 = vpack.c.bf16 %v2006_v19, %v2002_v18  ;;  %v1884_v34 = vadd.f32 %v1756_v29, %v1628_v23  ;;  %v1633_v42 = vld [vmem:[%s6213_s7 + $0x308] sm:$0xff]  ;;  %v1635_v49 = vld [vmem:[%s6213_s7 + $0x318] sm:$0xff]  ;;  %v1632_v57 = vld [vmem:[%s6213_s7 + $0x300] sm:$0xff] }
 0x23f   : > { %v2011_v32 = vmax.f32 %v1883_v21, 0.0  ;;  %v2093_v38 = vpack.c.bf16 %v2013_v26, %v2009_v25  ;;  %v1886_v41 = vadd.f32 %v1758_v37, %v1630_v35  ;;  %v1637_v43 = vld [vmem:[%s6213_s7 + $0x328] sm:$0xff]  ;;  %v2008_v45 = vmax.f32 %v1880_v33, 0.0  ;;  %v1639_v50 = vld [vmem:[%s6213_s7 + $0x338] sm:$0xff]  ;;  %v1636_v62 = vld [vmem:[%s6213_s7 + $0x320] sm:$0xff] }
 0x240   : > { %2229 = vmatpush1.bf16.msra.mxu0 %v2088_v24  ;;  %v2015_v39 = vmax.f32 %v1887_v27, 0.0  ;;  %v1761_v44 = vld [vmem:[%s6217_s19 + $0x308] sm:$0xff]  ;;  %2342 = vmatpush1.bf16.msra.mxu1 %v2090_v31  ;;  %v2012_v46 = vmax.f32 %v1884_v34, 0.0  ;;  %v2010_v52 = vmax.f32 %v1882_v40, 0.0  ;;  %v1763_v55 = vld [vmem:[%s6217_s19 + $0x318] sm:$0xff]  ;;  %v1760_v63 = vld [vmem:[%s6217_s19 + $0x300] sm:$0xff] }
 0x241   : > { %v1765_v47 = vld [vmem:[%s6217_s19 + $0x328] sm:$0xff]  ;;  %v1889_v48 = vadd.f32 %v1761_v44, %v1633_v42  ;;  %2230 = vmatprep.subr.bf16.mxu0 %v2093_v38  ;;  %v2014_v53 = vmax.f32 %v1886_v41, 0.0  ;;  %v1767_v56 = vld [vmem:[%s6217_s19 + $0x338] sm:$0xff]  ;;  %v1891_v60 = vadd.f32 %v1763_v55, %v1635_v49  ;;  %v1764_v0 = vld [vmem:[%s6217_s19 + $0x320] sm:$0xff]  ;;  %v1888_v3 = vadd.f32 %v1760_v63, %v1632_v57 }
 0x242   : > { %v2095_v51 = vpack.c.bf16 %v2015_v39, %v2011_v32  ;;  %v1893_v54 = vadd.f32 %v1765_v47, %v1637_v43  ;;  %v2092_v58 = vpack.c.bf16 %v2012_v46, %v2008_v45  ;;  %v1895_v61 = vadd.f32 %v1767_v56, %v1639_v50  ;;  %v1634_v5 = vld [vmem:[%s6213_s7 + $0x310] sm:$0xff]  ;;  %v1641_v12 = vld [vmem:[%s6213_s7 + $0x348] sm:$0xff]  ;;  %v1643_v20 = vld [vmem:[%s6213_s7 + $0x358] sm:$0xff] }
 0x243   : > { %v2017_v59 = vmax.f32 %v1889_v48, 0.0  ;;  %v2094_v1 = vpack.c.bf16 %v2014_v53, %v2010_v52  ;;  %v1892_v4 = vadd.f32 %v1764_v0, %v1636_v62  ;;  %v1638_v6 = vld [vmem:[%s6213_s7 + $0x330] sm:$0xff]  ;;  %v2019_v8 = vmax.f32 %v1891_v60, 0.0  ;;  %v1645_v13 = vld [vmem:[%s6213_s7 + $0x368] sm:$0xff]  ;;  %v1647_v25 = vld [vmem:[%s6213_s7 + $0x378] sm:$0xff] }
 0x244   : > { %2343 = vmatprep.subr.bf16.mxu1 %v2095_v51  ;;  %v2021_v2 = vmax.f32 %v1893_v54, 0.0  ;;  %v1762_v7 = vld [vmem:[%s6217_s19 + $0x310] sm:$0xff]  ;;  %2231 = vmatpush1.bf16.msra.mxu0 %v2092_v58  ;;  %v2023_v9 = vmax.f32 %v1895_v61, 0.0  ;;  %v2016_v15 = vmax.f32 %v1888_v3, 0.0  ;;  %v1769_v18 = vld [vmem:[%s6217_s19 + $0x348] sm:$0xff]  ;;  %v1771_v26 = vld [vmem:[%s6217_s19 + $0x358] sm:$0xff] }
 0x245   : > { %v1766_v10 = vld [vmem:[%s6217_s19 + $0x330] sm:$0xff]  ;;  %v1890_v11 = vadd.f32 %v1762_v7, %v1634_v5  ;;  %2344 = vmatpush1.bf16.msra.mxu1 %v2094_v1  ;;  %v2020_v16 = vmax.f32 %v1892_v4, 0.0  ;;  %v1773_v19 = vld [vmem:[%s6217_s19 + $0x368] sm:$0xff]  ;;  %v1897_v23 = vadd.f32 %v1769_v18, %v1641_v12  ;;  %v1775_v27 = vld [vmem:[%s6217_s19 + $0x378] sm:$0xff]  ;;  %v1899_v30 = vadd.f32 %v1771_v26, %v1643_v20 }
 0x246   : > { %v2097_v14 = vpack.c.bf16 %v2021_v2, %v2017_v59  ;;  %v1894_v17 = vadd.f32 %v1766_v10, %v1638_v6  ;;  %v2099_v21 = vpack.c.bf16 %v2023_v9, %v2019_v8  ;;  %v1901_v24 = vadd.f32 %v1773_v19, %v1645_v13  ;;  %v1640_v32 = vld [vmem:[%s6213_s7 + $0x340] sm:$0xff]  ;;  %v1642_v39 = vld [vmem:[%s6213_s7 + $0x350] sm:$0xff]  ;;  %v1649_v47 = vld [vmem:[%s6213_s7 + $0x388] sm:$0xff] }
 0x247   : > { %v2018_v22 = vmax.f32 %v1890_v11, 0.0  ;;  %v2096_v28 = vpack.c.bf16 %v2020_v16, %v2016_v15  ;;  %v1903_v31 = vadd.f32 %v1775_v27, %v1647_v25  ;;  %v1644_v33 = vld [vmem:[%s6213_s7 + $0x360] sm:$0xff]  ;;  %v2025_v35 = vmax.f32 %v1897_v23, 0.0  ;;  %v1646_v40 = vld [vmem:[%s6213_s7 + $0x370] sm:$0xff]  ;;  %v1653_v52 = vld [vmem:[%s6213_s7 + $0x3a8] sm:$0xff] }
 0x248   : > { %2232 = vmatprep.subr.bf16.mxu0 %v2097_v14  ;;  %v2022_v29 = vmax.f32 %v1894_v17, 0.0  ;;  %v1768_v34 = vld [vmem:[%s6217_s19 + $0x340] sm:$0xff]  ;;  %2345 = vmatprep.subr.bf16.mxu1 %v2099_v21  ;;  %v2029_v36 = vmax.f32 %v1901_v24, 0.0  ;;  %v2027_v42 = vmax.f32 %v1899_v30, 0.0  ;;  %v1770_v45 = vld [vmem:[%s6217_s19 + $0x350] sm:$0xff]  ;;  %v1777_v53 = vld [vmem:[%s6217_s19 + $0x388] sm:$0xff] }
 0x249   : > { %v1772_v37 = vld [vmem:[%s6217_s19 + $0x360] sm:$0xff]  ;;  %v1896_v38 = vadd.f32 %v1768_v34, %v1640_v32  ;;  %2233 = vmatpush1.bf16.msra.mxu0 %v2096_v28  ;;  %v2031_v43 = vmax.f32 %v1903_v31, 0.0  ;;  %v1774_v46 = vld [vmem:[%s6217_s19 + $0x370] sm:$0xff]  ;;  %v1898_v50 = vadd.f32 %v1770_v45, %v1642_v39  ;;  %v1781_v54 = vld [vmem:[%s6217_s19 + $0x3a8] sm:$0xff]  ;;  %v1905_v57 = vadd.f32 %v1777_v53, %v1649_v47 }
 0x24a   : > { %v2098_v41 = vpack.c.bf16 %v2022_v29, %v2018_v22  ;;  %v1900_v44 = vadd.f32 %v1772_v37, %v1644_v33  ;;  %v2101_v48 = vpack.c.bf16 %v2029_v36, %v2025_v35  ;;  %v1902_v51 = vadd.f32 %v1774_v46, %v1646_v40  ;;  %v1651_v59 = vld [vmem:[%s6213_s7 + $0x398] sm:$0xff]  ;;  %v1648_v2 = vld [vmem:[%s6213_s7 + $0x380] sm:$0xff]  ;;  %v1650_v10 = vld [vmem:[%s6213_s7 + $0x390] sm:$0xff] }
 0x24b   : > { %v2024_v49 = vmax.f32 %v1896_v38, 0.0  ;;  %v2103_v55 = vpack.c.bf16 %v2031_v43, %v2027_v42  ;;  %v1909_v58 = vadd.f32 %v1781_v54, %v1653_v52  ;;  %v1655_v60 = vld [vmem:[%s6213_s7 + $0x3b8] sm:$0xff]  ;;  %v2026_v62 = vmax.f32 %v1898_v50, 0.0  ;;  %v1652_v3 = vld [vmem:[%s6213_s7 + $0x3a0] sm:$0xff]  ;;  %v1654_v15 = vld [vmem:[%s6213_s7 + $0x3b0] sm:$0xff] }
 0x24c   : > { %2346 = vmatpush1.bf16.msra.mxu1 %v2098_v41  ;;  %v2028_v56 = vmax.f32 %v1900_v44, 0.0  ;;  %v1779_v61 = vld [vmem:[%s6217_s19 + $0x398] sm:$0xff]  ;;  %2234 = vmatprep.subr.bf16.mxu0 %v2101_v48  ;;  %v2030_v63 = vmax.f32 %v1902_v51, 0.0  ;;  %v2033_v5 = vmax.f32 %v1905_v57, 0.0  ;;  %v1776_v8 = vld [vmem:[%s6217_s19 + $0x380] sm:$0xff]  ;;  %v1778_v16 = vld [vmem:[%s6217_s19 + $0x390] sm:$0xff] }
 0x24d   : > { %v1783_v0 = vld [vmem:[%s6217_s19 + $0x3b8] sm:$0xff]  ;;  %v1907_v1 = vadd.f32 %v1779_v61, %v1651_v59  ;;  %2347 = vmatprep.subr.bf16.mxu1 %v2103_v55  ;;  %v2037_v6 = vmax.f32 %v1909_v58, 0.0  ;;  %v1780_v9 = vld [vmem:[%s6217_s19 + $0x3a0] sm:$0xff]  ;;  %v1904_v13 = vadd.f32 %v1776_v8, %v1648_v2  ;;  %v1782_v17 = vld [vmem:[%s6217_s19 + $0x3b0] sm:$0xff]  ;;  %v1906_v20 = vadd.f32 %v1778_v16, %v1650_v10 }
 0x24e   : > { %v2100_v4 = vpack.c.bf16 %v2028_v56, %v2024_v49  ;;  %v1911_v7 = vadd.f32 %v1783_v0, %v1655_v60  ;;  %v2102_v11 = vpack.c.bf16 %v2030_v63, %v2026_v62  ;;  %v1908_v14 = vadd.f32 %v1780_v9, %v1652_v3  ;;  %v1657_v22 = vld [vmem:[%s6213_s7 + $0x3c8] sm:$0xff]  ;;  %v1659_v29 = vld [vmem:[%s6213_s7 + $0x3d8] sm:$0xff]  ;;  %v1656_v37 = vld [vmem:[%s6213_s7 + $0x3c0] sm:$0xff] }
 0x24f   : > { %v2035_v12 = vmax.f32 %v1907_v1, 0.0  ;;  %v2105_v18 = vpack.c.bf16 %v2037_v6, %v2033_v5  ;;  %v1910_v21 = vadd.f32 %v1782_v17, %v1654_v15  ;;  %v1661_v23 = vld [vmem:[%s6213_s7 + $0x3e8] sm:$0xff]  ;;  %v2032_v25 = vmax.f32 %v1904_v13, 0.0  ;;  %v1663_v30 = vld [vmem:[%s6213_s7 + $0x3f8] sm:$0xff]  ;;  %v1660_v42 = vld [vmem:[%s6213_s7 + $0x3e0] sm:$0xff] }
 0x250   : > { %2235 = vmatpush1.bf16.msra.mxu0 %v2100_v4  ;;  %v2039_v19 = vmax.f32 %v1911_v7, 0.0  ;;  %v1785_v24 = vld [vmem:[%s6217_s19 + $0x3c8] sm:$0xff]  ;;  %2348 = vmatpush1.bf16.msra.mxu1 %v2102_v11  ;;  %v2036_v26 = vmax.f32 %v1908_v14, 0.0  ;;  %v2034_v32 = vmax.f32 %v1906_v20, 0.0  ;;  %v1787_v35 = vld [vmem:[%s6217_s19 + $0x3d8] sm:$0xff]  ;;  %v1784_v43 = vld [vmem:[%s6217_s19 + $0x3c0] sm:$0xff] }
 0x251   : > { %v1789_v27 = vld [vmem:[%s6217_s19 + $0x3e8] sm:$0xff]  ;;  %v1913_v28 = vadd.f32 %v1785_v24, %v1657_v22  ;;  %2236 = vmatprep.subr.bf16.mxu0 %v2105_v18  ;;  %v2038_v33 = vmax.f32 %v1910_v21, 0.0  ;;  %v1791_v36 = vld [vmem:[%s6217_s19 + $0x3f8] sm:$0xff]  ;;  %v1915_v40 = vadd.f32 %v1787_v35, %v1659_v29  ;;  %v1788_v44 = vld [vmem:[%s6217_s19 + $0x3e0] sm:$0xff]  ;;  %v1912_v47 = vadd.f32 %v1784_v43, %v1656_v37 }
 0x252   : > { %v2107_v31 = vpack.c.bf16 %v2039_v19, %v2035_v12  ;;  %v1917_v34 = vadd.f32 %v1789_v27, %v1661_v23  ;;  %v2104_v38 = vpack.c.bf16 %v2036_v26, %v2032_v25  ;;  %v1919_v41 = vadd.f32 %v1791_v36, %v1663_v30  ;;  %v1658_v49 = vld [vmem:[%s6213_s7 + $0x3d0] sm:$0xff]  ;;  %v3926_v0 = vld [vmem:[%s7273_s2] ss:$8 sps:$4 sm:$0xff]   ;;  %v3932_v4 = vld [vmem:[%s7273_s2 + $0x24] ss:$8 sps:$4 sm:$0xff]  }
 0x253   : > { %v2041_v39 = vmax.f32 %v1913_v28, 0.0  ;;  %v2106_v45 = vpack.c.bf16 %v2038_v33, %v2034_v32  ;;  %v1916_v48 = vadd.f32 %v1788_v44, %v1660_v42  ;;  %v1662_v50 = vld [vmem:[%s6213_s7 + $0x3f0] sm:$0xff]  ;;  %v2043_v52 = vmax.f32 %v1915_v40, 0.0  ;;  %v3934_v5 = vld [vmem:[%s7273_s2 + $0x20] ss:$8 sps:$4 sm:$0xff]  }
 0x254   : > { %2349 = vmatprep.subr.bf16.mxu1 %v2107_v31  ;;  %v2045_v46 = vmax.f32 %v1917_v34, 0.0  ;;  %v1786_v51 = vld [vmem:[%s6217_s19 + $0x3d0] sm:$0xff]  ;;  %2237 = vmatpush1.bf16.msra.mxu0 %v2104_v38  ;;  %v2047_v53 = vmax.f32 %v1919_v41, 0.0  ;;  %v2040_v57 = vmax.f32 %v1912_v47, 0.0  ;;  %v3938_v8 = vld [vmem:[%s7273_s2 + $0x44] ss:$8 sps:$4 sm:$0xff]  }
 0x255   : > { %v1790_v54 = vld [vmem:[%s6217_s19 + $0x3f0] sm:$0xff]  ;;  %v1914_v55 = vadd.f32 %v1786_v51, %v1658_v49  ;;  %2350 = vmatpush1.bf16.msra.mxu1 %v2106_v45  ;;  %v2044_v58 = vmax.f32 %v1916_v48, 0.0  ;;  %v3940_v9 = vld [vmem:[%s7273_s2 + $0x40] ss:$8 sps:$4 sm:$0xff]   ;;  %v3944_v12 = vld [vmem:[%s7273_s2 + $0x64] ss:$8 sps:$4 sm:$0xff]  }
 0x256   : > { %v2109_v56 = vpack.c.bf16 %v2045_v46, %v2041_v39  ;;  %v1918_v59 = vadd.f32 %v1790_v54, %v1662_v50  ;;  %v2111_v60 = vpack.c.bf16 %v2047_v53, %v2043_v52  ;;  %v3929_v2 = vld [vmem:[%s7273_s2 + $0x14] ss:$8 sps:$4 sm:$0xff]   ;;  %v3931_v3 = vld [vmem:[%s7273_s2 + $0x10] ss:$8 sps:$4 sm:$0xff]   ;;  %v3946_v13 = vld [vmem:[%s7273_s2 + $0x60] ss:$8 sps:$4 sm:$0xff]  }
 0x257   : > { %v2042_v61 = vmax.f32 %v1914_v55, 0.0  ;;  %v2108_v62 = vpack.c.bf16 %v2044_v58, %v2040_v57  ;;  %v3935_v6 = vld [vmem:[%s7273_s2 + $0x34] ss:$8 sps:$4 sm:$0xff]   ;;  %v3937_v7 = vld [vmem:[%s7273_s2 + $0x30] ss:$8 sps:$4 sm:$0xff]  }
 0x258   : > { %2238 = vmatprep.subr.bf16.mxu0 %v2109_v56  ;;  %v2046_v63 = vmax.f32 %v1918_v59, 0.0  ;;  %2351 = vmatprep.subr.bf16.mxu1 %v2111_v60  ;;  %v3941_v10 = vld [vmem:[%s7273_s2 + $0x54] ss:$8 sps:$4 sm:$0xff]   ;;  %v3943_v11 = vld [vmem:[%s7273_s2 + $0x50] ss:$8 sps:$4 sm:$0xff]  }
 0x259   : > { %2239 = vmatpush1.bf16.msra.mxu0 %v2108_v62  ;;  %v3947_v14 = vld [vmem:[%s7273_s2 + $0x74] ss:$8 sps:$4 sm:$0xff]   ;;  %v3949_v15 = vld [vmem:[%s7273_s2 + $0x70] ss:$8 sps:$4 sm:$0xff]  }
 0x25a   : > { %v2110_v1 = vpack.c.bf16 %v2046_v63, %v2042_v61 }
 0x25c   : > { %2352 = vmatpush1.bf16.msra.mxu1 %v2110_v1  ;;  %2241 = vmatmul.mubr.bf16.vlgmr.msra.gmra.mrb[0].mxu0 %v3926_v0 }
 0x25d   : > { %2250 = vmatprep.mubr.bf16.mxu0 %v3929_v2 }
 0x25f   : > { %2354 = vmatmul.mubr.bf16.vlgmr.msra.gmra.mrb[0].mxu1 %v3926_v0 }
 0x260   : > { %2363 = vmatprep.mubr.bf16.mxu1 %v3929_v2 }
 0x264   : > { %2251 = vmatmul.mubr.bf16.gmra.mrb[4].mxu0 %v3931_v3 }
 0x265   : > { %2260 = vmatprep.mubr.bf16.mxu0 %v3932_v4 }
 0x267   : > { %2364 = vmatmul.mubr.bf16.gmra.mrb[4].mxu1 %v3931_v3 }
 0x268   : > { %2373 = vmatprep.mubr.bf16.mxu1 %v3932_v4 }
 0x26c   : > { %2261 = vmatmul.mubr.bf16.gmra.mrb[8].mxu0 %v3934_v5 }
 0x26d   : > { %2270 = vmatprep.mubr.bf16.mxu0 %v3935_v6 }
 0x26f   : > { %2374 = vmatmul.mubr.bf16.gmra.mrb[8].mxu1 %v3934_v5 }
 0x270   : > { %2383 = vmatprep.mubr.bf16.mxu1 %v3935_v6 }
 0x274   : > { %2271 = vmatmul.mubr.bf16.gmra.mrb[12].mxu0 %v3937_v7 }
 0x275   : > { %2280 = vmatprep.mubr.bf16.mxu0 %v3938_v8 }
 0x277   : > { %2384 = vmatmul.mubr.bf16.gmra.mrb[12].mxu1 %v3937_v7 }
 0x278   : > { %2393 = vmatprep.mubr.bf16.mxu1 %v3938_v8 }
 0x27c   : > { %2281 = vmatmul.mubr.bf16.gmra.mrb[16].mxu0 %v3940_v9 }
 0x27d   : > { %2290 = vmatprep.mubr.bf16.mxu0 %v3941_v10 }
 0x27f   : > { %2394 = vmatmul.mubr.bf16.gmra.mrb[16].mxu1 %v3940_v9 }
 0x280   : > { %2403 = vmatprep.mubr.bf16.mxu1 %v3941_v10 }
 0x284   : > { %2291 = vmatmul.mubr.bf16.gmra.mrb[20].mxu0 %v3943_v11 }
 0x285   : > { %2300 = vmatprep.mubr.bf16.mxu0 %v3944_v12 }
 0x287   : > { %2404 = vmatmul.mubr.bf16.gmra.mrb[20].mxu1 %v3943_v11 }
 0x288   : > { %2413 = vmatprep.mubr.bf16.mxu1 %v3944_v12 }
 0x28c   : > { %2301 = vmatmul.mubr.bf16.gmra.mrb[24].mxu0 %v3946_v13 }
 0x28d   : > { %2310 = vmatprep.mubr.bf16.mxu0 %v3947_v14 }
 0x28f   : > { %2414 = vmatmul.mubr.bf16.gmra.mrb[24].mxu1 %v3946_v13 }
 0x290   : > { %2423 = vmatprep.mubr.bf16.mxu1 %v3947_v14 }
 0x294   : > { %2311 = vmatmul.mubr.bf16.gmra.mrb[28].mxu0 %v3949_v15 }
 0x297   : > { %2424 = vmatmul.mubr.bf16.gmra.mrb[28].mxu1 %v3949_v15 }
 0x32f   : > { %v2242_v16 = vpop.f32.mrb[0].mxu0 }
 0x330   : > { %2434 = vst [vmem:[%s6520_s11] sm:$0xff] %v2242_v16  ;;  %v2244_v17 = vpop.f32.mrb[1].mxu0 }
 0x331   : > { %2435 = vst [vmem:[%s6520_s11 + $0x8] sm:$0xff] %v2244_v17  ;;  %v2246_v19 = vpop.f32.mrb[2].mxu0 }
 0x332   : > { %v2355_v18 = vpop.f32.mrb[0].mxu1  ;;  %2438 = vst [vmem:[%s6520_s11 + $0x20] sm:$0xff] %v2246_v19  ;;  %v2248_v21 = vpop.f32.mrb[3].mxu0 }
 0x333   : > { %2436 = vst [vmem:[%s6520_s11 + $0x10] sm:$0xff] %v2355_v18  ;;  %v2357_v20 = vpop.f32.mrb[1].mxu1  ;;  %2439 = vst [vmem:[%s6520_s11 + $0x28] sm:$0xff] %v2248_v21 }
 0x334   : > { %2437 = vst [vmem:[%s6520_s11 + $0x18] sm:$0xff] %v2357_v20  ;;  %v2359_v22 = vpop.f32.mrb[2].mxu1 }
 0x335   : > { %2440 = vst [vmem:[%s6520_s11 + $0x30] sm:$0xff] %v2359_v22  ;;  %v2361_v23 = vpop.f32.mrb[3].mxu1 }
 0x336   : > { %2441 = vst [vmem:[%s6520_s11 + $0x38] sm:$0xff] %v2361_v23 }
 0x337   : > { %v2252_v24 = vpop.f32.mrb[4].mxu0 }
 0x338   : > { %2442 = vst [vmem:[%s6520_s11 + $0x40] sm:$0xff] %v2252_v24  ;;  %v2254_v25 = vpop.f32.mrb[5].mxu0 }
 0x339   : > { %2443 = vst [vmem:[%s6520_s11 + $0x48] sm:$0xff] %v2254_v25  ;;  %v2256_v27 = vpop.f32.mrb[6].mxu0 }
 0x33a   : > { %v2365_v26 = vpop.f32.mrb[4].mxu1  ;;  %2446 = vst [vmem:[%s6520_s11 + $0x60] sm:$0xff] %v2256_v27  ;;  %v2258_v29 = vpop.f32.mrb[7].mxu0 }
 0x33b   : > { %2444 = vst [vmem:[%s6520_s11 + $0x50] sm:$0xff] %v2365_v26  ;;  %v2367_v28 = vpop.f32.mrb[5].mxu1  ;;  %2447 = vst [vmem:[%s6520_s11 + $0x68] sm:$0xff] %v2258_v29 }
 0x33c   : > { %2445 = vst [vmem:[%s6520_s11 + $0x58] sm:$0xff] %v2367_v28  ;;  %v2369_v30 = vpop.f32.mrb[6].mxu1 }
 0x33d   : > { %2448 = vst [vmem:[%s6520_s11 + $0x70] sm:$0xff] %v2369_v30  ;;  %v2371_v31 = vpop.f32.mrb[7].mxu1 }
 0x33e   : > { %2449 = vst [vmem:[%s6520_s11 + $0x78] sm:$0xff] %v2371_v31 }
 0x33f   : > { %v2262_v32 = vpop.f32.mrb[8].mxu0 }
 0x340   : > { %2450 = vst [vmem:[%s6520_s11 + $0x80] sm:$0xff] %v2262_v32  ;;  %v2264_v33 = vpop.f32.mrb[9].mxu0 }
 0x341   : > { %2451 = vst [vmem:[%s6520_s11 + $0x88] sm:$0xff] %v2264_v33  ;;  %v2266_v35 = vpop.f32.mrb[10].mxu0 }
 0x342   : > { %v2375_v34 = vpop.f32.mrb[8].mxu1  ;;  %2454 = vst [vmem:[%s6520_s11 + $0xa0] sm:$0xff] %v2266_v35  ;;  %v2268_v37 = vpop.f32.mrb[11].mxu0 }
 0x343   : > { %2452 = vst [vmem:[%s6520_s11 + $0x90] sm:$0xff] %v2375_v34  ;;  %v2377_v36 = vpop.f32.mrb[9].mxu1  ;;  %2455 = vst [vmem:[%s6520_s11 + $0xa8] sm:$0xff] %v2268_v37 }
 0x344   : > { %2453 = vst [vmem:[%s6520_s11 + $0x98] sm:$0xff] %v2377_v36  ;;  %v2379_v38 = vpop.f32.mrb[10].mxu1 }
 0x345   : > { %2456 = vst [vmem:[%s6520_s11 + $0xb0] sm:$0xff] %v2379_v38  ;;  %v2381_v39 = vpop.f32.mrb[11].mxu1 }
 0x346   : > { %2457 = vst [vmem:[%s6520_s11 + $0xb8] sm:$0xff] %v2381_v39 }
 0x347   : > { %v2272_v40 = vpop.f32.mrb[12].mxu0 }
 0x348   : > { %2458 = vst [vmem:[%s6520_s11 + $0xc0] sm:$0xff] %v2272_v40  ;;  %v2274_v41 = vpop.f32.mrb[13].mxu0 }
 0x349   : > { %2459 = vst [vmem:[%s6520_s11 + $0xc8] sm:$0xff] %v2274_v41  ;;  %v2276_v43 = vpop.f32.mrb[14].mxu0 }
 0x34a   : > { %v2385_v42 = vpop.f32.mrb[12].mxu1  ;;  %2462 = vst [vmem:[%s6520_s11 + $0xe0] sm:$0xff] %v2276_v43  ;;  %v2278_v45 = vpop.f32.mrb[15].mxu0 }
 0x34b   : > { %2460 = vst [vmem:[%s6520_s11 + $0xd0] sm:$0xff] %v2385_v42  ;;  %v2387_v44 = vpop.f32.mrb[13].mxu1  ;;  %2463 = vst [vmem:[%s6520_s11 + $0xe8] sm:$0xff] %v2278_v45 }
 0x34c   : > { %2461 = vst [vmem:[%s6520_s11 + $0xd8] sm:$0xff] %v2387_v44  ;;  %v2389_v46 = vpop.f32.mrb[14].mxu1 }
 0x34d   : > { %2464 = vst [vmem:[%s6520_s11 + $0xf0] sm:$0xff] %v2389_v46  ;;  %v2391_v47 = vpop.f32.mrb[15].mxu1 }
 0x34e   : > { %2465 = vst [vmem:[%s6520_s11 + $0xf8] sm:$0xff] %v2391_v47 }
 0x34f   : > { %v2282_v48 = vpop.f32.mrb[16].mxu0 }
 0x350   : > { %2466 = vst [vmem:[%s6520_s11 + $0x100] sm:$0xff] %v2282_v48  ;;  %v2284_v49 = vpop.f32.mrb[17].mxu0 }
 0x351   : > { %2467 = vst [vmem:[%s6520_s11 + $0x108] sm:$0xff] %v2284_v49  ;;  %v2286_v51 = vpop.f32.mrb[18].mxu0 }
 0x352   : > { %v2395_v50 = vpop.f32.mrb[16].mxu1  ;;  %2470 = vst [vmem:[%s6520_s11 + $0x120] sm:$0xff] %v2286_v51  ;;  %v2288_v53 = vpop.f32.mrb[19].mxu0 }
 0x353   : > { %2468 = vst [vmem:[%s6520_s11 + $0x110] sm:$0xff] %v2395_v50  ;;  %v2397_v52 = vpop.f32.mrb[17].mxu1  ;;  %2471 = vst [vmem:[%s6520_s11 + $0x128] sm:$0xff] %v2288_v53 }
 0x354   : > { %2469 = vst [vmem:[%s6520_s11 + $0x118] sm:$0xff] %v2397_v52  ;;  %v2399_v54 = vpop.f32.mrb[18].mxu1 }
 0x355   : > { %2472 = vst [vmem:[%s6520_s11 + $0x130] sm:$0xff] %v2399_v54  ;;  %v2401_v55 = vpop.f32.mrb[19].mxu1 }
 0x356   : > { %2473 = vst [vmem:[%s6520_s11 + $0x138] sm:$0xff] %v2401_v55 }
 0x357   : > { %v2292_v56 = vpop.f32.mrb[20].mxu0 }
 0x358   : > { %2474 = vst [vmem:[%s6520_s11 + $0x140] sm:$0xff] %v2292_v56  ;;  %v2294_v57 = vpop.f32.mrb[21].mxu0 }
 0x359   : > { %2475 = vst [vmem:[%s6520_s11 + $0x148] sm:$0xff] %v2294_v57  ;;  %v2296_v59 = vpop.f32.mrb[22].mxu0 }
 0x35a   : > { %v2405_v58 = vpop.f32.mrb[20].mxu1  ;;  %2478 = vst [vmem:[%s6520_s11 + $0x160] sm:$0xff] %v2296_v59  ;;  %v2298_v61 = vpop.f32.mrb[23].mxu0 }
 0x35b   : > { %2476 = vst [vmem:[%s6520_s11 + $0x150] sm:$0xff] %v2405_v58  ;;  %v2407_v60 = vpop.f32.mrb[21].mxu1  ;;  %2479 = vst [vmem:[%s6520_s11 + $0x168] sm:$0xff] %v2298_v61 }
 0x35c   : > { %2477 = vst [vmem:[%s6520_s11 + $0x158] sm:$0xff] %v2407_v60  ;;  %v2409_v62 = vpop.f32.mrb[22].mxu1 }
 0x35d   : > { %2480 = vst [vmem:[%s6520_s11 + $0x170] sm:$0xff] %v2409_v62  ;;  %v2411_v63 = vpop.f32.mrb[23].mxu1 }
 0x35e   : > { %2481 = vst [vmem:[%s6520_s11 + $0x178] sm:$0xff] %v2411_v63 }
 0x35f   : > { %v2302_v0 = vpop.f32.mrb[24].mxu0 }
 0x360   : > { %2482 = vst [vmem:[%s6520_s11 + $0x180] sm:$0xff] %v2302_v0  ;;  %v2304_v1 = vpop.f32.mrb[25].mxu0 }
 0x361   : > { %2483 = vst [vmem:[%s6520_s11 + $0x188] sm:$0xff] %v2304_v1  ;;  %v2306_v3 = vpop.f32.mrb[26].mxu0 }
 0x362   : > { %v2415_v2 = vpop.f32.mrb[24].mxu1  ;;  %2486 = vst [vmem:[%s6520_s11 + $0x1a0] sm:$0xff] %v2306_v3  ;;  %v2308_v5 = vpop.f32.mrb[27].mxu0 }
 0x363   : > { %2484 = vst [vmem:[%s6520_s11 + $0x190] sm:$0xff] %v2415_v2  ;;  %v2417_v4 = vpop.f32.mrb[25].mxu1  ;;  %2487 = vst [vmem:[%s6520_s11 + $0x1a8] sm:$0xff] %v2308_v5 }
 0x364   : > { %2485 = vst [vmem:[%s6520_s11 + $0x198] sm:$0xff] %v2417_v4  ;;  %v2419_v6 = vpop.f32.mrb[26].mxu1 }
 0x365   : > { %2488 = vst [vmem:[%s6520_s11 + $0x1b0] sm:$0xff] %v2419_v6  ;;  %v2421_v7 = vpop.f32.mrb[27].mxu1 }
 0x366   : > { %2489 = vst [vmem:[%s6520_s11 + $0x1b8] sm:$0xff] %v2421_v7 }
 0x367   : > { %v2312_v8 = vpop.f32.mrb[28].mxu0 }
 0x368   : > { %2490 = vst [vmem:[%s6520_s11 + $0x1c0] sm:$0xff] %v2312_v8  ;;  %v2314_v9 = vpop.f32.mrb[29].mxu0  ;;  %2504 = sbr.rel (!%p4439_p6) target bundleno = 1084 (0x43c), region = 168 }
 0x369   : > { %2491 = vst [vmem:[%s6520_s11 + $0x1c8] sm:$0xff] %v2314_v9  ;;  %v2316_v11 = vpop.f32.mrb[30].mxu0 }
 0x36a   : > { %v2425_v10 = vpop.f32.mrb[28].mxu1  ;;  %2494 = vst [vmem:[%s6520_s11 + $0x1e0] sm:$0xff] %v2316_v11  ;;  %v2318_v13 = vpop.f32.mrb[31].mxu0 }
 0x36b   : > { %2492 = vst [vmem:[%s6520_s11 + $0x1d0] sm:$0xff] %v2425_v10  ;;  %v2427_v12 = vpop.f32.mrb[29].mxu1  ;;  %2495 = vst [vmem:[%s6520_s11 + $0x1e8] sm:$0xff] %v2318_v13 }
 0x36c   : > { %2493 = vst [vmem:[%s6520_s11 + $0x1d8] sm:$0xff] %v2427_v12  ;;  %v2429_v14 = vpop.f32.mrb[30].mxu1 }
 0x36d   : > { %2496 = vst [vmem:[%s6520_s11 + $0x1f0] sm:$0xff] %v2429_v14  ;;  %v2431_v15 = vpop.f32.mrb[31].mxu1 }
 0x36e   : > { %2497 = vst [vmem:[%s6520_s11 + $0x1f8] sm:$0xff] %v2431_v15 }
 0x36f   : > { %s7362_s30 = smov (!%p2507_p9, %s2506_s30), 4 }
 0x370   : > { %s3454_s7 = sshll.u32 %s7362_s30, 11  ;;  %s6595_s19 = sshll.u32 %s7362_s30, 3 }
 0x371   : > { %p3458_p10 = scmp.eq.s32.totalorder %s3454_s7, 0 }
 0x372   : > { %p2519_p11 = scmp.lt.u32.totalorder (!%p3458_p10), %s6595_s19, 8 }
 0x373   : > { %2518 = sbr.rel (%p3458_p10) target bundleno = 1084 (0x43c), region = 172 }
 0x37a   : > { %2522 = sbr.rel (%p2519_p11) target bundleno = 1064 (0x428), region = 176  ;;  %s6599_s22 = sand.u32 (!%p2519_p11), 7, %s6595_s19  }
 0x37b   : > { %p2568_p6 = scmp.eq.s32.totalorder (!%p2519_p11), %s6599_s22, 0  ;;  %p3459_p12 = scmp.ne.s32.totalorder (!%p2519_p11), %s6599_s22, 0 }
 0x381   : > { %2571 = sbr.rel (%p3459_p12) target bundleno = 971 (0x3cb), region = 191  ;;  %s2572_s14 = sshrl.u32 (!%p3459_p12), %s6595_s19, 3 }
 0x382   : > { %s6606_s8 = sshrl.u32 (!%p3459_p12), %s2572_s14, 2 }
 0x383   : > { %p3460_p13 = scmp.le.s32.totalorder (!%p3459_p12), %s6606_s8, 0 }
 0x388   : > { %3288 = sbr.rel (%p3460_p13) target bundleno = 944 (0x3b0), region = 409  ;;  %s7319_s9 = smov (!%p3460_p13), %s6593_s0 }
 0x389   : > { %s7320_s10 = smov (!%p3460_p13), %s6520_s11  ;;  %s6615_s28 = smov (!%p3460_p13), 0  }
 0x38a   : > { %s6617_s4 = smov (!%p3460_p13), 0  }
 0x38f LB: >> { %v2585_v16 = vld [vmem:[%s4316_s10] sm:$0xff]  ;;  %v2587_v17 = vld [vmem:[%s4316_s10 + $0x8] sm:$0xff]  ;;  %v2589_v18 = vld [vmem:[%s4316_s10 + $0x10] sm:$0xff]  ;;  %s2713_s5 = sadd.s32 1, %s4320_s28  ;;  %s2579_s4 = sadd.s32 1, %s4324_s4   ;;  %s4324_s4 = sphi %s6617_s4, %s2579_s4   ;;  %s4320_s28 = sphi %s6615_s28, %s7323_s28   ;;  %s4316_s10 = sphi %s7320_s10, %s7322_s10   ;;  %s4312_s9 = sphi %s7319_s9, %s7321_s9  }
 0x390   : >> { %2586 = vst [vmem:[%s4312_s9] sm:$0xff] %v2585_v16  ;;  %2588 = vst [vmem:[%s4312_s9 + $0x8] sm:$0xff] %v2587_v17  ;;  %v2591_v19 = vld [vmem:[%s4316_s10 + $0x18] sm:$0xff]  ;;  %v2593_v20 = vld [vmem:[%s4316_s10 + $0x20] sm:$0xff]  ;;  %p2714_p0 = scmp.ge.s32.totalorder %s2713_s5, %s6606_s8  ;;  %p2578_p3 = scmp.ge.s32.totalorder %s2579_s4, %s6606_s8 }
 0x391   : >> { %2590 = vst [vmem:[%s4312_s9 + $0x10] sm:$0xff] %v2589_v18  ;;  %v2595_v21 = vld [vmem:[%s4316_s10 + $0x28] sm:$0xff]  ;;  %2592 = vst [vmem:[%s4312_s9 + $0x18] sm:$0xff] %v2591_v19  ;;  %v2597_v22 = vld [vmem:[%s4316_s10 + $0x30] sm:$0xff] }
 0x392   : >> { %2594 = vst [vmem:[%s4312_s9 + $0xc8] sm:$0xff] %v2593_v20  ;;  %2596 = vst [vmem:[%s4312_s9 + $0xd0] sm:$0xff] %v2595_v21  ;;  %v2599_v23 = vld [vmem:[%s4316_s10 + $0x38] sm:$0xff]  ;;  %v2601_v24 = vld [vmem:[%s4316_s10 + $0x40] sm:$0xff]  ;;  %s7364_s5 = smov (%p2714_p0, %s2713_s5), 0 }
 0x393   : >> { %2598 = vst [vmem:[%s4312_s9 + $0xd8] sm:$0xff] %v2597_v22  ;;  %2600 = vst [vmem:[%s4312_s9 + $0xe0] sm:$0xff] %v2599_v23  ;;  %v2603_v25 = vld [vmem:[%s4316_s10 + $0x48] sm:$0xff]  ;;  %v2605_v26 = vld [vmem:[%s4316_s10 + $0x50] sm:$0xff]  ;;  %s3461_s6 = sshll.u32 %s7364_s5, 5  ;;  %s7323_s28 = smov %s7364_s5 }
 0x394   : >> { %2602 = vst [vmem:[%s4312_s9 + $0x190] sm:$0xff] %v2601_v24  ;;  %v2607_v27 = vld [vmem:[%s4316_s10 + $0x58] sm:$0xff]  ;;  %2604 = vst [vmem:[%s4312_s9 + $0x198] sm:$0xff] %v2603_v25  ;;  %v2609_v28 = vld [vmem:[%s4316_s10 + $0x60] sm:$0xff]  ;;  %s6673_s24 = scalar_lea.vmem %s6520_s11, %s3461_s6 [#allocation4]   ;;  %s6676_s18 = scalar_lea.vmem %s6593_s0, %s3461_s6  }
 0x395   : >> { %2606 = vst [vmem:[%s4312_s9 + $0x1a0] sm:$0xff] %v2605_v26  ;;  %2608 = vst [vmem:[%s4312_s9 + $0x1a8] sm:$0xff] %v2607_v27  ;;  %v2611_v29 = vld [vmem:[%s4316_s10 + $0x68] sm:$0xff]  ;;  %v2613_v30 = vld [vmem:[%s4316_s10 + $0x70] sm:$0xff] }
 0x396   : >> { %2610 = vst [vmem:[%s4312_s9 + $0x258] sm:$0xff] %v2609_v28  ;;  %2612 = vst [vmem:[%s4312_s9 + $0x260] sm:$0xff] %v2611_v29  ;;  %v2615_v31 = vld [vmem:[%s4316_s10 + $0x78] sm:$0xff]  ;;  %v2617_v32 = vld [vmem:[%s4316_s10 + $0x80] sm:$0xff] }
 0x397   : >> { %2614 = vst [vmem:[%s4312_s9 + $0x268] sm:$0xff] %v2613_v30  ;;  %v2619_v33 = vld [vmem:[%s4316_s10 + $0x88] sm:$0xff]  ;;  %2616 = vst [vmem:[%s4312_s9 + $0x270] sm:$0xff] %v2615_v31  ;;  %v2621_v34 = vld [vmem:[%s4316_s10 + $0x90] sm:$0xff] }
 0x398   : >> { %2618 = vst [vmem:[%s4312_s9 + $0x320] sm:$0xff] %v2617_v32  ;;  %2620 = vst [vmem:[%s4312_s9 + $0x328] sm:$0xff] %v2619_v33  ;;  %v2623_v35 = vld [vmem:[%s4316_s10 + $0x98] sm:$0xff]  ;;  %v2625_v36 = vld [vmem:[%s4316_s10 + $0xa0] sm:$0xff] }
 0x399   : >> { %2622 = vst [vmem:[%s4312_s9 + $0x330] sm:$0xff] %v2621_v34  ;;  %2624 = vst [vmem:[%s4312_s9 + $0x338] sm:$0xff] %v2623_v35  ;;  %v2627_v37 = vld [vmem:[%s4316_s10 + $0xa8] sm:$0xff]  ;;  %v2629_v38 = vld [vmem:[%s4316_s10 + $0xb0] sm:$0xff] }
 0x39a   : >> { %2626 = vst [vmem:[%s4312_s9 + $0x3e8] sm:$0xff] %v2625_v36  ;;  %v2631_v39 = vld [vmem:[%s4316_s10 + $0xb8] sm:$0xff]  ;;  %2628 = vst [vmem:[%s4312_s9 + $0x3f0] sm:$0xff] %v2627_v37  ;;  %v2633_v40 = vld [vmem:[%s4316_s10 + $0xc0] sm:$0xff] }
 0x39b   : >> { %2630 = vst [vmem:[%s4312_s9 + $0x3f8] sm:$0xff] %v2629_v38  ;;  %2632 = vst [vmem:[%s4312_s9 + $0x400] sm:$0xff] %v2631_v39  ;;  %v2635_v41 = vld [vmem:[%s4316_s10 + $0xc8] sm:$0xff]  ;;  %v2637_v42 = vld [vmem:[%s4316_s10 + $0xd0] sm:$0xff] }
 0x39c   : >> { %2634 = vst [vmem:[%s4312_s9 + $0x4b0] sm:$0xff] %v2633_v40  ;;  %2636 = vst [vmem:[%s4312_s9 + $0x4b8] sm:$0xff] %v2635_v41  ;;  %v2639_v43 = vld [vmem:[%s4316_s10 + $0xd8] sm:$0xff]  ;;  %v2641_v44 = vld [vmem:[%s4316_s10 + $0xe0] sm:$0xff] }
 0x39d   : >> { %2638 = vst [vmem:[%s4312_s9 + $0x4c0] sm:$0xff] %v2637_v42  ;;  %v2643_v45 = vld [vmem:[%s4316_s10 + $0xe8] sm:$0xff]  ;;  %2640 = vst [vmem:[%s4312_s9 + $0x4c8] sm:$0xff] %v2639_v43  ;;  %v2645_v46 = vld [vmem:[%s4316_s10 + $0xf0] sm:$0xff] }
 0x39e   : >> { %2642 = vst [vmem:[%s4312_s9 + $0x578] sm:$0xff] %v2641_v44  ;;  %2644 = vst [vmem:[%s4312_s9 + $0x580] sm:$0xff] %v2643_v45  ;;  %v2647_v47 = vld [vmem:[%s4316_s10 + $0xf8] sm:$0xff]  ;;  %v2649_v48 = vld [vmem:[%s4316_s10 + $0x100] sm:$0xff] }
 0x39f   : >> { %2646 = vst [vmem:[%s4312_s9 + $0x588] sm:$0xff] %v2645_v46  ;;  %2648 = vst [vmem:[%s4312_s9 + $0x590] sm:$0xff] %v2647_v47  ;;  %v2651_v49 = vld [vmem:[%s4316_s10 + $0x108] sm:$0xff]  ;;  %v2653_v50 = vld [vmem:[%s4316_s10 + $0x110] sm:$0xff] }
 0x3a0   : >> { %2650 = vst [vmem:[%s4312_s9 + $0x640] sm:$0xff] %v2649_v48  ;;  %v2655_v51 = vld [vmem:[%s4316_s10 + $0x118] sm:$0xff]  ;;  %2652 = vst [vmem:[%s4312_s9 + $0x648] sm:$0xff] %v2651_v49  ;;  %v2657_v52 = vld [vmem:[%s4316_s10 + $0x120] sm:$0xff] }
 0x3a1   : >> { %2654 = vst [vmem:[%s4312_s9 + $0x650] sm:$0xff] %v2653_v50  ;;  %2656 = vst [vmem:[%s4312_s9 + $0x658] sm:$0xff] %v2655_v51  ;;  %v2659_v53 = vld [vmem:[%s4316_s10 + $0x128] sm:$0xff]  ;;  %v2661_v54 = vld [vmem:[%s4316_s10 + $0x130] sm:$0xff] }
 0x3a2   : >> { %2658 = vst [vmem:[%s4312_s9 + $0x708] sm:$0xff] %v2657_v52  ;;  %2660 = vst [vmem:[%s4312_s9 + $0x710] sm:$0xff] %v2659_v53  ;;  %v2663_v55 = vld [vmem:[%s4316_s10 + $0x138] sm:$0xff]  ;;  %v2665_v56 = vld [vmem:[%s4316_s10 + $0x140] sm:$0xff] }
 0x3a3   : >> { %2662 = vst [vmem:[%s4312_s9 + $0x718] sm:$0xff] %v2661_v54  ;;  %v2667_v57 = vld [vmem:[%s4316_s10 + $0x148] sm:$0xff]  ;;  %2664 = vst [vmem:[%s4312_s9 + $0x720] sm:$0xff] %v2663_v55  ;;  %v2669_v58 = vld [vmem:[%s4316_s10 + $0x150] sm:$0xff] }
 0x3a4   : >> { %2666 = vst [vmem:[%s4312_s9 + $0x7d0] sm:$0xff] %v2665_v56  ;;  %2668 = vst [vmem:[%s4312_s9 + $0x7d8] sm:$0xff] %v2667_v57  ;;  %v2671_v59 = vld [vmem:[%s4316_s10 + $0x158] sm:$0xff]  ;;  %v2673_v60 = vld [vmem:[%s4316_s10 + $0x160] sm:$0xff] }
 0x3a5   : >> { %2670 = vst [vmem:[%s4312_s9 + $0x7e0] sm:$0xff] %v2669_v58  ;;  %2672 = vst [vmem:[%s4312_s9 + $0x7e8] sm:$0xff] %v2671_v59  ;;  %v2675_v61 = vld [vmem:[%s4316_s10 + $0x168] sm:$0xff]  ;;  %v2677_v62 = vld [vmem:[%s4316_s10 + $0x170] sm:$0xff] }
 0x3a6   : >> { %2674 = vst [vmem:[%s4312_s9 + $0x898] sm:$0xff] %v2673_v60  ;;  %v2679_v63 = vld [vmem:[%s4316_s10 + $0x178] sm:$0xff]  ;;  %2676 = vst [vmem:[%s4312_s9 + $0x8a0] sm:$0xff] %v2675_v61  ;;  %v2681_v0 = vld [vmem:[%s4316_s10 + $0x180] sm:$0xff] }
 0x3a7   : >> { %2678 = vst [vmem:[%s4312_s9 + $0x8a8] sm:$0xff] %v2677_v62  ;;  %2680 = vst [vmem:[%s4312_s9 + $0x8b0] sm:$0xff] %v2679_v63  ;;  %v2683_v1 = vld [vmem:[%s4316_s10 + $0x188] sm:$0xff]  ;;  %v2685_v2 = vld [vmem:[%s4316_s10 + $0x190] sm:$0xff] }
 0x3a8   : >> { %2682 = vst [vmem:[%s4312_s9 + $0x960] sm:$0xff] %v2681_v0  ;;  %2684 = vst [vmem:[%s4312_s9 + $0x968] sm:$0xff] %v2683_v1  ;;  %v2687_v3 = vld [vmem:[%s4316_s10 + $0x198] sm:$0xff]  ;;  %v2689_v4 = vld [vmem:[%s4316_s10 + $0x1a0] sm:$0xff] }
 0x3a9   : >> { %2686 = vst [vmem:[%s4312_s9 + $0x970] sm:$0xff] %v2685_v2  ;;  %v2691_v5 = vld [vmem:[%s4316_s10 + $0x1a8] sm:$0xff]  ;;  %2688 = vst [vmem:[%s4312_s9 + $0x978] sm:$0xff] %v2687_v3  ;;  %v2693_v6 = vld [vmem:[%s4316_s10 + $0x1b0] sm:$0xff]  ;;  %2581 = sbr.rel (!%p2578_p3) target bundleno = 911 (0x38f), region = 415 }
 0x3aa   : >> { %2690 = vst [vmem:[%s4312_s9 + $0xa28] sm:$0xff] %v2689_v4  ;;  %2692 = vst [vmem:[%s4312_s9 + $0xa30] sm:$0xff] %v2691_v5  ;;  %v2695_v7 = vld [vmem:[%s4316_s10 + $0x1b8] sm:$0xff]  ;;  %v2697_v8 = vld [vmem:[%s4316_s10 + $0x1c0] sm:$0xff] }
 0x3ab   : >> { %2694 = vst [vmem:[%s4312_s9 + $0xa38] sm:$0xff] %v2693_v6  ;;  %2696 = vst [vmem:[%s4312_s9 + $0xa40] sm:$0xff] %v2695_v7  ;;  %v2699_v9 = vld [vmem:[%s4316_s10 + $0x1c8] sm:$0xff]  ;;  %v2701_v10 = vld [vmem:[%s4316_s10 + $0x1d0] sm:$0xff] }
 0x3ac   : >> { %2698 = vst [vmem:[%s4312_s9 + $0xaf0] sm:$0xff] %v2697_v8  ;;  %v2703_v11 = vld [vmem:[%s4316_s10 + $0x1d8] sm:$0xff]  ;;  %2700 = vst [vmem:[%s4312_s9 + $0xaf8] sm:$0xff] %v2699_v9  ;;  %v2705_v12 = vld [vmem:[%s4316_s10 + $0x1e0] sm:$0xff] }
 0x3ad   : >> { %2702 = vst [vmem:[%s4312_s9 + $0xb00] sm:$0xff] %v2701_v10  ;;  %2704 = vst [vmem:[%s4312_s9 + $0xb08] sm:$0xff] %v2703_v11  ;;  %v2707_v13 = vld [vmem:[%s4316_s10 + $0x1e8] sm:$0xff]  ;;  %v2709_v14 = vld [vmem:[%s4316_s10 + $0x1f0] sm:$0xff] }
 0x3ae   : >> { %2706 = vst [vmem:[%s4312_s9 + $0xbb8] sm:$0xff] %v2705_v12  ;;  %2708 = vst [vmem:[%s4312_s9 + $0xbc0] sm:$0xff] %v2707_v13  ;;  %v2711_v15 = vld [vmem:[%s4316_s10 + $0x1f8] sm:$0xff]  ;;  %s7322_s10 = smov %s6673_s24 }
 0x3af   : >> { %2710 = vst [vmem:[%s4312_s9 + $0xbc8] sm:$0xff] %v2709_v14  ;;  %2712 = vst [vmem:[%s4312_s9 + $0xbd0] sm:$0xff] %v2711_v15  ;;  %s7321_s9 = smov %s6676_s18 }
 0x3b0 PF: > { %s6782_s27 = sand.u32 3, %s2572_s14   ;;  %s3492_s29 = sshll.u32 %s6606_s8, 9 }
 0x3b1   : > { %s2724_s20 = sshra.s32 %s3492_s29, 4  ;;  %p3466_p1 = scmp.le.s32.totalorder %s6782_s27, 0 }
 0x3b2   : > { %s6786_s12 = scalar_lea.vmem %s6520_s11, %s2724_s20 [#allocation4]   ;;  %s6789_s25 = scalar_lea.vmem %s6593_s0, %s2724_s20  }
 0x3b3   : > { %3302 = sbr.rel (%p3466_p1) target bundleno = 971 (0x3cb), region = 420  ;;  %s7324_s30 = smov (!%p3466_p1), %s6789_s25 }
 0x3b4   : > { %s7325_s26 = smov (!%p3466_p1), %s6786_s12  ;;  %s6798_s21 = smov (!%p3466_p1), 0  }
 0x3b5   : > { %s6800_s7 = smov (!%p3466_p1), 0  }
 0x3ba LB: >> { %v2740_v16 = vld [vmem:[%s4332_s26] sm:$0xff]  ;;  %s2772_s14 = sadd.s32 1, %s4336_s21  ;;  %s2734_s7 = sadd.s32 1, %s4340_s7   ;;  %s4340_s7 = sphi %s6800_s7, %s2734_s7   ;;  %s4336_s21 = sphi %s6798_s21, %s7326_s21   ;;  %s4332_s26 = sphi %s7325_s26, %s2777_s26   ;;  %s4328_s30 = sphi %s7324_s30, %s2778_s30  }
 0x3bb   : >> { %v2742_v17 = vld [vmem:[%s4332_s26 + $0x20] sm:$0xff]  ;;  %2741 = vst [vmem:[%s4328_s30] sm:$0xff] %v2740_v16  ;;  %p2773_p2 = scmp.ge.s32.totalorder %s2772_s14, %s6782_s27  ;;  %p2733_p4 = scmp.ge.s32.totalorder %s2734_s7, %s6782_s27 }
 0x3bc   : >> { %v2744_v18 = vld [vmem:[%s4332_s26 + $0x40] sm:$0xff]  ;;  %2743 = vst [vmem:[%s4328_s30 + $0xc8] sm:$0xff] %v2742_v17 }
 0x3bd   : >> { %2745 = vst [vmem:[%s4328_s30 + $0x190] sm:$0xff] %v2744_v18  ;;  %v2746_v19 = vld [vmem:[%s4332_s26 + $0x60] sm:$0xff]  ;;  %s7366_s14 = smov (%p2773_p2, %s2772_s14), 0 }
 0x3be   : >> { %v2748_v20 = vld [vmem:[%s4332_s26 + $0x80] sm:$0xff]  ;;  %2747 = vst [vmem:[%s4328_s30 + $0x258] sm:$0xff] %v2746_v19  ;;  %s3467_s8 = sshll.u32 %s7366_s14, 3  ;;  %s7326_s21 = smov %s7366_s14 }
 0x3bf   : >> { %v2750_v21 = vld [vmem:[%s4332_s26 + $0xa0] sm:$0xff]  ;;  %2749 = vst [vmem:[%s4328_s30 + $0x320] sm:$0xff] %v2748_v20 }
 0x3c0   : >> { %2751 = vst [vmem:[%s4328_s30 + $0x3e8] sm:$0xff] %v2750_v21  ;;  %v2752_v22 = vld [vmem:[%s4332_s26 + $0xc0] sm:$0xff] }
 0x3c1   : >> { %v2754_v23 = vld [vmem:[%s4332_s26 + $0xe0] sm:$0xff]  ;;  %2753 = vst [vmem:[%s4328_s30 + $0x4b0] sm:$0xff] %v2752_v22 }
 0x3c2   : >> { %v2756_v24 = vld [vmem:[%s4332_s26 + $0x100] sm:$0xff]  ;;  %2755 = vst [vmem:[%s4328_s30 + $0x578] sm:$0xff] %v2754_v23 }
 0x3c3   : >> { %2757 = vst [vmem:[%s4328_s30 + $0x640] sm:$0xff] %v2756_v24  ;;  %v2758_v25 = vld [vmem:[%s4332_s26 + $0x120] sm:$0xff] }
 0x3c4   : >> { %v2760_v26 = vld [vmem:[%s4332_s26 + $0x140] sm:$0xff]  ;;  %2759 = vst [vmem:[%s4328_s30 + $0x708] sm:$0xff] %v2758_v25  ;;  %2736 = sbr.rel (!%p2733_p4) target bundleno = 954 (0x3ba), region = 426 }
 0x3c5   : >> { %v2762_v27 = vld [vmem:[%s4332_s26 + $0x160] sm:$0xff]  ;;  %2761 = vst [vmem:[%s4328_s30 + $0x7d0] sm:$0xff] %v2760_v26 }
 0x3c6   : >> { %2763 = vst [vmem:[%s4328_s30 + $0x898] sm:$0xff] %v2762_v27  ;;  %v2764_v28 = vld [vmem:[%s4332_s26 + $0x180] sm:$0xff] }
 0x3c7   : >> { %v2766_v29 = vld [vmem:[%s4332_s26 + $0x1a0] sm:$0xff]  ;;  %2765 = vst [vmem:[%s4328_s30 + $0x960] sm:$0xff] %v2764_v28 }
 0x3c8   : >> { %v2768_v30 = vld [vmem:[%s4332_s26 + $0x1c0] sm:$0xff]  ;;  %2767 = vst [vmem:[%s4328_s30 + $0xa28] sm:$0xff] %v2766_v29 }
 0x3c9   : >> { %2769 = vst [vmem:[%s4328_s30 + $0xaf0] sm:$0xff] %v2768_v30  ;;  %v2770_v31 = vld [vmem:[%s4332_s26 + $0x1e0] sm:$0xff]  ;;  %s2777_s26 = scalar_lea.vmem %s6786_s12, %s3467_s8 [#allocation4]  }
 0x3ca   : >> { %2771 = vst [vmem:[%s4328_s30 + $0xbb8] sm:$0xff] %v2770_v31  ;;  %s2778_s30 = scalar_lea.vmem %s6789_s25, %s3467_s8  }
 0x3cb PF: > { %2781 = sbr.rel (%p2568_p6) target bundleno = 1064 (0x428), region = 209  ;;  %s2783_s9 = ssub.s32 (!%p2568_p6), %s6595_s19, %s6599_s22 }
 0x3cc   : > { %s2787_s10 = sshrl.u32 (!%p2568_p6), %s6595_s19, 3  ;;  %s6863_s28 = scalar_lea.vmem (!%p2568_p6), %s6520_s11, %s2783_s9 [#allocation4] }
 0x3cd   : > { %s6866_s4 = scalar_lea.vmem (!%p2568_p6), %s6593_s0, %s2783_s9  ;;  %s6870_s5 = sshrl.u32 (!%p2568_p6), %s2787_s10, 2 }
 0x3ce   : > { %p3469_p5 = scmp.le.s32.totalorder (!%p2568_p6), %s6870_s5, 0 }
 0x3d2   : > { %3316 = sbr.rel (%p3469_p5) target bundleno = 1018 (0x3fa), region = 431  ;;  %s7327_s6 = smov (!%p3469_p5), %s6593_s0 }
 0x3d3   : > { %s7328_s24 = smov (!%p3469_p5), %s6520_s11  ;;  %s6879_s18 = smov (!%p3469_p5), 0  }
 0x3d4   : > { %s6881_s27 = smov (!%p3469_p5), 0  }
 0x3d9 LB: >> { %v2800_v32 = vld [vmem:[%s4348_s24] sm:$0xff]  ;;  %v2802_v33 = vld [vmem:[%s4348_s24 + $0x8] sm:$0xff]  ;;  %v2804_v34 = vld [vmem:[%s4348_s24 + $0x10] sm:$0xff]  ;;  %s2928_s29 = sadd.s32 1, %s4352_s18  ;;  %s2794_s27 = sadd.s32 1, %s4356_s27   ;;  %s4356_s27 = sphi %s6881_s27, %s2794_s27   ;;  %s4352_s18 = sphi %s6879_s18, %s7331_s18   ;;  %s4348_s24 = sphi %s7328_s24, %s7330_s24   ;;  %s4344_s6 = sphi %s7327_s6, %s7329_s6  }
 0x3da   : >> { %2801 = vst [vmem:[%s4344_s6] sm:$0xff] %v2800_v32  ;;  %2803 = vst [vmem:[%s4344_s6 + $0x8] sm:$0xff] %v2802_v33  ;;  %v2806_v35 = vld [vmem:[%s4348_s24 + $0x18] sm:$0xff]  ;;  %v2808_v36 = vld [vmem:[%s4348_s24 + $0x20] sm:$0xff]  ;;  %p2929_p7 = scmp.ge.s32.totalorder %s2928_s29, %s6870_s5  ;;  %p2793_p8 = scmp.ge.s32.totalorder %s2794_s27, %s6870_s5 }
 0x3db   : >> { %2805 = vst [vmem:[%s4344_s6 + $0x10] sm:$0xff] %v2804_v34  ;;  %v2810_v37 = vld [vmem:[%s4348_s24 + $0x28] sm:$0xff]  ;;  %2807 = vst [vmem:[%s4344_s6 + $0x18] sm:$0xff] %v2806_v35  ;;  %v2812_v38 = vld [vmem:[%s4348_s24 + $0x30] sm:$0xff] }
 0x3dc   : >> { %2809 = vst [vmem:[%s4344_s6 + $0xc8] sm:$0xff] %v2808_v36  ;;  %2811 = vst [vmem:[%s4344_s6 + $0xd0] sm:$0xff] %v2810_v37  ;;  %v2814_v39 = vld [vmem:[%s4348_s24 + $0x38] sm:$0xff]  ;;  %v2816_v40 = vld [vmem:[%s4348_s24 + $0x40] sm:$0xff]  ;;  %s7368_s29 = smov (%p2929_p7, %s2928_s29), 0 }
 0x3dd   : >> { %2813 = vst [vmem:[%s4344_s6 + $0xd8] sm:$0xff] %v2812_v38  ;;  %2815 = vst [vmem:[%s4344_s6 + $0xe0] sm:$0xff] %v2814_v39  ;;  %v2818_v41 = vld [vmem:[%s4348_s24 + $0x48] sm:$0xff]  ;;  %v2820_v42 = vld [vmem:[%s4348_s24 + $0x50] sm:$0xff]  ;;  %s3470_s20 = sshll.u32 %s7368_s29, 5  ;;  %s7331_s18 = smov %s7368_s29 }
 0x3de   : >> { %2817 = vst [vmem:[%s4344_s6 + $0x190] sm:$0xff] %v2816_v40  ;;  %v2822_v43 = vld [vmem:[%s4348_s24 + $0x58] sm:$0xff]  ;;  %2819 = vst [vmem:[%s4344_s6 + $0x198] sm:$0xff] %v2818_v41  ;;  %v2824_v44 = vld [vmem:[%s4348_s24 + $0x60] sm:$0xff]  ;;  %s6937_s12 = scalar_lea.vmem %s6520_s11, %s3470_s20 [#allocation4]   ;;  %s6940_s25 = scalar_lea.vmem %s6593_s0, %s3470_s20  }
 0x3df   : >> { %2821 = vst [vmem:[%s4344_s6 + $0x1a0] sm:$0xff] %v2820_v42  ;;  %2823 = vst [vmem:[%s4344_s6 + $0x1a8] sm:$0xff] %v2822_v43  ;;  %v2826_v45 = vld [vmem:[%s4348_s24 + $0x68] sm:$0xff]  ;;  %v2828_v46 = vld [vmem:[%s4348_s24 + $0x70] sm:$0xff] }
 0x3e0   : >> { %2825 = vst [vmem:[%s4344_s6 + $0x258] sm:$0xff] %v2824_v44  ;;  %2827 = vst [vmem:[%s4344_s6 + $0x260] sm:$0xff] %v2826_v45  ;;  %v2830_v47 = vld [vmem:[%s4348_s24 + $0x78] sm:$0xff]  ;;  %v2832_v48 = vld [vmem:[%s4348_s24 + $0x80] sm:$0xff] }
 0x3e1   : >> { %2829 = vst [vmem:[%s4344_s6 + $0x268] sm:$0xff] %v2828_v46  ;;  %v2834_v49 = vld [vmem:[%s4348_s24 + $0x88] sm:$0xff]  ;;  %2831 = vst [vmem:[%s4344_s6 + $0x270] sm:$0xff] %v2830_v47  ;;  %v2836_v50 = vld [vmem:[%s4348_s24 + $0x90] sm:$0xff] }
 0x3e2   : >> { %2833 = vst [vmem:[%s4344_s6 + $0x320] sm:$0xff] %v2832_v48  ;;  %2835 = vst [vmem:[%s4344_s6 + $0x328] sm:$0xff] %v2834_v49  ;;  %v2838_v51 = vld [vmem:[%s4348_s24 + $0x98] sm:$0xff]  ;;  %v2840_v52 = vld [vmem:[%s4348_s24 + $0xa0] sm:$0xff] }
 0x3e3   : >> { %2837 = vst [vmem:[%s4344_s6 + $0x330] sm:$0xff] %v2836_v50  ;;  %2839 = vst [vmem:[%s4344_s6 + $0x338] sm:$0xff] %v2838_v51  ;;  %v2842_v53 = vld [vmem:[%s4348_s24 + $0xa8] sm:$0xff]  ;;  %v2844_v54 = vld [vmem:[%s4348_s24 + $0xb0] sm:$0xff] }
 0x3e4   : >> { %2841 = vst [vmem:[%s4344_s6 + $0x3e8] sm:$0xff] %v2840_v52  ;;  %v2846_v55 = vld [vmem:[%s4348_s24 + $0xb8] sm:$0xff]  ;;  %2843 = vst [vmem:[%s4344_s6 + $0x3f0] sm:$0xff] %v2842_v53  ;;  %v2848_v56 = vld [vmem:[%s4348_s24 + $0xc0] sm:$0xff] }
 0x3e5   : >> { %2845 = vst [vmem:[%s4344_s6 + $0x3f8] sm:$0xff] %v2844_v54  ;;  %2847 = vst [vmem:[%s4344_s6 + $0x400] sm:$0xff] %v2846_v55  ;;  %v2850_v57 = vld [vmem:[%s4348_s24 + $0xc8] sm:$0xff]  ;;  %v2852_v58 = vld [vmem:[%s4348_s24 + $0xd0] sm:$0xff] }
 0x3e6   : >> { %2849 = vst [vmem:[%s4344_s6 + $0x4b0] sm:$0xff] %v2848_v56  ;;  %2851 = vst [vmem:[%s4344_s6 + $0x4b8] sm:$0xff] %v2850_v57  ;;  %v2854_v59 = vld [vmem:[%s4348_s24 + $0xd8] sm:$0xff]  ;;  %v2856_v60 = vld [vmem:[%s4348_s24 + $0xe0] sm:$0xff] }
 0x3e7   : >> { %2853 = vst [vmem:[%s4344_s6 + $0x4c0] sm:$0xff] %v2852_v58  ;;  %v2858_v61 = vld [vmem:[%s4348_s24 + $0xe8] sm:$0xff]  ;;  %2855 = vst [vmem:[%s4344_s6 + $0x4c8] sm:$0xff] %v2854_v59  ;;  %v2860_v62 = vld [vmem:[%s4348_s24 + $0xf0] sm:$0xff] }
 0x3e8   : >> { %2857 = vst [vmem:[%s4344_s6 + $0x578] sm:$0xff] %v2856_v60  ;;  %2859 = vst [vmem:[%s4344_s6 + $0x580] sm:$0xff] %v2858_v61  ;;  %v2862_v63 = vld [vmem:[%s4348_s24 + $0xf8] sm:$0xff]  ;;  %v2864_v0 = vld [vmem:[%s4348_s24 + $0x100] sm:$0xff] }
 0x3e9   : >> { %2861 = vst [vmem:[%s4344_s6 + $0x588] sm:$0xff] %v2860_v62  ;;  %2863 = vst [vmem:[%s4344_s6 + $0x590] sm:$0xff] %v2862_v63  ;;  %v2866_v1 = vld [vmem:[%s4348_s24 + $0x108] sm:$0xff]  ;;  %v2868_v2 = vld [vmem:[%s4348_s24 + $0x110] sm:$0xff] }
 0x3ea   : >> { %2865 = vst [vmem:[%s4344_s6 + $0x640] sm:$0xff] %v2864_v0  ;;  %v2870_v3 = vld [vmem:[%s4348_s24 + $0x118] sm:$0xff]  ;;  %2867 = vst [vmem:[%s4344_s6 + $0x648] sm:$0xff] %v2866_v1  ;;  %v2872_v4 = vld [vmem:[%s4348_s24 + $0x120] sm:$0xff] }
 0x3eb   : >> { %2869 = vst [vmem:[%s4344_s6 + $0x650] sm:$0xff] %v2868_v2  ;;  %2871 = vst [vmem:[%s4344_s6 + $0x658] sm:$0xff] %v2870_v3  ;;  %v2874_v5 = vld [vmem:[%s4348_s24 + $0x128] sm:$0xff]  ;;  %v2876_v6 = vld [vmem:[%s4348_s24 + $0x130] sm:$0xff] }
 0x3ec   : >> { %2873 = vst [vmem:[%s4344_s6 + $0x708] sm:$0xff] %v2872_v4  ;;  %2875 = vst [vmem:[%s4344_s6 + $0x710] sm:$0xff] %v2874_v5  ;;  %v2878_v7 = vld [vmem:[%s4348_s24 + $0x138] sm:$0xff]  ;;  %v2880_v8 = vld [vmem:[%s4348_s24 + $0x140] sm:$0xff] }
 0x3ed   : >> { %2877 = vst [vmem:[%s4344_s6 + $0x718] sm:$0xff] %v2876_v6  ;;  %v2882_v9 = vld [vmem:[%s4348_s24 + $0x148] sm:$0xff]  ;;  %2879 = vst [vmem:[%s4344_s6 + $0x720] sm:$0xff] %v2878_v7  ;;  %v2884_v10 = vld [vmem:[%s4348_s24 + $0x150] sm:$0xff] }
 0x3ee   : >> { %2881 = vst [vmem:[%s4344_s6 + $0x7d0] sm:$0xff] %v2880_v8  ;;  %2883 = vst [vmem:[%s4344_s6 + $0x7d8] sm:$0xff] %v2882_v9  ;;  %v2886_v11 = vld [vmem:[%s4348_s24 + $0x158] sm:$0xff]  ;;  %v2888_v12 = vld [vmem:[%s4348_s24 + $0x160] sm:$0xff] }
 0x3ef   : >> { %2885 = vst [vmem:[%s4344_s6 + $0x7e0] sm:$0xff] %v2884_v10  ;;  %2887 = vst [vmem:[%s4344_s6 + $0x7e8] sm:$0xff] %v2886_v11  ;;  %v2890_v13 = vld [vmem:[%s4348_s24 + $0x168] sm:$0xff]  ;;  %v2892_v14 = vld [vmem:[%s4348_s24 + $0x170] sm:$0xff] }
 0x3f0   : >> { %2889 = vst [vmem:[%s4344_s6 + $0x898] sm:$0xff] %v2888_v12  ;;  %v2894_v15 = vld [vmem:[%s4348_s24 + $0x178] sm:$0xff]  ;;  %2891 = vst [vmem:[%s4344_s6 + $0x8a0] sm:$0xff] %v2890_v13  ;;  %v2896_v16 = vld [vmem:[%s4348_s24 + $0x180] sm:$0xff] }
 0x3f1   : >> { %2893 = vst [vmem:[%s4344_s6 + $0x8a8] sm:$0xff] %v2892_v14  ;;  %2895 = vst [vmem:[%s4344_s6 + $0x8b0] sm:$0xff] %v2894_v15  ;;  %v2898_v17 = vld [vmem:[%s4348_s24 + $0x188] sm:$0xff]  ;;  %v2900_v18 = vld [vmem:[%s4348_s24 + $0x190] sm:$0xff] }
 0x3f2   : >> { %2897 = vst [vmem:[%s4344_s6 + $0x960] sm:$0xff] %v2896_v16  ;;  %2899 = vst [vmem:[%s4344_s6 + $0x968] sm:$0xff] %v2898_v17  ;;  %v2902_v19 = vld [vmem:[%s4348_s24 + $0x198] sm:$0xff]  ;;  %v2904_v20 = vld [vmem:[%s4348_s24 + $0x1a0] sm:$0xff] }
 0x3f3   : >> { %2901 = vst [vmem:[%s4344_s6 + $0x970] sm:$0xff] %v2900_v18  ;;  %v2906_v21 = vld [vmem:[%s4348_s24 + $0x1a8] sm:$0xff]  ;;  %2903 = vst [vmem:[%s4344_s6 + $0x978] sm:$0xff] %v2902_v19  ;;  %v2908_v22 = vld [vmem:[%s4348_s24 + $0x1b0] sm:$0xff]  ;;  %2796 = sbr.rel (!%p2793_p8) target bundleno = 985 (0x3d9), region = 437 }
 0x3f4   : >> { %2905 = vst [vmem:[%s4344_s6 + $0xa28] sm:$0xff] %v2904_v20  ;;  %2907 = vst [vmem:[%s4344_s6 + $0xa30] sm:$0xff] %v2906_v21  ;;  %v2910_v23 = vld [vmem:[%s4348_s24 + $0x1b8] sm:$0xff]  ;;  %v2912_v24 = vld [vmem:[%s4348_s24 + $0x1c0] sm:$0xff] }
 0x3f5   : >> { %2909 = vst [vmem:[%s4344_s6 + $0xa38] sm:$0xff] %v2908_v22  ;;  %2911 = vst [vmem:[%s4344_s6 + $0xa40] sm:$0xff] %v2910_v23  ;;  %v2914_v25 = vld [vmem:[%s4348_s24 + $0x1c8] sm:$0xff]  ;;  %v2916_v26 = vld [vmem:[%s4348_s24 + $0x1d0] sm:$0xff] }
 0x3f6   : >> { %2913 = vst [vmem:[%s4344_s6 + $0xaf0] sm:$0xff] %v2912_v24  ;;  %v2918_v27 = vld [vmem:[%s4348_s24 + $0x1d8] sm:$0xff]  ;;  %2915 = vst [vmem:[%s4344_s6 + $0xaf8] sm:$0xff] %v2914_v25  ;;  %v2920_v28 = vld [vmem:[%s4348_s24 + $0x1e0] sm:$0xff] }
 0x3f7   : >> { %2917 = vst [vmem:[%s4344_s6 + $0xb00] sm:$0xff] %v2916_v26  ;;  %2919 = vst [vmem:[%s4344_s6 + $0xb08] sm:$0xff] %v2918_v27  ;;  %v2922_v29 = vld [vmem:[%s4348_s24 + $0x1e8] sm:$0xff]  ;;  %v2924_v30 = vld [vmem:[%s4348_s24 + $0x1f0] sm:$0xff] }
 0x3f8   : >> { %2921 = vst [vmem:[%s4344_s6 + $0xbb8] sm:$0xff] %v2920_v28  ;;  %2923 = vst [vmem:[%s4344_s6 + $0xbc0] sm:$0xff] %v2922_v29  ;;  %v2926_v31 = vld [vmem:[%s4348_s24 + $0x1f8] sm:$0xff]  ;;  %s7330_s24 = smov %s6937_s12 }
 0x3f9   : >> { %2925 = vst [vmem:[%s4344_s6 + $0xbc8] sm:$0xff] %v2924_v30  ;;  %2927 = vst [vmem:[%s4344_s6 + $0xbd0] sm:$0xff] %v2926_v31  ;;  %s7329_s6 = smov %s6940_s25 }
 0x3fa PF: > { %s7046_s30 = sand.u32 3, %s2787_s10   ;;  %s3494_s26 = sshll.u32 %s6870_s5, 9 }
 0x3fb   : > { %s2939_s21 = sshra.s32 %s3494_s26, 4  ;;  %p3475_p9 = scmp.le.s32.totalorder %s7046_s30, 0 }
 0x3fc   : > { %s7050_s7 = scalar_lea.vmem %s6520_s11, %s2939_s21 [#allocation4]   ;;  %s7053_s14 = scalar_lea.vmem %s6593_s0, %s2939_s21  }
 0x3fd   : > { %3330 = sbr.rel (%p3475_p9) target bundleno = 1045 (0x415), region = 442  ;;  %s7332_s8 = smov (!%p3475_p9), %s7053_s14 }
 0x3fe   : > { %s7333_s9 = smov (!%p3475_p9), %s7050_s7  ;;  %s7062_s6 = smov (!%p3475_p9), 0  }
 0x3ff   : > { %s7064_s24 = smov (!%p3475_p9), 0  }
 0x404 LB: >> { %v2955_v32 = vld [vmem:[%s4364_s9] sm:$0xff]  ;;  %s2987_s10 = sadd.s32 1, %s4368_s6  ;;  %s2949_s24 = sadd.s32 1, %s4372_s24   ;;  %s4372_s24 = sphi %s7064_s24, %s2949_s24   ;;  %s4368_s6 = sphi %s7062_s6, %s7334_s6   ;;  %s4364_s9 = sphi %s7333_s9, %s2992_s9   ;;  %s4360_s8 = sphi %s7332_s8, %s2993_s8  }
 0x405   : >> { %v2957_v33 = vld [vmem:[%s4364_s9 + $0x20] sm:$0xff]  ;;  %2956 = vst [vmem:[%s4360_s8] sm:$0xff] %v2955_v32  ;;  %p2988_p10 = scmp.ge.s32.totalorder %s2987_s10, %s7046_s30  ;;  %p2948_p11 = scmp.ge.s32.totalorder %s2949_s24, %s7046_s30 }
 0x406   : >> { %v2959_v34 = vld [vmem:[%s4364_s9 + $0x40] sm:$0xff]  ;;  %2958 = vst [vmem:[%s4360_s8 + $0xc8] sm:$0xff] %v2957_v33 }
 0x407   : >> { %2960 = vst [vmem:[%s4360_s8 + $0x190] sm:$0xff] %v2959_v34  ;;  %v2961_v35 = vld [vmem:[%s4364_s9 + $0x60] sm:$0xff]  ;;  %s7370_s10 = smov (%p2988_p10, %s2987_s10), 0 }
 0x408   : >> { %v2963_v36 = vld [vmem:[%s4364_s9 + $0x80] sm:$0xff]  ;;  %2962 = vst [vmem:[%s4360_s8 + $0x258] sm:$0xff] %v2961_v35  ;;  %s3476_s5 = sshll.u32 %s7370_s10, 3  ;;  %s7334_s6 = smov %s7370_s10 }
 0x409   : >> { %v2965_v37 = vld [vmem:[%s4364_s9 + $0xa0] sm:$0xff]  ;;  %2964 = vst [vmem:[%s4360_s8 + $0x320] sm:$0xff] %v2963_v36 }
 0x40a   : >> { %2966 = vst [vmem:[%s4360_s8 + $0x3e8] sm:$0xff] %v2965_v37  ;;  %v2967_v38 = vld [vmem:[%s4364_s9 + $0xc0] sm:$0xff] }
 0x40b   : >> { %v2969_v39 = vld [vmem:[%s4364_s9 + $0xe0] sm:$0xff]  ;;  %2968 = vst [vmem:[%s4360_s8 + $0x4b0] sm:$0xff] %v2967_v38 }
 0x40c   : >> { %v2971_v40 = vld [vmem:[%s4364_s9 + $0x100] sm:$0xff]  ;;  %2970 = vst [vmem:[%s4360_s8 + $0x578] sm:$0xff] %v2969_v39 }
 0x40d   : >> { %2972 = vst [vmem:[%s4360_s8 + $0x640] sm:$0xff] %v2971_v40  ;;  %v2973_v41 = vld [vmem:[%s4364_s9 + $0x120] sm:$0xff] }
 0x40e   : >> { %v2975_v42 = vld [vmem:[%s4364_s9 + $0x140] sm:$0xff]  ;;  %2974 = vst [vmem:[%s4360_s8 + $0x708] sm:$0xff] %v2973_v41  ;;  %2951 = sbr.rel (!%p2948_p11) target bundleno = 1028 (0x404), region = 448 }
 0x40f   : >> { %v2977_v43 = vld [vmem:[%s4364_s9 + $0x160] sm:$0xff]  ;;  %2976 = vst [vmem:[%s4360_s8 + $0x7d0] sm:$0xff] %v2975_v42 }
 0x410   : >> { %2978 = vst [vmem:[%s4360_s8 + $0x898] sm:$0xff] %v2977_v43  ;;  %v2979_v44 = vld [vmem:[%s4364_s9 + $0x180] sm:$0xff] }
 0x411   : >> { %v2981_v45 = vld [vmem:[%s4364_s9 + $0x1a0] sm:$0xff]  ;;  %2980 = vst [vmem:[%s4360_s8 + $0x960] sm:$0xff] %v2979_v44 }
 0x412   : >> { %v2983_v46 = vld [vmem:[%s4364_s9 + $0x1c0] sm:$0xff]  ;;  %2982 = vst [vmem:[%s4360_s8 + $0xa28] sm:$0xff] %v2981_v45 }
 0x413   : >> { %2984 = vst [vmem:[%s4360_s8 + $0xaf0] sm:$0xff] %v2983_v46  ;;  %v2985_v47 = vld [vmem:[%s4364_s9 + $0x1e0] sm:$0xff]  ;;  %s2992_s9 = scalar_lea.vmem %s7050_s7, %s3476_s5 [#allocation4]  }
 0x414   : >> { %2986 = vst [vmem:[%s4360_s8 + $0xbb8] sm:$0xff] %v2985_v47  ;;  %s2993_s8 = scalar_lea.vmem %s7053_s14, %s3476_s5  }
 0x415 PF: > { %s4378_s18 = smov 0  }
 0x416   : > { %s7122_s27 = sshllo.u32 %s4378_s18, %s6599_s22 }
 0x417   : > { %v3003_v48 = vld [vmem:[%s6863_s28] sm:%s7122_s27] }
 0x418   : > { %v3005_v49 = vld [vmem:[%s6863_s28 + $0x20] sm:%s7122_s27]  ;;  %3004 = vst [vmem:[%s6866_s4] sm:%s7122_s27] %v3003_v48 }
 0x419   : > { %3006 = vst [vmem:[%s6866_s4 + $0xc8] sm:%s7122_s27] %v3005_v49  ;;  %v3007_v50 = vld [vmem:[%s6863_s28 + $0x40] sm:%s7122_s27] }
 0x41a   : > { %v3009_v51 = vld [vmem:[%s6863_s28 + $0x60] sm:%s7122_s27]  ;;  %3008 = vst [vmem:[%s6866_s4 + $0x190] sm:%s7122_s27] %v3007_v50 }
 0x41b   : > { %3010 = vst [vmem:[%s6866_s4 + $0x258] sm:%s7122_s27] %v3009_v51  ;;  %v3011_v52 = vld [vmem:[%s6863_s28 + $0x80] sm:%s7122_s27] }
 0x41c   : > { %v3013_v53 = vld [vmem:[%s6863_s28 + $0xa0] sm:%s7122_s27]  ;;  %3012 = vst [vmem:[%s6866_s4 + $0x320] sm:%s7122_s27] %v3011_v52 }
 0x41d   : > { %3014 = vst [vmem:[%s6866_s4 + $0x3e8] sm:%s7122_s27] %v3013_v53  ;;  %v3015_v54 = vld [vmem:[%s6863_s28 + $0xc0] sm:%s7122_s27] }
 0x41e   : > { %v3017_v55 = vld [vmem:[%s6863_s28 + $0xe0] sm:%s7122_s27]  ;;  %3016 = vst [vmem:[%s6866_s4 + $0x4b0] sm:%s7122_s27] %v3015_v54 }
 0x41f   : > { %3018 = vst [vmem:[%s6866_s4 + $0x578] sm:%s7122_s27] %v3017_v55  ;;  %v3019_v56 = vld [vmem:[%s6863_s28 + $0x100] sm:%s7122_s27] }
 0x420   : > { %v3021_v57 = vld [vmem:[%s6863_s28 + $0x120] sm:%s7122_s27]  ;;  %3020 = vst [vmem:[%s6866_s4 + $0x640] sm:%s7122_s27] %v3019_v56 }
 0x421   : > { %3022 = vst [vmem:[%s6866_s4 + $0x708] sm:%s7122_s27] %v3021_v57  ;;  %v3023_v58 = vld [vmem:[%s6863_s28 + $0x140] sm:%s7122_s27] }
 0x422   : > { %v3025_v59 = vld [vmem:[%s6863_s28 + $0x160] sm:%s7122_s27]  ;;  %3024 = vst [vmem:[%s6866_s4 + $0x7d0] sm:%s7122_s27] %v3023_v58 }
 0x423   : > { %3026 = vst [vmem:[%s6866_s4 + $0x898] sm:%s7122_s27] %v3025_v59  ;;  %v3027_v60 = vld [vmem:[%s6863_s28 + $0x180] sm:%s7122_s27] }
 0x424   : > { %v3029_v61 = vld [vmem:[%s6863_s28 + $0x1a0] sm:%s7122_s27]  ;;  %3028 = vst [vmem:[%s6866_s4 + $0x960] sm:%s7122_s27] %v3027_v60 }
 0x425   : > { %3030 = vst [vmem:[%s6866_s4 + $0xa28] sm:%s7122_s27] %v3029_v61  ;;  %v3031_v62 = vld [vmem:[%s6863_s28 + $0x1c0] sm:%s7122_s27] }
 0x426   : > { %v3033_v63 = vld [vmem:[%s6863_s28 + $0x1e0] sm:%s7122_s27]  ;;  %3032 = vst [vmem:[%s6866_s4 + $0xaf0] sm:%s7122_s27] %v3031_v62 }
 0x427   : > { %3034 = vst [vmem:[%s6866_s4 + $0xbb8] sm:%s7122_s27] %v3033_v63 }
 0x428 PF: > { %p3478_p6 = scmp.ge.u32.totalorder %s6595_s19, 8 }
 0x429   : > { %s4379_s22 = smov (!%p3478_p6), 0  }
 0x42a   : > { %2525 = sbr.rel (%p3478_p6) target bundleno = 1084 (0x43c), region = 180  ;;  %s7190_s28 = sshllo.u32 (!%p3478_p6), %s4379_s22, %s6595_s19 }
 0x42b   : > { %v2535_v0 = vld [vmem:[%s6520_s11] sm:%s7190_s28] (!%p3478_p6) }
 0x42c   : > { %v2537_v1 = vld [vmem:[%s6520_s11 + $0x20] sm:%s7190_s28] (!%p3478_p6)  ;;  %2536 = vst [vmem:[%s6593_s0] sm:%s7190_s28] (!%p3478_p6), %v2535_v0 }
 0x42d   : > { %2538 = vst [vmem:[%s6593_s0 + $0xc8] sm:%s7190_s28] (!%p3478_p6), %v2537_v1  ;;  %v2539_v2 = vld [vmem:[%s6520_s11 + $0x40] sm:%s7190_s28] (!%p3478_p6) }
 0x42e   : > { %v2541_v3 = vld [vmem:[%s6520_s11 + $0x60] sm:%s7190_s28] (!%p3478_p6)  ;;  %2540 = vst [vmem:[%s6593_s0 + $0x190] sm:%s7190_s28] (!%p3478_p6), %v2539_v2 }
 0x42f   : > { %2542 = vst [vmem:[%s6593_s0 + $0x258] sm:%s7190_s28] (!%p3478_p6), %v2541_v3  ;;  %v2543_v4 = vld [vmem:[%s6520_s11 + $0x80] sm:%s7190_s28] (!%p3478_p6) }
 0x430   : > { %v2545_v5 = vld [vmem:[%s6520_s11 + $0xa0] sm:%s7190_s28] (!%p3478_p6)  ;;  %2544 = vst [vmem:[%s6593_s0 + $0x320] sm:%s7190_s28] (!%p3478_p6), %v2543_v4 }
 0x431   : > { %2546 = vst [vmem:[%s6593_s0 + $0x3e8] sm:%s7190_s28] %v2545_v5  ;;  %v2547_v6 = vld [vmem:[%s6520_s11 + $0xc0] sm:%s7190_s28] }
 0x432   : > { %v2549_v7 = vld [vmem:[%s6520_s11 + $0xe0] sm:%s7190_s28]  ;;  %2548 = vst [vmem:[%s6593_s0 + $0x4b0] sm:%s7190_s28] %v2547_v6 }
 0x433   : > { %2550 = vst [vmem:[%s6593_s0 + $0x578] sm:%s7190_s28] %v2549_v7  ;;  %v2551_v8 = vld [vmem:[%s6520_s11 + $0x100] sm:%s7190_s28] }
 0x434   : > { %v2553_v9 = vld [vmem:[%s6520_s11 + $0x120] sm:%s7190_s28]  ;;  %2552 = vst [vmem:[%s6593_s0 + $0x640] sm:%s7190_s28] %v2551_v8 }
 0x435   : > { %2554 = vst [vmem:[%s6593_s0 + $0x708] sm:%s7190_s28] %v2553_v9  ;;  %v2555_v10 = vld [vmem:[%s6520_s11 + $0x140] sm:%s7190_s28] }
 0x436   : > { %v2557_v11 = vld [vmem:[%s6520_s11 + $0x160] sm:%s7190_s28]  ;;  %2556 = vst [vmem:[%s6593_s0 + $0x7d0] sm:%s7190_s28] %v2555_v10 }
 0x437   : > { %2558 = vst [vmem:[%s6593_s0 + $0x898] sm:%s7190_s28] %v2557_v11  ;;  %v2559_v12 = vld [vmem:[%s6520_s11 + $0x180] sm:%s7190_s28] }
 0x438   : > { %v2561_v13 = vld [vmem:[%s6520_s11 + $0x1a0] sm:%s7190_s28]  ;;  %2560 = vst [vmem:[%s6593_s0 + $0x960] sm:%s7190_s28] %v2559_v12 }
 0x439   : > { %2562 = vst [vmem:[%s6593_s0 + $0xa28] sm:%s7190_s28] %v2561_v13  ;;  %v2563_v14 = vld [vmem:[%s6520_s11 + $0x1c0] sm:%s7190_s28] }
 0x43a   : > { %v2565_v15 = vld [vmem:[%s6520_s11 + $0x1e0] sm:%s7190_s28]  ;;  %2564 = vst [vmem:[%s6593_s0 + $0xaf0] sm:%s7190_s28] %v2563_v14 }
 0x43b   : > { %2566 = vst [vmem:[%s6593_s0 + $0xbb8] sm:%s7190_s28] %v2565_v15 }
 0x43c PF: > { %s13_s16 = sadd.s32 1, %s4180_s16   ;;  %s7335_s12 = smov %s4168_s13 }
 0x43d   : > { %p10_p12 = scmp.ge.s32.totalorder %s13_s16, 9   ;;  %s7336_s13 = smov %s4444_s23 }
 0x43e   : > { %s7337_s14 = smov %s4176_s15  ;;  %s7338_s15 = smov %s7340_s17 }
 0x43f   :  { %12 = sbr.rel (!%p10_p12) target bundleno = 5 (0x5), region = 459 }

</bundles_post_ra>
